<compile_context>
chip_gen: v6e
topology: v6e:2x2x1
jax: 0.10.0
libtpu: 0.0.40
codegen_flags: <defaults>
</compile_context>

<pallas_src>
import functools

import jax
import jax.numpy as jnp
import numpy as np
from jax.experimental import pallas as pl
from jax.experimental.pallas import tpu as pltpu

BN_EPS = 1e-5


# --------------------------------------------------------------------------
# Kernel 1/2: 3x3 conv (optionally preceded by folded-BN + ReLU) + BN partials
# --------------------------------------------------------------------------
def _conv3x3_bn_stats_kernel(x_ref, scale_ref, bias_ref, w_ref,
                             y_ref, sum_ref, sq_ref, pad_ref,
                             *, H, W, C, pre_act):
    """One batch image per grid step.

    x_ref:     (1, H*W, C)   input activation (flattened spatial, C on lanes)
    scale_ref: (1, C)        folded BN scale (used only when pre_act)
    bias_ref:  (1, C)        folded BN bias  (used only when pre_act)
    w_ref:     (9*C, C)      bf16 im2col weights, row = (dy*3 + dx)*C + ci
    y_ref:     (1, H*W, C)   fp32 conv output
    sum_ref:   (1, 1, C)     per-image channel sum of conv output
    sq_ref:    (1, 1, C)     per-image channel sum of squares
    pad_ref:   (H*W + 2*PADW, C) fp32 scratch (zero halos + activation)
    """
    M = H * W
    PADW = (pad_ref.shape[0] - M) // 2

    a = x_ref[0].astype(jnp.float32)                      # (M, C)
    if pre_act:
        # folded BatchNorm (single FMA) + ReLU of the previous conv output
        a = jnp.maximum(a * scale_ref[...] + bias_ref[...], 0.0)

    # Zero only the halo rows (they provide the H-direction zero padding of the
    # 3x3 conv); the interior is overwritten every step.
    zero_halo = jnp.zeros((PADW, C), jnp.float32)
    pad_ref[0:PADW, :] = zero_halo
    pad_ref[PADW + M:, :] = zero_halo
    pad_ref[PADW:PADW + M, :] = a

    # W-direction boundary masks (H-direction is handled by the zero halo).
    w_idx = jax.lax.broadcasted_iota(jnp.int32, (M, 1), 0) % W
    mask_l = w_idx == 0          # tap dx == 0 reads column w-1 -> invalid at w == 0
    mask_r = w_idx == W - 1      # tap dx == 2 reads column w+1 -> invalid at w == W-1

    # Build the im2col slab once: 9 shifted flat slices concatenated on lanes.
    taps = []
    for dy in range(3):
        for dx in range(3):
            start = PADW + (dy - 1) * W + (dx - 1)
            v = pad_ref[start:start + M, :]               # (M, C), static slice
            if dx == 0:
                v = jnp.where(mask_l, 0.0, v)
            elif dx == 2:
                v = jnp.where(mask_r, 0.0, v)
            taps.append(v)
    patches = jnp.concatenate(taps, axis=-1).astype(jnp.bfloat16)   # (M, 9*C)

    # Single fused MXU matmul: bf16 inputs, fp32 accumulation.
    acc = jnp.dot(patches, w_ref[...], preferred_element_type=jnp.float32)

    y_ref[0] = acc.astype(y_ref.dtype)
    sum_ref[0] = jnp.sum(acc, axis=0, keepdims=True)
    sq_ref[0] = jnp.sum(acc * acc, axis=0, keepdims=True)


def _conv_bn_stats_pass(x_flat, scale, bias, w_packed, H, W, *, pre_act):
    N, M, C = x_flat.shape
    padw = W + 8
    kernel = functools.partial(_conv3x3_bn_stats_kernel,
                               H=H, W=W, C=C, pre_act=pre_act)
    return pl.pallas_call(
        kernel,
        out_shape=(
            jax.ShapeDtypeStruct((N, M, C), jnp.float32),
            jax.ShapeDtypeStruct((N, 1, C), jnp.float32),
            jax.ShapeDtypeStruct((N, 1, C), jnp.float32),
        ),
        grid_spec=pltpu.PrefetchScalarGridSpec(
            num_scalar_prefetch=0,
            grid=(N,),
            in_specs=[
                pl.BlockSpec((1, M, C), lambda i: (i, 0, 0)),     # x (per image)
                pl.BlockSpec((1, C), lambda i: (0, 0)),           # folded scale
                pl.BlockSpec((1, C), lambda i: (0, 0)),           # folded bias
                pl.BlockSpec((9 * C, C), lambda i: (0, 0)),       # packed weights
            ],
            out_specs=[
                pl.BlockSpec((1, M, C), lambda i: (i, 0, 0)),     # conv output
                pl.BlockSpec((1, 1, C), lambda i: (i, 0, 0)),     # channel sum
                pl.BlockSpec((1, 1, C), lambda i: (i, 0, 0)),     # channel sum sq
            ],
            scratch_shapes=[pltpu.VMEM((M + 2 * padw, C), jnp.float32)],
        ),
        compiler_params=pltpu.CompilerParams(
            dimension_semantics=("parallel",)),
    )(x_flat, scale, bias, w_packed)


# --------------------------------------------------------------------------
# Kernel 3: folded BN2 + residual add + ReLU
# --------------------------------------------------------------------------
def _bn_residual_relu_kernel(y_ref, scale_ref, bias_ref, x_ref, o_ref):
    y = y_ref[0].astype(jnp.float32)
    out = jnp.maximum(
        y * scale_ref[...] + bias_ref[...] + x_ref[0].astype(jnp.float32), 0.0)
    o_ref[0] = out.astype(o_ref.dtype)


def _bn_residual_relu_pass(y_flat, scale, bias, x_flat):
    N, M, C = y_flat.shape
    return pl.pallas_call(
        _bn_residual_relu_kernel,
        out_shape=jax.ShapeDtypeStruct((N, M, C), jnp.float32),
        grid_spec=pltpu.PrefetchScalarGridSpec(
            num_scalar_prefetch=0,
            grid=(N,),
            in_specs=[
                pl.BlockSpec((1, M, C), lambda i: (i, 0, 0)),
                pl.BlockSpec((1, C), lambda i: (0, 0)),
                pl.BlockSpec((1, C), lambda i: (0, 0)),
                pl.BlockSpec((1, M, C), lambda i: (i, 0, 0)),
            ],
            out_specs=pl.BlockSpec((1, M, C), lambda i: (i, 0, 0)),
        ),
        compiler_params=pltpu.CompilerParams(
            dimension_semantics=("parallel",)),
    )(y_flat, scale, bias, x_flat)


# --------------------------------------------------------------------------
# Host-side glue
# --------------------------------------------------------------------------
def _fold_bn(sum_per_img, sq_per_img, count, gamma, beta):
    """Full-batch BN statistics (biased variance) folded into scale/bias FMA."""
    s = jnp.sum(sum_per_img, axis=0)            # (1, C)
    q = jnp.sum(sq_per_img, axis=0)             # (1, C)
    mean = s / count
    var = jnp.maximum(q / count - mean * mean, 0.0)
    scale = gamma * jax.lax.rsqrt(var + BN_EPS)
    bias = beta - mean * scale
    return scale, bias


def _pack_conv_weight(w_oihw):
    """PyTorch OIHW (Cout, Cin, 3, 3) -> (9*Cin, Cout) bf16, row = (dy*3+dx)*Cin + ci."""
    cout, cin, kh, kw = w_oihw.shape
    return jnp.transpose(w_oihw, (2, 3, 1, 0)).reshape(kh * kw * cin, cout) \
              .astype(jnp.bfloat16)


def basic_block_forward_nhwc(x_nhwc, params):
    """NHWC entry point (use this to chain blocks without per-layer transposes)."""
    w1, w2, g1, b1, g2, b2 = params             # w*: OIHW fp32; g*/b*: (C,)
    N, H, W, C = x_nhwc.shape
    M = H * W

    w1p, w2p = _pack_conv_weight(w1), _pack_conv_weight(w2)
    g1r, b1r = g1.reshape(1, C), b1.reshape(1, C)
    g2r, b2r = g2.reshape(1, C), b2.reshape(1, C)

    x_flat = x_nhwc.reshape(N, M, C).astype(jnp.float32)
    ones = jnp.ones((1, C), jnp.float32)
    zeros = jnp.zeros((1, C), jnp.float32)
    count = jnp.float32(N * M)

    # pass 1: conv1 + per-image BN1 partial statistics
    y1, s1, q1 = _conv_bn_stats_pass(x_flat, ones, zeros, w1p, H, W,
                                     pre_act=False)
    scale1, bias1 = _fold_bn(s1, q1, count, g1r, b1r)

    # pass 2: folded bn1 + relu -> conv2 + per-image BN2 partial statistics
    y2, s2, q2 = _conv_bn_stats_pass(y1, scale1, bias1, w2p, H, W,
                                     pre_act=True)
    scale2, bias2 = _fold_bn(s2, q2, count, g2r, b2r)

    # pass 3: folded bn2 + residual add + relu
    out = _bn_residual_relu_pass(y2, scale2, bias2, x_flat)
    return out.reshape(N, H, W, C)


def basic_block_forward(x_nchw, params):
    """NCHW wrapper matching the PyTorch module interface."""
    x_nhwc = jnp.transpose(x_nchw, (0, 2, 3, 1))
    out = basic_block_forward_nhwc(x_nhwc, params)
    return jnp.transpose(out, (0, 3, 1, 2))


# --------------------------------------------------------------------------
# Pure-JAX reference (fp32, NCHW, training-mode BN)
# --------------------------------------------------------------------------
def reference_basic_block(x, params):
    w1, w2, g1, b1, g2, b2 = params

    def conv(x, w):
        return jax.lax.conv_general_dilated(
            x, jnp.transpose(w, (2, 3, 1, 0)), (1, 1), ((1, 1), (1, 1)),
            dimension_numbers=("NCHW", "HWIO", "NCHW"))

    def bn(x, g, b):
        mean = jnp.mean(x, axis=(0, 2, 3), keepdims=True)
        var = jnp.mean(jnp.square(x - mean), axis=(0, 2, 3), keepdims=True)
        return (x - mean) * jax.lax.rsqrt(var + BN_EPS) * g.reshape(1, -1, 1, 1) \
               + b.reshape(1, -1, 1, 1)

    out = jax.nn.relu(bn(conv(x, w1), g1, b1))
    out = bn(conv(out, w2), g2, b2) + x
    return jax.nn.relu(out)


if __name__ == "__main__":
    key = jax.random.PRNGKey(0)
    N, C, H, W = 2, 32, 16, 16          # BasicBlock main path: in_channel == out_channel
    ks = jax.random.split(key, 7)

    x = jax.random.normal(ks[0], (N, C, H, W), jnp.float32)
    w1 = 0.1 * jax.random.normal(ks[1], (C, C, 3, 3), jnp.float32)   # PyTorch OIHW
    w2 = 0.1 * jax.random.normal(ks[2], (C, C, 3, 3), jnp.float32)
    g1 = 1.0 + 0.1 * jax.random.normal(ks[3], (C,), jnp.float32)
    b1 = 0.1 * jax.random.normal(ks[4], (C,), jnp.float32)
    g2 = 1.0 + 0.1 * jax.random.normal(ks[5], (C,), jnp.float32)
    b2 = 0.1 * jax.random.normal(ks[6], (C,), jnp.float32)
    params = (w1, w2, g1, b1, g2, b2)

    out = jax.block_until_ready(basic_block_forward(x, params))
    ref = reference_basic_block(x, params)

    # bf16 MXU inputs (fp32 accumulation) -> slightly looser tolerance than fp32.
    np.testing.assert_allclose(np.asarray(out), np.asarray(ref),
                               atol=5e-2, rtol=5e-2)
    print("KERNEL_OK")
</pallas_src>

<mosaic_0001>
module attributes {stable_mosaic.version = 11 : i64} {
  func.func @_conv3x3_bn_stats_kernel(%arg0: i32, %arg1: memref<1x256x32xf32, #tpu.memory_space<vmem>>, %arg2: memref<1x32xf32, #tpu.memory_space<vmem>>, %arg3: memref<1x32xf32, #tpu.memory_space<vmem>>, %arg4: memref<288x32xbf16, #tpu.memory_space<vmem>>, %arg5: memref<1x256x32xf32, #tpu.memory_space<vmem>>, %arg6: memref<1x1x32xf32, #tpu.memory_space<vmem>>, %arg7: memref<1x1x32xf32, #tpu.memory_space<vmem>>, %arg8: memref<304x32xf32, #tpu.memory_space<vmem>>) attributes {dimension_semantics = [#tpu.dimension_semantics<parallel>], iteration_bounds = array<i64: 2>, scalar_prefetch = 0 : i64, scratch_operands = 1 : i64, tpu.core_type = #tpu.core_type<tc>, window_params = [{transform_indices = @transform_0, window_bounds = array<i64: 1, 256, 32>}, {pipeline_mode = #tpu.pipeline_mode<synchronous>, transform_indices = @transform_1, window_bounds = array<i64: 1, 32>}, {pipeline_mode = #tpu.pipeline_mode<synchronous>, transform_indices = @transform_2, window_bounds = array<i64: 1, 32>}, {pipeline_mode = #tpu.pipeline_mode<synchronous>, transform_indices = @transform_3, window_bounds = array<i64: 288, 32>}, {transform_indices = @transform_4, window_bounds = array<i64: 1, 256, 32>}, {transform_indices = @transform_5, window_bounds = array<i64: 1, 1, 32>}, {transform_indices = @transform_6, window_bounds = array<i64: 1, 1, 32>}]} {
    %c0 = arith.constant 0 : index
    %c0_0 = arith.constant 0 : index
    %c0_1 = arith.constant 0 : index
    %0 = vector.load %arg1[%c0, %c0_0, %c0_1] : memref<1x256x32xf32, #tpu.memory_space<vmem>>, vector<1x256x32xf32>
    %1 = vector.shape_cast %0 : vector<1x256x32xf32> to vector<256x32xf32>
    %cst = arith.constant 0.000000e+00 : f32
    %2 = vector.broadcast %cst : f32 to vector<24x32xf32>
    %c0_2 = arith.constant 0 : index
    %c0_3 = arith.constant 0 : index
    %3 = vector.load %arg8[%c0_2, %c0_3] : memref<304x32xf32, #tpu.memory_space<vmem>>, vector<24x32xf32>
    tpu.vector_store %arg8[%c0_2, %c0_3], %2 {strides = array<i32>} : memref<304x32xf32, #tpu.memory_space<vmem>>, vector<24x32xf32>,
    %c280 = arith.constant 280 : index
    %c0_4 = arith.constant 0 : index
    %4 = vector.load %arg8[%c280, %c0_4] : memref<304x32xf32, #tpu.memory_space<vmem>>, vector<24x32xf32>
    tpu.vector_store %arg8[%c280, %c0_4], %2 {strides = array<i32>} : memref<304x32xf32, #tpu.memory_space<vmem>>, vector<24x32xf32>,
    %c24 = arith.constant 24 : index
    %c0_5 = arith.constant 0 : index
    %5 = vector.load %arg8[%c24, %c0_5] : memref<304x32xf32, #tpu.memory_space<vmem>>, vector<256x32xf32>
    tpu.vector_store %arg8[%c24, %c0_5], %1 {strides = array<i32>} : memref<304x32xf32, #tpu.memory_space<vmem>>, vector<256x32xf32>,
    %6 = tpu.iota {dimensions = array<i32: 0>} : vector<256x1xi32>
    %c16_i32 = arith.constant 16 : i32
    %c0_i32 = arith.constant 0 : i32
    %7 = arith.cmpi eq, %c16_i32, %c0_i32 : i32
    %c1_i32 = arith.constant 1 : i32
    %8 = arith.select %7, %c1_i32, %c16_i32 : i32
    %9 = vector.broadcast %8 : i32 to vector<256x1xi32>
    %10 = arith.remsi %6, %9 : vector<256x1xi32>
    %c0_i32_6 = arith.constant 0 : i32
    %11 = vector.broadcast %c0_i32_6 : i32 to vector<256x1xi32>
    %12 = arith.cmpi ne, %10, %11 : vector<256x1xi32>
    %c0_i32_7 = arith.constant 0 : i32
    %13 = vector.broadcast %c0_i32_7 : i32 to vector<256x1xi32>
    %14 = arith.cmpi slt, %10, %13 : vector<256x1xi32>
    %c0_i32_8 = arith.constant 0 : i32
    %15 = arith.cmpi slt, %8, %c0_i32_8 : i32
    %16 = vector.broadcast %15 : i1 to vector<256x1xi1>
    %17 = vector.broadcast %16 : vector<256x1xi1> to vector<256x1xi1>
    %18 = arith.xori %14, %17 : vector<256x1xi1>
    %19 = arith.andi %18, %12 : vector<256x1xi1>
    %20 = vector.broadcast %8 : i32 to vector<256x1xi32>
    %21 = arith.addi %10, %20 : vector<256x1xi32>
    %22 = arith.select %19, %21, %10 : vector<256x1xi1>, vector<256x1xi32>
    %c0_i32_9 = arith.constant 0 : i32
    %23 = vector.broadcast %c0_i32_9 : i32 to vector<256x1xi32>
    %24 = arith.cmpi eq, %22, %23 : vector<256x1xi32>
    %c15_i32 = arith.constant 15 : i32
    %25 = vector.broadcast %c15_i32 : i32 to vector<256x1xi32>
    %26 = arith.cmpi eq, %22, %25 : vector<256x1xi32>
    %c7 = arith.constant 7 : index
    %c0_10 = arith.constant 0 : index
    %27 = vector.load %arg8[%c7, %c0_10] : memref<304x32xf32, #tpu.memory_space<vmem>>, vector<256x32xf32>
    %cst_11 = arith.constant 0.000000e+00 : f32
    %28 = vector.shape_cast %24 : vector<256x1xi1> to vector<256x1xi1>
    %29 = vector.broadcast %28 : vector<256x1xi1> to vector<256x32xi1>
    %30 = vector.broadcast %cst_11 : f32 to vector<256x32xf32>
    %31 = arith.select %29, %30, %27 : vector<256x32xi1>, vector<256x32xf32>
    %c8 = arith.constant 8 : index
    %c0_12 = arith.constant 0 : index
    %32 = vector.load %arg8[%c8, %c0_12] : memref<304x32xf32, #tpu.memory_space<vmem>>, vector<256x32xf32>
    %c9 = arith.constant 9 : index
    %c0_13 = arith.constant 0 : index
    %33 = vector.load %arg8[%c9, %c0_13] : memref<304x32xf32, #tpu.memory_space<vmem>>, vector<256x32xf32>
    %cst_14 = arith.constant 0.000000e+00 : f32
    %34 = vector.shape_cast %26 : vector<256x1xi1> to vector<256x1xi1>
    %35 = vector.broadcast %34 : vector<256x1xi1> to vector<256x32xi1>
    %36 = vector.broadcast %cst_14 : f32 to vector<256x32xf32>
    %37 = arith.select %35, %36, %33 : vector<256x32xi1>, vector<256x32xf32>
    %c23 = arith.constant 23 : index
    %c0_15 = arith.constant 0 : index
    %38 = vector.load %arg8[%c23, %c0_15] : memref<304x32xf32, #tpu.memory_space<vmem>>, vector<256x32xf32>
    %cst_16 = arith.constant 0.000000e+00 : f32
    %39 = vector.shape_cast %24 : vector<256x1xi1> to vector<256x1xi1>
    %40 = vector.broadcast %39 : vector<256x1xi1> to vector<256x32xi1>
    %41 = vector.broadcast %cst_16 : f32 to vector<256x32xf32>
    %42 = arith.select %40, %41, %38 : vector<256x32xi1>, vector<256x32xf32>
    %c24_17 = arith.constant 24 : index
    %c0_18 = arith.constant 0 : index
    %43 = vector.load %arg8[%c24_17, %c0_18] : memref<304x32xf32, #tpu.memory_space<vmem>>, vector<256x32xf32>
    %c25 = arith.constant 25 : index
    %c0_19 = arith.constant 0 : index
    %44 = vector.load %arg8[%c25, %c0_19] : memref<304x32xf32, #tpu.memory_space<vmem>>, vector<256x32xf32>
    %cst_20 = arith.constant 0.000000e+00 : f32
    %45 = vector.shape_cast %26 : vector<256x1xi1> to vector<256x1xi1>
    %46 = vector.broadcast %45 : vector<256x1xi1> to vector<256x32xi1>
    %47 = vector.broadcast %cst_20 : f32 to vector<256x32xf32>
    %48 = arith.select %46, %47, %44 : vector<256x32xi1>, vector<256x32xf32>
    %c39 = arith.constant 39 : index
    %c0_21 = arith.constant 0 : index
    %49 = vector.load %arg8[%c39, %c0_21] : memref<304x32xf32, #tpu.memory_space<vmem>>, vector<256x32xf32>
    %cst_22 = arith.constant 0.000000e+00 : f32
    %50 = vector.shape_cast %24 : vector<256x1xi1> to vector<256x1xi1>
    %51 = vector.broadcast %50 : vector<256x1xi1> to vector<256x32xi1>
    %52 = vector.broadcast %cst_22 : f32 to vector<256x32xf32>
    %53 = arith.select %51, %52, %49 : vector<256x32xi1>, vector<256x32xf32>
    %c40 = arith.constant 40 : index
    %c0_23 = arith.constant 0 : index
    %54 = vector.load %arg8[%c40, %c0_23] : memref<304x32xf32, #tpu.memory_space<vmem>>, vector<256x32xf32>
    %c41 = arith.constant 41 : index
    %c0_24 = arith.constant 0 : index
    %55 = vector.load %arg8[%c41, %c0_24] : memref<304x32xf32, #tpu.memory_space<vmem>>, vector<256x32xf32>
    %cst_25 = arith.constant 0.000000e+00 : f32
    %56 = vector.shape_cast %26 : vector<256x1xi1> to vector<256x1xi1>
    %57 = vector.broadcast %56 : vector<256x1xi1> to vector<256x32xi1>
    %58 = vector.broadcast %cst_25 : f32 to vector<256x32xf32>
    %59 = arith.select %57, %58, %55 : vector<256x32xi1>, vector<256x32xf32>
    %60 = tpu.concatenate %31, %32, %37, %42, %43, %48, %53, %54, %59 in 1 : vector<256x32xf32>, vector<256x32xf32>, vector<256x32xf32>, vector<256x32xf32>, vector<256x32xf32>, vector<256x32xf32>, vector<256x32xf32>, vector<256x32xf32>, vector<256x32xf32> -> vector<256x288xf32>
    %61 = arith.truncf %60 : vector<256x288xf32> to vector<256x288xbf16>
    %c0_26 = arith.constant 0 : index
    %c0_27 = arith.constant 0 : index
    %62 = vector.load %arg4[%c0_26, %c0_27] : memref<288x32xbf16, #tpu.memory_space<vmem>>, vector<288x32xbf16>
    %cst_28 = arith.constant dense<0.000000e+00> : vector<256x32xf32>
    %63 = tpu.matmul %61, %62, %cst_28 {dimension_numbers = #tpu.dot_dimension_numbers<[1], [0], [0], [1], [0, 0, 1, 1], [], []>} : vector<256x288xbf16>, vector<288x32xbf16>, vector<256x32xf32> -> vector<256x32xf32>
    %c0_29 = arith.constant 0 : index
    %c0_30 = arith.constant 0 : index
    %c0_31 = arith.constant 0 : index
    %64 = vector.load %arg5[%c0_29, %c0_30, %c0_31] : memref<1x256x32xf32, #tpu.memory_space<vmem>>, vector<1x256x32xf32>
    %65 = vector.shape_cast %64 : vector<1x256x32xf32> to vector<256x32xf32>
    %66 = vector.shape_cast %63 : vector<256x32xf32> to vector<1x256x32xf32>
    tpu.vector_store %arg5[%c0_29, %c0_30, %c0_31], %66 {strides = array<i32>} : memref<1x256x32xf32, #tpu.memory_space<vmem>>, vector<1x256x32xf32>,
    %cst_32 = arith.constant dense<0.000000e+00> : vector<32xf32>
    %67 = vector.multi_reduction <add>, %63, %cst_32 [0] : vector<256x32xf32> to vector<32xf32>
    %68 = vector.shape_cast %67 : vector<32xf32> to vector<1x32xf32>
    %c0_33 = arith.constant 0 : index
    %c0_34 = arith.constant 0 : index
    %c0_35 = arith.constant 0 : index
    %69 = vector.load %arg6[%c0_33, %c0_34, %c0_35] : memref<1x1x32xf32, #tpu.memory_space<vmem>>, vector<1x1x32xf32>
    %70 = vector.shape_cast %69 : vector<1x1x32xf32> to vector<1x32xf32>
    %71 = vector.shape_cast %68 : vector<1x32xf32> to vector<1x1x32xf32>
    tpu.vector_store %arg6[%c0_33, %c0_34, %c0_35], %71 {strides = array<i32>} : memref<1x1x32xf32, #tpu.memory_space<vmem>>, vector<1x1x32xf32>,
    %72 = arith.mulf %63, %63 : vector<256x32xf32>
    %cst_36 = arith.constant dense<0.000000e+00> : vector<32xf32>
    %73 = vector.multi_reduction <add>, %72, %cst_36 [0] : vector<256x32xf32> to vector<32xf32>
    %74 = vector.shape_cast %73 : vector<32xf32> to vector<1x32xf32>
    %c0_37 = arith.constant 0 : index
    %c0_38 = arith.constant 0 : index
    %c0_39 = arith.constant 0 : index
    %75 = vector.load %arg7[%c0_37, %c0_38, %c0_39] : memref<1x1x32xf32, #tpu.memory_space<vmem>>, vector<1x1x32xf32>
    %76 = vector.shape_cast %75 : vector<1x1x32xf32> to vector<1x32xf32>
    %77 = vector.shape_cast %74 : vector<1x32xf32> to vector<1x1x32xf32>
    tpu.vector_store %arg7[%c0_37, %c0_38, %c0_39], %77 {strides = array<i32>} : memref<1x1x32xf32, #tpu.memory_space<vmem>>, vector<1x1x32xf32>,
    return
  }
  func.func @transform_0(%arg0: i32) -> (i32, i32, i32) {
    %c0_i32 = arith.constant 0 : i32
    %c0_i32_0 = arith.constant 0 : i32
    %c0_i32_1 = arith.constant 0 : i32
    return %arg0, %c0_i32, %c0_i32_0 : i32, i32, i32
  }
  func.func @transform_1(%arg0: i32) -> (i32, i32) {
    %c0_i32 = arith.constant 0 : i32
    %c0_i32_0 = arith.constant 0 : i32
    %c0_i32_1 = arith.constant 0 : i32
    return %c0_i32, %c0_i32_0 : i32, i32
  }
  func.func @transform_2(%arg0: i32) -> (i32, i32) {
    %c0_i32 = arith.constant 0 : i32
    %c0_i32_0 = arith.constant 0 : i32
    %c0_i32_1 = arith.constant 0 : i32
    return %c0_i32, %c0_i32_0 : i32, i32
  }
  func.func @transform_3(%arg0: i32) -> (i32, i32) {
    %c0_i32 = arith.constant 0 : i32
    %c0_i32_0 = arith.constant 0 : i32
    %c0_i32_1 = arith.constant 0 : i32
    return %c0_i32, %c0_i32_0 : i32, i32
  }
  func.func @transform_4(%arg0: i32) -> (i32, i32, i32) {
    %c0_i32 = arith.constant 0 : i32
    %c0_i32_0 = arith.constant 0 : i32
    %c0_i32_1 = arith.constant 0 : i32
    return %arg0, %c0_i32, %c0_i32_0 : i32, i32, i32
  }
  func.func @transform_5(%arg0: i32) -> (i32, i32, i32) {
    %c0_i32 = arith.constant 0 : i32
    %c0_i32_0 = arith.constant 0 : i32
    %c0_i32_1 = arith.constant 0 : i32
    return %arg0, %c0_i32, %c0_i32_0 : i32, i32, i32
  }
  func.func @transform_6(%arg0: i32) -> (i32, i32, i32) {
    %c0_i32 = arith.constant 0 : i32
    %c0_i32_0 = arith.constant 0 : i32
    %c0_i32_1 = arith.constant 0 : i32
    return %arg0, %c0_i32, %c0_i32_0 : i32, i32, i32
  }
}

</mosaic_0001>

<bundles_post_ra>
// kernel: tpu_custom_call.1
= control target key start
LH: loop header
LB: loop body
LE: loop exit
PB: predicated region body
PF: predicated region fallthrough
CT: control target
= control target key end

     0   :  { %12 = vsyncpa [#allocation4], 0  ;;  %s5734_s0 = inlined_call_operand.vmem [shape: f32[2,256,32], index: 0, kind: input, shape index: {}]   ;;  %s5735_s1 = inlined_call_operand.vmem [shape: f32[1,32], index: 1, kind: input, shape index: {}]   ;;  %s5736_s2 = inlined_call_operand.vmem [shape: f32[1,32], index: 2, kind: input, shape index: {}]   ;;  %s5737_s3 = inlined_call_operand.vmem [shape: bf16[288,32], index: 3, kind: input, shape index: {}]   ;;  %s5738_s4 = inlined_call_operand.vmem [shape: f32[2,256,32], index: 4, kind: output, shape index: {0}]   ;;  %s5739_s5 = inlined_call_operand.hbm [shape: f32[2,1,32], index: 5, kind: output, shape index: {1}]   ;;  %s5740_s6 = inlined_call_operand.hbm [shape: f32[2,1,32], index: 6, kind: output, shape index: {2}]  }
   0x1   :  { %14 = vsyncpa [#allocation4 + $0x1], 0 }
   0x2   :  { %15 = vsyncpa [#allocation6], 0 }
   0x3   :  { %17 = vsyncpa [#allocation6 + $0x1], 0  ;;  %s4072_s1 = smov 0   ;;  %s4074_s21 = smov 0  }
   0x4   :  { %s4076_s2 = smov 0   ;;  %s4078_s22 = smov 0  }
   0x5 LB: > { %s4093_s23 = sadd.s32 4294967295, %s4029_s22   ;;  %s3099_s24 = sadd.s32 4294967294, %s4029_s22   ;;  %s4029_s22 = sphi %s4078_s22, %s6164_s22   ;;  %s4025_s2 = sphi %s4076_s2, %s6163_s2   ;;  %s4021_s21 = sphi %s4074_s21, %s6162_s21   ;;  %s4017_s1 = sphi %s4072_s1, %s6161_s1  }
   0x6   : > { %s4097_s25 = sadd.s32 1, %s4029_s22   ;;  %s145_s26 = sadd.s32 1, %s4025_s2 }
   0x7   : > { %s142_s27 = ssub.s32 %s4029_s22, %s4097_s25  ;;  %p155_p0 = scmp.ne.s32.totalorder %s4025_s2, %s4021_s21 }
   0x8   : > { %p143_p1 = scmp.eq.s32.totalorder %s142_s27, 0  ;;  %p156_p2 = scmp.eq.s32.totalorder %s4093_s23, 1 }
   0x9   : > { %p161_p3 = scmp.ne.s32.totalorder %s4021_s21, %s4017_s1  ;;  %p162_p4 = scmp.eq.s32.totalorder %s3099_s24, 1 }
   0xa   : > { %s4108_s28 = scalar_select %p143_p1, %s4025_s2, %s145_s26  }
   0xb   : > { %p4110_p5 = por %p156_p2, %p155_p0  ;;  %p4114_p6 = por %p162_p4, %p161_p3 }
   0xc   : > { %p3102_p7 = scmp.ge.s32.totalorder %s4029_s22, 1  ;;  %p223_p8 = scmp.lt.s32.totalorder %s4029_s22, 3 }
   0xe   : > { %p224_p9 = pnand %p3102_p7, %p223_p8 }
  0x10   : > { %227 = sbr.rel (%p224_p9) target bundleno = 622 (0x26e), region = 36 }
  0x15   : > { %vm5741_vm0 = vcmask 261120   ;;  %p261_p10 = scmp.lt.s32.totalorder %s4093_s23, 1  ;;  %v343_v0 = vlaneseq  ;;  %v4031_v1 = vmov 0.0   ;;  %v3857_v2 = vld [vmem:[%s5737_s3 + $0x78] sm:$0xff]   ;;  %v3859_v5 = vld [vmem:[%s5737_s3 + $0x70] sm:$0xff]   ;;  %s4032_s20 = smov 32  }
  0x16   : > { %306 = vst.msk [vmem:[#allocation2 + $0x8] sm:$0xff] %vm5741_vm0, %v4031_v1  ;;  %307 = vst.msk [vmem:[#allocation2 + $0x10] sm:$0xff] %vm5741_vm0, %v4031_v1  ;;  %v3858_v3 = vld [vmem:[%s5737_s3 + $0x38] sm:$0xff]   ;;  %3147 = vmatprep.subr.bf16.mxu0 %v3857_v2  ;;  %3313 = vmatprep.subr.bf16.mxu1 %v3857_v2  ;;  %v3860_v6 = vld [vmem:[%s5737_s3 + $0x30] sm:$0xff]   ;;  %v5772_v34 = vmov 0  ;;  %s4033_s24 = smov 96  }
  0x17   : > { %305 = vst.msk [vmem:[#allocation2] sm:$0xff] %vm5741_vm0, %v4031_v1  ;;  %308 = vst.msk [vmem:[#allocation2 + $0x118] sm:$0xff] %vm5741_vm0, %v4031_v1  ;;  %s4134_s11 = scalar_select %p261_p10, %s4093_s23, 1  ;;  %v4136_v4 = vshrl.u32 %v343_v0, 7  ;;  %3148 = vmatpush3.bf16.msra.mxu0 %v3858_v3  ;;  %3321 = vmatpush3.bf16.msra.mxu1 %v3858_v3  ;;  %v5827_v0 = vmov 0 }
  0x18   : > { %309 = vst.msk [vmem:[#allocation2 + $0x120] sm:$0xff] %vm5741_vm0, %v4031_v1  ;;  %310 = vst.msk [vmem:[#allocation2 + $0x128] sm:$0xff] %vm5741_vm0, %v4031_v1  ;;  %3149 = vmatprep.subr.bf16.mxu0 %v3859_v5  ;;  %3314 = vmatprep.subr.bf16.mxu1 %v3859_v5  ;;  %s4034_s26 = smov 64   ;;  %s4035_s10 = smov [#allocation3]  }
  0x19   : > { %s3145_s14 = sshll.u32 %s4134_s11, 8  ;;  %v345_v7 = vadd.s32 8, %v4136_v4  ;;  %v347_v13 = vadd.s32 24, %v4136_v4  ;;  %v380_v22 = vand.u32 15, %v4136_v4  ;;  %v346_v27 = vadd.s32 16, %v4136_v4  ;;  %s5650_s11 = sand.u32 1, %s4021_s21  }
  0x1a   : > { %s4150_s19 = scalar_lea.vmem %s5734_s0, %s3145_s14  ;;  %v369_v63 = vadd.s32 200, %v4136_v4  ;;  %s254_s12 = scalar_lea.vmem [#allocation3], %s5650_s11 }
  0x1b   : > { %v274_v8 = vld [vmem:[%s4150_s19 + $0x10] sm:$0xff]  ;;  %v275_v9 = vld [vmem:[%s4150_s19 + $0x18] sm:$0xff]  ;;  %v272_v10 = vld [vmem:[%s4150_s19] sm:$0xff]  ;;  %3150 = vmatpush3.bf16.msra.mxu0 %v3860_v6  ;;  %3322 = vmatpush3.bf16.msra.mxu1 %v3860_v6  ;;  %v387_v18 = vand.u32 15, %v345_v7  ;;  %v401_v26 = vand.u32 15, %v347_v13  ;;  %vm4205_vm2 = vcmp.eq.s32.totalorder %v380_v22, 0 }
  0x1c   : > { %313 = vst.msk [vmem:[#allocation2 + $0x28] sm:$0xff] %vm5741_vm0, %v274_v8  ;;  %314 = vst.msk [vmem:[#allocation2 + $0x30] sm:$0xff] %vm5741_vm0, %v275_v9  ;;  %v273_v11 = vld [vmem:[%s4150_s19 + $0x8] sm:$0xff]  ;;  %v276_v12 = vld [vmem:[%s4150_s19 + $0x20] sm:$0xff]  ;;  %v394_v46 = vand.u32 15, %v346_v27  ;;  %v555_v9 = vand.u32 15, %v369_v63 }
  0x1d   : > { %311 = vst.msk [vmem:[#allocation2 + $0x18] sm:$0xff] %vm5741_vm0, %v272_v10  ;;  %v277_v14 = vld [vmem:[%s4150_s19 + $0x28] sm:$0xff]  ;;  %v953_v16 = vld [vmem:[#allocation2 + $0x10] sm:$0xff]  ;;  %312 = vst.msk [vmem:[#allocation2 + $0x20] sm:$0xff] %vm5741_vm0, %v273_v11  ;;  %vm4190_vm1 = vcmp.eq.s32.totalorder %v387_v18, 15  ;;  %vm4217_vm3 = vcmp.eq.s32.totalorder %v401_v26, 15 }
  0x1e   : > { %v952_v15 = vld [vmem:[#allocation2 + $0x8] sm:$0xff]  ;;  %315 = vst.msk [vmem:[#allocation2 + $0x38] sm:$0xff] %vm5741_vm0, %v276_v12  ;;  %316 = vst.msk [vmem:[#allocation2 + $0x40] sm:$0xff] %vm5741_vm0, %v277_v14  ;;  %v296_v19 = vld [vmem:[%s4150_s19 + $0xc0] sm:$0xff]  ;;  %v5773_v34 = vsel %vm4190_vm1, 4294967295, %v5772_v34  ;;  %vm4242_vm4 = vcmp.eq.s32.totalorder %v394_v46, 0 }
  0x1f   : > { %v3377_v17 = vpack.i.bf16 %v953_v16, %v952_v15  ;;  %v297_v20 = vld [vmem:[%s4150_s19 + $0xc8] sm:$0xff]  ;;  %v298_v21 = vld [vmem:[%s4150_s19 + $0xd0] sm:$0xff]  ;;  %335 = vst.msk [vmem:[#allocation2 + $0xd8] sm:$0xff] %vm5741_vm0, %v296_v19  ;;  %v299_v23 = vld [vmem:[%s4150_s19 + $0xd8] sm:$0xff]  ;;  %v368_v10 = vadd.s32 192, %v4136_v4  ;;  %vm4284_vm5 = vcmp.eq.s32.totalorder %v555_v9, 15 }
  0x20   : > { %336 = vst.msk [vmem:[#allocation2 + $0xe0] sm:$0xff] %vm5741_vm0, %v297_v20  ;;  %337 = vst.msk [vmem:[#allocation2 + $0xe8] sm:$0xff] %vm5741_vm0, %v298_v21  ;;  %v294_v24 = vld [vmem:[%s4150_s19 + $0xb0] sm:$0xff]  ;;  %v295_v25 = vld [vmem:[%s4150_s19 + $0xb8] sm:$0xff]  ;;  %v5781_v19 = vmov 0  ;;  %v349_v22 = vadd.s32 40, %v4136_v4 }
  0x21   : > { %3378 = vrot.lane.b32.xlu0 %v3377_v17, %s4032_s20  ;;  %338 = vst.msk [vmem:[#allocation2 + $0xf0] sm:$0xff] %vm5741_vm0, %v299_v23  ;;  %333 = vst.msk [vmem:[#allocation2 + $0xc8] sm:$0xff] %vm5741_vm0, %v294_v24  ;;  %v278_v28 = vld [vmem:[%s4150_s19 + $0x30] sm:$0xff]  ;;  %v279_v29 = vld [vmem:[%s4150_s19 + $0x38] sm:$0xff]  ;;  %v5782_v19 = vsel %vm4284_vm5, 4294967295, %v5781_v19  ;;  %v548_v21 = vand.u32 15, %v368_v10 }
  0x22   : > { %334 = vst.msk [vmem:[#allocation2 + $0xd0] sm:$0xff] %vm5741_vm0, %v295_v25  ;;  %v300_v30 = vld [vmem:[%s4150_s19 + $0xe0] sm:$0xff]  ;;  %317 = vst.msk [vmem:[#allocation2 + $0x48] sm:$0xff] %vm5741_vm0, %v278_v28  ;;  %v301_v31 = vld [vmem:[%s4150_s19 + $0xe8] sm:$0xff]  ;;  %v373_v23 = vadd.s32 232, %v4136_v4  ;;  %s2978_s13 = sshll.u32 %s254_s12, 4  ;;  %s5662_s13 = int_to_ptr.vmem [resolvable:$true] %s2978_s13 }
  0x23   : > { %318 = vst.msk [vmem:[#allocation2 + $0x50] sm:$0xff] %vm5741_vm0, %v279_v29  ;;  %339 = vst.msk [vmem:[#allocation2 + $0xf8] sm:$0xff] %vm5741_vm0, %v300_v30  ;;  %v280_v32 = vld [vmem:[%s4150_s19 + $0x40] sm:$0xff]  ;;  %v281_v33 = vld [vmem:[%s4150_s19 + $0x48] sm:$0xff]  ;;  %vm4304_vm6 = vcmp.eq.s32.totalorder %v548_v21, 0  ;;  %s260_s15 = scalar_lea.vmem [#allocation5], %s5650_s11 }
  0x24   : > { %340 = vst.msk [vmem:[#allocation2 + $0x100] sm:$0xff] %vm5741_vm0, %v301_v31  ;;  %319 = vst.msk [vmem:[#allocation2 + $0x58] sm:$0xff] %vm5741_vm0, %v280_v32  ;;  %v302_v35 = vld [vmem:[%s4150_s19 + $0xf0] sm:$0xff]  ;;  %v303_v36 = vld [vmem:[%s4150_s19 + $0xf8] sm:$0xff]  ;;  %v415_v31 = vand.u32 15, %v349_v22  ;;  %s2991_s16 = sshll.u32 %s260_s15, 4  ;;  %s5670_s16 = int_to_ptr.vmem [resolvable:$true] %s2991_s16 }
  0x25   : > { %320 = vst.msk [vmem:[#allocation2 + $0x60] sm:$0xff] %vm5741_vm0, %v281_v33  ;;  %v4199_v37 = vld [vmem:[#allocation2 + $0x28] sm:$0xff]  ;;  %v4201_v38 = vld [vmem:[#allocation2 + $0x30] sm:$0xff]  ;;  %v4203_v39 = vld [vmem:[#allocation2 + $0x18] sm:$0xff]  ;;  %v583_v33 = vand.u32 15, %v373_v23  ;;  %s2959_s8 = scalar_lea.sflag [#allocation4], %s5650_s11 }
  0x26   : > { %341 = vst.msk [vmem:[#allocation2 + $0x108] sm:$0xff] %vm5741_vm0, %v302_v35  ;;  %342 = vst.msk [vmem:[#allocation2 + $0x110] sm:$0xff] %vm5741_vm0, %v303_v36  ;;  %v4213_v41 = vpack.i.bf16 %v4201_v38, %v4199_v37  ;;  %v4215_v42 = vld [vmem:[#allocation2 + $0x20] sm:$0xff]  ;;  %v829_v50 = vld [vmem:[#allocation2 + $0x2f] sm:$0xff]  ;;  %vm4325_vm7 = vcmp.eq.s32.totalorder %v415_v31, 15  ;;  %s3939_s9 = scalar_lea.vmem %s5662_s13, 16 }
  0x27   : > { %v986_v43 = vld [vmem:[#allocation2 + $0x19] sm:$0xff]  ;;  %v987_v44 = vld [vmem:[#allocation2 + $0x21] sm:$0xff]  ;;  %v3387_v47 = vpack.i.bf16 %v4215_v42, %v4203_v39  ;;  %v4232_v53 = vld [vmem:[#allocation2 + $0x31] sm:$0xff]  ;;  %5783 = vst [vmem:[#allocation10_spill] sm:$0xff] %v5782_v19  ;;  %vm4332_vm8 = vcmp.eq.s32.totalorder %v583_v33, 15  ;;  %p3940_p11 = scmp.ne.s32.totalorder %s5662_s13, %s3939_s9 }
  0x28   : > { %v1151_v48 = vsel %vm4190_vm1, 0.0, %v987_v44  ;;  %v4225_v49 = vld [vmem:[#allocation2 + $0x27] sm:$0xff]  ;;  %3383 = vrot.lane.b32.xlu0 %v4213_v41, %s4033_s24  ;;  %v985_v54 = vld [vmem:[#allocation2 + $0x11] sm:$0xff]  ;;  %v1153_v57 = vsel %vm4217_vm3, 0.0, %v4232_v53  ;;  %v4257_v3 = vld [vmem:[#allocation2 + $0x3f] sm:$0xff]  ;;  %v1083_v18 = vsel %vm4217_vm3, 0.0, %v987_v44 }
  0x29   : > { %v3392_v51 = vpack.i.bf16 %v1151_v48, %v986_v43  ;;  %v1184_v52 = vsel %vm4205_vm2, 0.0, %v4225_v49  ;;  %3388 = vrot.lane.b32.xlu1 %v3387_v47, %s4032_s20  ;;  %v4235_v56 = vld [vmem:[#allocation2 + $0x29] sm:$0xff]  ;;  %v1081_v59 = vsel %vm4190_vm1, 0.0, %v985_v54  ;;  %v4246_v61 = vld [vmem:[#allocation2 + $0x37] sm:$0xff]  ;;  %v4262_v6 = vld [vmem:[#allocation2 + $0x41] sm:$0xff]  ;;  %v3427_v25 = vpack.i.bf16 %v1083_v18, %v986_v43  ;;  %p3941_p12 = pnand %p3940_p11, %p4110_p5 }
  0x2a   : > { %v3397_v55 = vpack.i.bf16 %v829_v50, %v1184_v52  ;;  %v984_v58 = vld [vmem:[#allocation2 + $0x9] sm:$0xff]  ;;  %v4248_v62 = vld [vmem:[#allocation2 + $0x17] sm:$0xff]  ;;  %v3412_v1 = vpack.i.bf16 %v1153_v57, %v4235_v56  ;;  %v1186_v5 = vsel %vm4242_vm4, 0.0, %v4246_v61  ;;  %v4264_v7 = vld [vmem:[#allocation2 + $0x1f] sm:$0xff]  ;;  %v1223_v12 = vsel %vm4217_vm3, 0.0, %v4262_v6 }
  0x2b   : > { %v3402_v2 = vpack.i.bf16 %v1081_v59, %v984_v58  ;;  %v1114_v8 = vsel %vm4205_vm2, 0.0, %v4248_v62  ;;  %v4270_v11 = vld [vmem:[#allocation2 + $0x39] sm:$0xff]  ;;  %v3417_v14 = vpack.i.bf16 %v4257_v3, %v1186_v5  ;;  %v4288_v20 = vld [vmem:[#allocation2 + $0xe1] sm:$0xff]  ;;  %v1116_v28 = vsel %vm4242_vm4, 0.0, %v4225_v49  ;;  %v282_v32 = vld [vmem:[%s4150_s19 + $0x50] sm:$0xff]  ;;  %p3942_p13 = pneg %p3941_p12 }
  0x2c   : > { %3393 = vrot.lane.b32.xlu0 %v3392_v51, %s4032_s20  ;;  %v4276_v13 = vpack.c.bf16 %v1223_v12, %v4270_v11  ;;  %v3407_v15 = vpack.i.bf16 %v4264_v7, %v1114_v8  ;;  %v958_v16 = vld [vmem:[#allocation2 + $0x38] sm:$0xff]  ;;  %v959_v17 = vld [vmem:[#allocation2 + $0x40] sm:$0xff]  ;;  %v1175_v27 = vsel %vm4284_vm5, 0.0, %v4288_v20  ;;  %321 = vst.msk [vmem:[#allocation2 + $0x68] sm:$0xff] %vm5741_vm0, %v282_v32  ;;  %v3432_v43 = vpack.i.bf16 %v829_v50, %v1116_v28  ;;  %v4317_v44 = vld [vmem:[#allocation2 + $0xef] sm:$0xff] }
  0x2d   : > { %3398 = vrot.lane.b32.xlu1 %v3397_v55, %s4034_s26  ;;  %v4293_v24 = vpack.i.bf16 %v959_v17, %v958_v16  ;;  %v4296_v26 = vld [vmem:[#allocation2 + $0xd9] sm:$0xff]  ;;  %v4308_v30 = vld [vmem:[#allocation2 + $0xe7] sm:$0xff]  ;;  %v348_v47 = vadd.s32 32, %v4136_v4  ;;  %v977_v51 = vld [vmem:[#allocation2 + $0xd0] sm:$0xff]  ;;  %v5786_v52 = vmov 0  ;;  %v1155_v5 = vsel %vm4325_vm7, 0.0, %v4262_v6 }
  0x2e   : > { %5780 = vst [vmem:[#allocation9_spill] sm:$0xff] %v4276_v13  ;;  %v3437_v35 = vpack.i.bf16 %v1175_v27, %v4296_v26  ;;  %v283_v36 = vld [vmem:[%s4150_s19 + $0x58] sm:$0xff]  ;;  %v1208_v45 = vsel %vm4304_vm6, 0.0, %v4308_v30  ;;  %v976_v46 = vld [vmem:[#allocation2 + $0xc8] sm:$0xff]  ;;  %v284_v48 = vld [vmem:[%s4150_s19 + $0x60] sm:$0xff]  ;;  %v5787_v52 = vsel %vm4325_vm7, 4294967295, %v5786_v52 }
  0x2f   : > { %322 = vst.msk [vmem:[#allocation2 + $0x70] sm:$0xff] %vm5741_vm0, %v283_v36  ;;  %5788 = vst [vmem:[#allocation11_spill] sm:$0xff] %v5787_v52  ;;  %v1009_v54 = vld [vmem:[#allocation2 + $0xd1] sm:$0xff]  ;;  %v3861_v57 = vld [vmem:[%s5737_s3 + $0x68] sm:$0xff]   ;;  %v3447_v58 = vpack.i.bf16 %v4317_v44, %v1208_v45  ;;  %v408_v8 = vand.u32 15, %v348_v47  ;;  %v371_v16 = vadd.s32 216, %v4136_v4 }
  0x30   : > { %3413 = vrot.lane.b32.xlu0 %v3412_v1, %s4032_s20  ;;  %v4329_v50 = vld [vmem:[#allocation2 + $0x111] sm:$0xff]  ;;  %323 = vst.msk [vmem:[#allocation2 + $0x78] sm:$0xff] %vm5741_vm0, %v284_v48  ;;  %v4341_v59 = vld [vmem:[#allocation2 + $0x109] sm:$0xff]  ;;  %3151 = vmatprep.subr.bf16.mxu0 %v3861_v57  ;;  %v3863_v27 = vld [vmem:[%s5737_s3 + $0x60] sm:$0xff]  }
  0x31   : > { %3403 = vrot.lane.b32.xlu1 %v3402_v2, %s4034_s26  ;;  %v1249_v63 = vsel %vm4332_vm8, 0.0, %v4329_v50  ;;  %v285_v1 = vld [vmem:[%s4150_s19 + $0x68] sm:$0xff]  ;;  %v3442_v2 = vpack.i.bf16 %v977_v51, %v976_v46  ;;  %3315 = vmatprep.subr.bf16.mxu1 %v3861_v57  ;;  %vm4364_vm9 = vcmp.eq.s32.totalorder %v408_v8, 0  ;;  %v981_v23 = vld [vmem:[#allocation2 + $0xf0] sm:$0xff]  ;;  %v3864_v28 = vld [vmem:[%s5737_s3 + $0x20] sm:$0xff]   ;;  %v569_v33 = vand.u32 15, %v371_v16 }
  0x32   : > { %v4352_v9 = vpack.c.bf16 %v1249_v63, %v4341_v59  ;;  %324 = vst.msk [vmem:[#allocation2 + $0x80] sm:$0xff] %vm5741_vm0, %v285_v1  ;;  %v3862_v10 = vld [vmem:[%s5737_s3 + $0x28] sm:$0xff]   ;;  %v3865_v46 = vld [vmem:[%s5737_s3 + $0x58] sm:$0xff]   ;;  %v286_v47 = vld [vmem:[%s4150_s19 + $0x70] sm:$0xff] }
  0x33   : > { %v1008_v12 = vld [vmem:[#allocation2 + $0xc9] sm:$0xff]  ;;  %3152 = vmatpush3.bf16.msra.mxu0 %v3862_v10  ;;  %3323 = vmatpush3.bf16.msra.mxu1 %v3862_v10  ;;  %325 = vst.msk [vmem:[#allocation2 + $0x88] sm:$0xff] %vm5741_vm0, %v286_v47  ;;  %v4399_v57 = vld [vmem:[#allocation2 + $0xf1] sm:$0xff]  ;;  %vm4407_vm10 = vcmp.eq.s32.totalorder %v569_v33, 15  ;;  %v1085_v10 = vsel %vm4325_vm7, 0.0, %v4232_v53  ;;  %v4449_v33 = vld [vmem:[#allocation2 + $0xff] sm:$0xff] }
  0x34   : > { %3418 = vrot.lane.b32.xlu0 %v3417_v14, %s4034_s26  ;;  %5791 = vst [vmem:[#allocation12_spill] sm:$0xff] %v4352_v9  ;;  %v1105_v14 = vsel %vm4284_vm5, 0.0, %v1009_v54  ;;  %v980_v18 = vld [vmem:[#allocation2 + $0xe8] sm:$0xff]  ;;  %3153 = vmatprep.subr.bf16.mxu0 %v3863_v27  ;;  %v961_v51 = vld [vmem:[#allocation2 + $0x50] sm:$0xff]  ;;  %v3866_v63 = vld [vmem:[%s5737_s3 + $0x18] sm:$0xff]   ;;  %v3482_v53 = vpack.i.bf16 %v1085_v10, %v4235_v56 }
  0x35   : > { %3408 = vrot.lane.b32.xlu1 %v3407_v15, %s4033_s24  ;;  %v3457_v15 = vpack.i.bf16 %v1155_v5, %v4270_v11  ;;  %v3452_v17 = vpack.i.bf16 %v1105_v14, %v1008_v12  ;;  %v4368_v22 = vld [vmem:[#allocation2 + $0x47] sm:$0xff]  ;;  %v4379_v31 = vld [vmem:[#allocation2 + $0x4f] sm:$0xff]  ;;  %v4386_v36 = vpack.i.bf16 %v981_v23, %v980_v18  ;;  %3316 = vmatprep.subr.bf16.mxu1 %v3863_v27  ;;  %v287_v8 = vld [vmem:[%s4150_s19 + $0x78] sm:$0xff]  ;;  %v1118_v23 = vsel %vm4364_vm9, 0.0, %v4246_v61 }
  0x36   : > { %v1188_v32 = vsel %vm4364_vm9, 0.0, %v4368_v22  ;;  %v960_v48 = vld [vmem:[#allocation2 + $0x48] sm:$0xff]  ;;  %v3867_v5 = vld [vmem:[%s5737_s3 + $0x50] sm:$0xff]   ;;  %326 = vst.msk [vmem:[#allocation2 + $0x90] sm:$0xff] %vm5741_vm0, %v287_v8  ;;  %v288_v18 = vld [vmem:[%s4150_s19 + $0x80] sm:$0xff]  ;;  %v3492_v47 = vpack.i.bf16 %v4257_v3, %v1118_v23  ;;  %v5799_v3 = vmov 0 }
  0x37   : > { %3154 = vmatpush3.bf16.msra.mxu0 %v3864_v28  ;;  %3324 = vmatpush3.bf16.msra.mxu1 %v3864_v28  ;;  %v3477_v54 = vpack.i.bf16 %v4379_v31, %v1188_v32  ;;  %v3868_v12 = vld [vmem:[%s5737_s3 + $0x10] sm:$0xff]   ;;  %v3869_v14 = vld [vmem:[%s5737_s3 + $0x48] sm:$0xff]   ;;  %327 = vst.msk [vmem:[#allocation2 + $0x98] sm:$0xff] %vm5741_vm0, %v288_v18  ;;  %v291_v8 = vld [vmem:[%s4150_s19 + $0x98] sm:$0xff]  ;;  %v1107_v23 = vsel %vm4407_vm10, 0.0, %v4288_v20  ;;  %v372_v20 = vadd.s32 224, %v4136_v4 }
  0x38   : > { %3423 = vrot.lane.b32.xlu0 %v4293_v24, %s4033_s24  ;;  %3155 = vmatprep.subr.bf16.mxu0 %v3865_v46  ;;  %v4430_v16 = vld [vmem:[#allocation2 + $0xe9] sm:$0xff]  ;;  %v4443_v28 = vld [vmem:[#allocation2 + $0xf7] sm:$0xff]  ;;  %330 = vst.msk [vmem:[#allocation2 + $0xb0] sm:$0xff] %vm5741_vm0, %v291_v8  ;;  %v292_v10 = vld [vmem:[%s4150_s19 + $0xa0] sm:$0xff]  ;;  %v355_v18 = vadd.s32 88, %v4136_v4 }
  0x39   : > { %3428 = vrot.lane.b32.xlu1 %v3427_v25, %s4034_s26  ;;  %v4370_v25 = vld [vmem:[#allocation2 + $0xd7] sm:$0xff]  ;;  %3317 = vmatprep.subr.bf16.mxu1 %v3865_v46  ;;  %v3870_v32 = vld [vmem:[%s5737_s3 + $0x8] sm:$0xff]   ;;  %331 = vst.msk [vmem:[#allocation2 + $0xb8] sm:$0xff] %vm5741_vm0, %v292_v10  ;;  %v576_v10 = vand.u32 15, %v372_v20 }
  0x3a   : > { %v1138_v45 = vsel %vm4304_vm6, 0.0, %v4370_v25  ;;  %v293_v46 = vld [vmem:[%s4150_s19 + $0xa8] sm:$0xff]  ;;  %v4556_v20 = vld [vmem:[#allocation2 + $0xf9] sm:$0xff] }
  0x3b   : > { %3156 = vmatpush3.bf16.msra.mxu0 %v3866_v63  ;;  %3325 = vmatpush3.bf16.msra.mxu1 %v3866_v63  ;;  %332 = vst.msk [vmem:[#allocation2 + $0xc0] sm:$0xff] %vm5741_vm0, %v293_v46  ;;  %vm4550_vm14 = vcmp.eq.s32.totalorder %v576_v10, 0  ;;  %v4567_v10 = vld [vmem:[#allocation2 + $0x107] sm:$0xff] }
  0x3c   : > { %3438 = vrot.lane.b32.xlu0 %v3437_v35, %s4032_s20  ;;  %v370_v35 = vadd.s32 208, %v4136_v4  ;;  %3157 = vmatprep.subr.bf16.mxu0 %v3867_v5 }
  0x3d   : > { %3433 = vrot.lane.b32.xlu1 %v3432_v43, %s4033_s24  ;;  %v851_v43 = vld [vmem:[#allocation2 + $0xdf] sm:$0xff]  ;;  %3318 = vmatprep.subr.bf16.mxu1 %v3867_v5  ;;  %v290_v5 = vld [vmem:[%s4150_s19 + $0x90] sm:$0xff] }
  0x3e   : > { %v3472_v1 = vpack.i.bf16 %v851_v43, %v1138_v45  ;;  %v289_v45 = vld [vmem:[%s4150_s19 + $0x88] sm:$0xff]  ;;  %329 = vst.msk [vmem:[#allocation2 + $0xa8] sm:$0xff] %vm5741_vm0, %v290_v5  ;;  %v375_v5 = vadd.s32 248, %v4136_v4  ;;  %v4767_v9 = vld [vmem:[#allocation2 + $0x91] sm:$0xff] }
  0x3f   : > { %3158 = vmatpush3.bf16.msra.mxu0 %v3868_v12  ;;  %3326 = vmatpush3.bf16.msra.mxu1 %v3868_v12  ;;  %328 = vst.msk [vmem:[#allocation2 + $0xa0] sm:$0xff] %vm5741_vm0, %v289_v45  ;;  %v983_v45 = vld [vmem:[#allocation2 + $0x100] sm:$0xff] }
  0x40   : > { %3448 = vrot.lane.b32.xlu0 %v3447_v58, %s4034_s26  ;;  %v351_v58 = vadd.s32 56, %v4136_v4  ;;  %3159 = vmatprep.subr.bf16.mxu0 %v3869_v14 }
  0x41   : > { %3443 = vrot.lane.b32.xlu1 %v3442_v2, %s4032_s20  ;;  %v5794_v2 = vmov 0  ;;  %3319 = vmatprep.subr.bf16.mxu1 %v3869_v14 }
  0x42   : > { %v5795_v2 = vsel %vm4407_vm10, 4294967295, %v5794_v2  ;;  %v429_v56 = vand.u32 15, %v351_v58  ;;  %v4468_v58 = vld [vmem:[#allocation2 + $0x51] sm:$0xff] }
  0x43   : > { %5796 = vst [vmem:[#allocation13_spill] sm:$0xff] %v5795_v2  ;;  %3160 = vmatpush3.bf16.msra.mxu0 %v3870_v32  ;;  %3327 = vmatpush3.bf16.msra.mxu1 %v3870_v32 }
  0x44   : > { %3458 = vrot.lane.b32.xlu0 %v3457_v15, %s4032_s20  ;;  %v4426_v15 = vpack.i.bf16 %v961_v51, %v960_v48  ;;  %v4464_v51 = vld [vmem:[#allocation2 + $0xd8] sm:$0xff]  ;;  %vm4475_vm12 = vcmp.eq.s32.totalorder %v429_v56, 15 }
  0x45   : > { %3453 = vrot.lane.b32.xlu1 %v3452_v17, %s4034_s26  ;;  %v1177_v17 = vsel %vm4407_vm10, 0.0, %v4399_v57  ;;  %v5800_v3 = vsel %vm4475_vm12, 4294967295, %v5799_v3 }
  0x46   : > { %v3497_v43 = vpack.i.bf16 %v1177_v17, %v4430_v16  ;;  %5801 = vst [vmem:[#allocation14_spill] sm:$0xff] %v5800_v3  ;;  %v1157_v17 = vsel %vm4475_vm12, 0.0, %v4468_v58  ;;  %v971_v13 = vld [vmem:[#allocation2 + $0xa0] sm:$0xff] }
  0x48   : > { %3468 = vrot.lane.b32.xlu0 %v4213_v41, %s4032_s20  ;;  %v562_v41 = vand.u32 15, %v370_v35  ;;  %v3871_v35 = vld [vmem:[%s5737_s3 + $0x40] sm:$0xff]  }
  0x49   : > { %3463 = vrot.lane.b32.xlu1 %v4386_v36, %s4033_s24  ;;  %3161 = vmatprep.subr.bf16.mxu0 %v3871_v35 }
  0x4a   : > { %vm4439_vm11 = vcmp.eq.s32.totalorder %v562_v41, 0  ;;  %v3872_v41 = vld [vmem:[%s5737_s3] sm:$0xff]   ;;  %3320 = vmatprep.subr.bf16.mxu1 %v3871_v35  ;;  %v3512_v35 = vpack.i.bf16 %v1107_v23, %v4296_v26 }
  0x4b   : > { %v1210_v48 = vsel %vm4439_vm11, 0.0, %v4443_v28  ;;  %3162 = vmatpush3.bf16.msra.mxu0 %v3872_v41  ;;  %3328 = vmatpush3.bf16.msra.mxu1 %v3872_v41  ;;  %v1140_v41 = vsel %vm4439_vm11, 0.0, %v4308_v30  ;;  %v963_v23 = vld [vmem:[#allocation2 + $0x60] sm:$0xff] }
  0x4c   : > { %3478 = vrot.lane.b32.xlu0 %v3477_v54, %s4034_s26  ;;  %v4466_v54 = vld [vmem:[#allocation2 + $0xe0] sm:$0xff]  ;;  %v3507_v12 = vpack.i.bf16 %v4449_v33, %v1210_v48 }
  0x4d   : > { %3473 = vrot.lane.b32.xlu1 %v3472_v1, %s4033_s24  ;;  %v350_v1 = vadd.s32 48, %v4136_v4  ;;  %v4494_v14 = vpack.i.bf16 %v4466_v54, %v4464_v51 }
  0x4f   : > { %v422_v56 = vand.u32 15, %v350_v1  ;;  %v4523_v1 = vld [vmem:[#allocation2 + $0x5f] sm:$0xff] }
  0x50   : > { %3488 = vrot.lane.b32.xlu0 %v4426_v15, %s4033_s24 }
  0x51   : > { %3483 = vrot.lane.b32.xlu1 %v3482_v53, %s4034_s26  ;;  %v4496_v53 = vld [vmem:[#allocation2 + $0x49] sm:$0xff]  ;;  %vm4512_vm13 = vcmp.eq.s32.totalorder %v422_v56, 0  ;;  %v352_v56 = vadd.s32 64, %v4136_v4 }
  0x52   : > { %v3517_v32 = vpack.i.bf16 %v1157_v17, %v4496_v53  ;;  %v962_v17 = vld [vmem:[#allocation2 + $0x58] sm:$0xff] }
  0x54   : > { %3498 = vrot.lane.b32.xlu0 %v3497_v43, %s4032_s20  ;;  %v982_v43 = vld [vmem:[#allocation2 + $0xf8] sm:$0xff] }
  0x55   : > { %3493 = vrot.lane.b32.xlu1 %v3492_v47, %s4033_s24  ;;  %v4516_v47 = vld [vmem:[#allocation2 + $0x57] sm:$0xff]  ;;  %v4521_v48 = vpack.i.bf16 %v983_v45, %v982_v43  ;;  %v4548_v43 = vpack.i.bf16 %v963_v23, %v962_v17  ;;  %v4574_v23 = vld [vmem:[#allocation2 + $0x10f] sm:$0xff] }
  0x56   : > { %v1190_v26 = vsel %vm4512_vm13, 0.0, %v4516_v47 }
  0x57   : > { %v3537_v8 = vpack.i.bf16 %v4523_v1, %v1190_v26  ;;  %v436_v26 = vand.u32 15, %v352_v56  ;;  %v1212_v56 = vsel %vm4550_vm14, 0.0, %v4567_v10 }
  0x58   : > { %3508 = vrot.lane.b32.xlu0 %v3507_v12, %s4034_s26  ;;  %v3532_v12 = vpack.i.bf16 %v4317_v44, %v1140_v41  ;;  %v4587_v41 = vld [vmem:[#allocation2 + $0x61] sm:$0xff] }
  0x59   : > { %3503 = vrot.lane.b32.xlu1 %v4494_v14, %s4032_s20  ;;  %vm4579_vm15 = vcmp.eq.s32.totalorder %v436_v26, 0 }
  0x5c   : > { %3518 = vrot.lane.b32.xlu0 %v3517_v32, %s4032_s20  ;;  %v1087_v32 = vsel %vm4475_vm12, 0.0, %v4262_v6  ;;  %vm5832_vm12 = vcmask 261120  }
  0x5d   : > { %3513 = vrot.lane.b32.xlu1 %v3512_v35, %s4034_s26  ;;  %v4544_v35 = vld [vmem:[#allocation2 + $0x101] sm:$0xff]  ;;  %v3542_v44 = vpack.i.bf16 %v1087_v32, %v4270_v11 }
  0x5e   : > { %v1179_v6 = vsel %vm4332_vm8, 0.0, %v4544_v35 }
  0x5f   : > { %v3557_v11 = vpack.i.bf16 %v1179_v6, %v4556_v20  ;;  %v4595_v6 = vld [vmem:[#allocation2 + $0x59] sm:$0xff] }
  0x60   : > { %3528 = vrot.lane.b32.xlu0 %v4293_v24, %s4032_s20  ;;  %v353_v24 = vadd.s32 72, %v4136_v4 }
  0x61   : > { %3523 = vrot.lane.b32.xlu1 %v4521_v48, %s4033_s24 }
  0x64   : > { %3538 = vrot.lane.b32.xlu0 %v3537_v8, %s4034_s26  ;;  %v1120_v8 = vsel %vm4512_vm13, 0.0, %v4368_v22 }
  0x65   : > { %3533 = vrot.lane.b32.xlu1 %v3532_v12, %s4033_s24  ;;  %v443_v12 = vand.u32 15, %v353_v24  ;;  %v3552_v17 = vpack.i.bf16 %v4379_v31, %v1120_v8  ;;  %v5808_v24 = vmov 0  ;;  %v1109_v8 = vsel %vm4332_vm8, 0.0, %v4399_v57  ;;  %v4608_v31 = vld [vmem:[#allocation2 + $0x67] sm:$0xff]  ;;  %v4613_v57 = vld [vmem:[#allocation2 + $0x6f] sm:$0xff] }
  0x67   : > { %vm4583_vm3 = vcmp.eq.s32.totalorder %v443_v12, 15 }
  0x68   : > { %3548 = vrot.lane.b32.xlu0 %v4548_v43, %s4033_s24  ;;  %v5809_v24 = vsel %vm4583_vm3, 4294967295, %v5808_v24  ;;  %v1159_v26 = vsel %vm4583_vm3, 0.0, %v4587_v41 }
  0x69   : > { %3543 = vrot.lane.b32.xlu1 %v3542_v44, %s4034_s26  ;;  %5810 = vst [vmem:[#allocation15_spill] sm:$0xff] %v5809_v24  ;;  %v3567_v44 = vpack.i.bf16 %v4574_v23, %v1212_v56  ;;  %v3577_v12 = vpack.i.bf16 %v1159_v26, %v4595_v6  ;;  %v1147_v56 = vld [vmem:[#allocation2 + $0x110] sm:$0xff]  ;;  %v374_v26 = vadd.s32 240, %v4136_v4 }
  0x6a   : > { %v825_v24 = vld [vmem:[#allocation2 + $0xf] sm:$0xff] }
  0x6c   : > { %3558 = vrot.lane.b32.xlu0 %v3557_v11, %s4032_s20  ;;  %v3572_v11 = vpack.i.bf16 %v1109_v8, %v4430_v16  ;;  %v597_v16 = vand.u32 15, %v375_v5  ;;  %v590_v5 = vand.u32 15, %v374_v26 }
  0x6d   : > { %3553 = vrot.lane.b32.xlu1 %v3552_v17, %s4033_s24  ;;  %v1146_v17 = vld [vmem:[#allocation2 + $0x108] sm:$0xff] }
  0x6e   : > { %v3582_v55 = vpack.i.bf16 %v1147_v56, %v1146_v17  ;;  %v965_v17 = vld [vmem:[#allocation2 + $0x70] sm:$0xff]  ;;  %v1089_v56 = vsel %vm4583_vm3, 0.0, %v4468_v58  ;;  %vm4630_vm8 = vcmp.eq.s32.totalorder %v597_v16, 15  ;;  %v1122_v58 = vsel %vm4579_vm15, 0.0, %v4516_v47 }
  0x6f   : > { %vm4646_vm0 = vcmp.eq.s32.totalorder %v590_v5, 0  ;;  %v457_v16 = vand.u32 15, %v355_v18  ;;  %v5816_v47 = vmov 0  ;;  %v354_v18 = vadd.s32 80, %v4136_v4 }
  0x70   : > { %3568 = vrot.lane.b32.xlu0 %v3567_v44, %s4034_s26  ;;  %v1192_v44 = vsel %vm4579_vm15, 0.0, %v4608_v31 }
  0x71   : > { %3563 = vrot.lane.b32.xlu1 %v4386_v36, %s4032_s20  ;;  %v1142_v36 = vsel %vm4550_vm14, 0.0, %v4443_v28  ;;  %v3597_v8 = vpack.i.bf16 %v4613_v57, %v1192_v44  ;;  %v5811_v28 = vmov 0  ;;  %vm4657_vm10 = vcmp.eq.s32.totalorder %v457_v16, 15  ;;  %v4683_v16 = vld [vmem:[#allocation2 + $0x77] sm:$0xff]  ;;  %v3899_v44 = vld [vmem:[#allocation2 + $0xff] sm:$0xff] }
  0x72   : > { %v5812_v28 = vsel %vm4630_vm8, 4294967295, %v5811_v28  ;;  %v5817_v47 = vsel %vm4657_vm10, 4294967295, %v5816_v47 }
  0x73   : > { %5813 = vst [vmem:[#allocation16_spill] sm:$0xff] %v5812_v28  ;;  %5818 = vst [vmem:[#allocation17_spill] sm:$0xff] %v5817_v47 }
  0x74   : > { %3578 = vrot.lane.b32.xlu0 %v3577_v12, %s4032_s20  ;;  %v3592_v12 = vpack.i.bf16 %v4449_v33, %v1142_v36  ;;  %v3602_v33 = vpack.i.bf16 %v1089_v56, %v4496_v53  ;;  %v1182_v36 = vld [vmem:[#allocation2 + $0x117] sm:$0xff]  ;;  %v3612_v53 = vpack.i.bf16 %v4523_v1, %v1122_v58  ;;  %v450_v56 = vand.u32 15, %v354_v18  ;;  %v1217_v58 = vld [vmem:[#allocation2 + $0x120] sm:$0xff] }
  0x75   : > { %3573 = vrot.lane.b32.xlu1 %v3572_v11, %s4034_s26  ;;  %v964_v11 = vld [vmem:[#allocation2 + $0x68] sm:$0xff]  ;;  %v356_v18 = vadd.s32 96, %v4136_v4 }
  0x76   : > { %vm4679_vm5 = vcmp.eq.s32.totalorder %v450_v56, 0  ;;  %v967_v56 = vld [vmem:[#allocation2 + $0x80] sm:$0xff] }
  0x78   : > { %3588 = vrot.lane.b32.xlu0 %v4426_v15, %s4032_s20  ;;  %v4636_v15 = vpack.i.bf16 %v965_v17, %v964_v11  ;;  %v1111_v17 = vsel %vm4630_vm8, 0.0, %v4544_v35  ;;  %v357_v35 = vadd.s32 104, %v4136_v4 }
  0x79   : > { %3583 = vrot.lane.b32.xlu1 %v3582_v55, %s4033_s24  ;;  %v1181_v55 = vsel %vm4630_vm8, 0.0, %v4329_v50  ;;  %v1183_v50 = vld [vmem:[#allocation2 + $0x11f] sm:$0xff] }
  0x7a   : > { %v3617_v26 = vpack.i.bf16 %v1181_v55, %v4341_v59  ;;  %v4666_v59 = vld [vmem:[#allocation2 + $0x69] sm:$0xff]  ;;  %v1216_v55 = vld [vmem:[#allocation2 + $0x118] sm:$0xff] }
  0x7c   : > { %3598 = vrot.lane.b32.xlu0 %v3597_v8, %s4034_s26  ;;  %v1214_v8 = vsel %vm4646_vm0, 0.0, %v1182_v36  ;;  %v5819_v36 = vmov 0 }
  0x7d   : > { %3593 = vrot.lane.b32.xlu1 %v3592_v12, %s4033_s24  ;;  %v4661_v12 = vld [vmem:[#allocation2 + $0x71] sm:$0xff]  ;;  %v3627_v11 = vpack.i.bf16 %v1183_v50, %v1214_v8  ;;  %v5820_v36 = vsel %vm4679_vm5, 4294967295, %v5819_v36  ;;  %v1144_v50 = vsel %vm4646_vm0, 0.0, %v4567_v10  ;;  %v471_v8 = vand.u32 15, %v357_v35  ;;  %v4724_v35 = vld [vmem:[#allocation2 + $0x79] sm:$0xff] }
  0x7e   : > { %v1161_v1 = vsel %vm4657_vm10, 0.0, %v4661_v12  ;;  %v5821_v10 = vmov 0 }
  0x7f   : > { %v3637_v5 = vpack.i.bf16 %v1161_v1, %v4666_v59  ;;  %v3652_v1 = vpack.i.bf16 %v4574_v23, %v1144_v50  ;;  %vm4711_vm8 = vcmp.eq.s32.totalorder %v471_v8, 15  ;;  %v5824_v50 = vmov 0  ;;  %v4737_v8 = vld [vmem:[#allocation2 + $0x87] sm:$0xff] }
  0x80   : > { %3608 = vrot.lane.b32.xlu0 %v4636_v15, %s4033_s24  ;;  %v5822_v10 = vsel %vm4711_vm8, 4294967295, %v5821_v10 }
  0x81   : > { %3603 = vrot.lane.b32.xlu1 %v3602_v33, %s4034_s26  ;;  %v3632_v33 = vpack.i.bf16 %v1111_v17, %v4556_v20  ;;  %v4693_v20 = vld [vmem:[#allocation2 + $0x7f] sm:$0xff]  ;;  %5823 = vst [vmem:[#allocation18_spill] sm:$0xff] %v5822_v10 }
  0x82   : > { %v966_v17 = vld [vmem:[#allocation2 + $0x78] sm:$0xff] }
  0x84   : > { %3618 = vrot.lane.b32.xlu0 %v3617_v26, %s4032_s20  ;;  %v4689_v26 = vld [vmem:[%s5737_s3 + $0x88] sm:$0xff]  }
  0x85   : > { %3613 = vrot.lane.b32.xlu1 %v3612_v53, %s4033_s24  ;;  %v1194_v53 = vsel %vm4679_vm5, 0.0, %v4683_v16  ;;  %3277 = vmatprep.subr.bf16.mxu1 %v4689_v26 }
  0x88   : > { %3628 = vrot.lane.b32.xlu0 %v3627_v11, %s4034_s26  ;;  %v3657_v11 = vpack.i.bf16 %v4693_v20, %v1194_v53  ;;  %v1124_v53 = vsel %vm4679_vm5, 0.0, %v4608_v31  ;;  %vm5845_vm5 = vcmask 785408  }
  0x89   : > { %3623 = vrot.lane.b32.xlu1 %v4521_v48, %s4032_s20  ;;  %v3642_v48 = vpack.i.bf16 %v1217_v58, %v1216_v55  ;;  %v464_v55 = vand.u32 15, %v356_v18  ;;  %v4720_v58 = vpack.i.bf16 %v967_v56, %v966_v17  ;;  %v358_v18 = vadd.s32 112, %v4136_v4  ;;  %v4750_v56 = vld [vmem:[#allocation2 + $0x7] sm:$0xff]  ;;  %vm5846_vm1 = vmmov %vm5845_vm5 }
  0x8b   : > { %v478_v63 = vand.u32 15, %v358_v18 }
  0x8c   : > { %3638 = vrot.lane.b32.xlu0 %v3637_v5, %s4032_s20  ;;  %v1091_v5 = vsel %vm4657_vm10, 0.0, %v4587_v41  ;;  %vm4733_vm10 = vcmp.eq.s32.totalorder %v464_v55, 0 }
  0x8d   : > { %3633 = vrot.lane.b32.xlu1 %v3632_v33, %s4034_s26  ;;  %v4715_v33 = vld [vmem:[#allocation2 + $0x81] sm:$0xff]  ;;  %v3662_v23 = vpack.i.bf16 %v1091_v5, %v4595_v6  ;;  %v5825_v50 = vsel %vm4733_vm10, 4294967295, %v5824_v50  ;;  %v1196_v31 = vsel %vm4733_vm10, 0.0, %v4737_v8 }
  0x8e   : > { %v1163_v41 = vsel %vm4711_vm8, 0.0, %v4715_v33  ;;  %5826 = vst [vmem:[#allocation19_spill] sm:$0xff] %v5825_v50 }
  0x8f   : > { %v3677_v6 = vpack.i.bf16 %v1163_v41, %v4724_v35  ;;  %v1093_v41 = vsel %vm4711_vm8, 0.0, %v4661_v12  ;;  %vm5833_vm8 = vmmov %vm5832_vm12 }
  0x90   : > { %3648 = vrot.lane.b32.xlu0 %v4548_v43, %s4032_s20 }
  0x91   : > { %3643 = vrot.lane.b32.xlu1 %v3642_v48, %s4033_s24  ;;  %v359_v48 = vadd.s32 120, %v4136_v4 }
  0x93   : > { %v4718_v43 = vpop.permute.xlu0 %3378  ;;  %v485_v17 = vand.u32 15, %v359_v48  ;;  %v920_v48 = vsel %vm4205_vm2, 0.0, %v4750_v56  ;;  %vm4780_vm2 = vcmp.eq.s32.totalorder %v478_v63, 0 }
  0x94   : > { %3658 = vrot.lane.b32.xlu0 %v3657_v11, %s4034_s26  ;;  %v3672_v11 = vpack.i.bf16 %v4613_v57, %v1124_v53  ;;  %v969_v53 = vld [vmem:[#allocation2 + $0x90] sm:$0xff] }
  0x95   : > { %3653 = vrot.lane.b32.xlu1 %v3652_v1, %s4033_s24  ;;  %v4745_v1 = vld [vmem:[#allocation2 + $0x8f] sm:$0xff]  ;;  %vm4763_vm3 = vcmp.eq.s32.totalorder %v485_v17, 15 }
  0x96   : > { %v3687_v57 = vpack.i.bf16 %v4745_v1, %v1196_v31  ;;  %v5828_v0 = vsel %vm4763_vm3, 4294967295, %v5827_v0  ;;  %v361_v31 = vadd.s32 136, %v4136_v4 }
  0x97   : > { %5829 = vst [vmem:[#allocation20_spill] sm:$0xff] %v5828_v0 }
  0x98   : > { %3668 = vrot.lane.b32.xlu0 %v4720_v58, %s4033_s24  ;;  %v499_v47 = vand.u32 15, %v361_v31 }
  0x99   : > { %3663 = vrot.lane.b32.xlu1 %v3662_v23, %s4034_s26  ;;  %v968_v23 = vld [vmem:[#allocation2 + $0x88] sm:$0xff] }
  0x9a   : > { %v3384_v5 = vpop.permute.xlu0 %3383  ;;  %v4771_v40 = vpack.i.bf16 %v969_v53, %v968_v23  ;;  %v4792_v23 = vld [vmem:[#allocation2 + $0x97] sm:$0xff] }
  0x9b   : > { %v4752_v55 = vpop.permute.xlu1 %3388  ;;  %v3385_v19 = vunpack.i.l.bf16 %v3384_v5 }
  0x9c   : > { %3678 = vrot.lane.b32.xlu0 %v3677_v6, %s4032_s20  ;;  %v3692_v6 = vpack.i.bf16 %v1093_v41, %v4666_v59  ;;  %v1165_v59 = vsel %vm4763_vm3, 0.0, %v4767_v9 }
  0x9d   : > { %3673 = vrot.lane.b32.xlu1 %v3672_v11, %s4033_s24  ;;  %v1126_v11 = vsel %vm4733_vm10, 0.0, %v4683_v16  ;;  %vm5834_vm10 = vcmask 523264  }
  0x9e   : > { %v3394_v12 = vpop.permute.xlu0 %3393  ;;  %vm5835_vm7 = vmmov %vm5834_vm10  ;;  %v3702_v31 = vpack.i.bf16 %v4693_v20, %v1126_v11 }
  0x9f   : > { %v3396_v18 = vunpack.i.h.bf16 %v3394_v12  ;;  %v3395_v28 = vunpack.i.l.bf16 %v3394_v12  ;;  %v3399_v2 = vpop.permute.xlu1 %3398  ;;  %v3386_v12 = vunpack.i.h.bf16 %v3384_v5  ;;  %v4797_v5 = vadd.s32 128, %v4136_v4 }
  0xa0   : > { %v3401_v17 = vunpack.i.h.bf16 %v3399_v2  ;;  %v3400_v56 = vunpack.i.l.bf16 %v3399_v2  ;;  %3688 = vrot.lane.b32.xlu0 %v3687_v57, %s4034_s26  ;;  %v4790_v57 = vld [vmem:[#allocation2 + $0x89] sm:$0xff] }
  0xa1   : > { %3683 = vrot.lane.b32.xlu1 %v4636_v15, %s4032_s20  ;;  %v2090_v16 = vsel %vm5832_vm12, %v4203_v39, %v3395_v28  ;;  %v2091_v2 = vsel %vm5833_vm8, %v4215_v42, %v3396_v18  ;;  %v3381_v15 = vunpack.i.h.bf16 %v4718_v43  ;;  %v3380_v39 = vunpack.i.l.bf16 %v4718_v43 }
  0xa2   : > { %v3414_v53 = vpop.permute.xlu0 %3413  ;;  %v2122_v63 = vsel %vm5834_vm10, %v2090_v16, %v3400_v56  ;;  %v2123_v10 = vsel %vm5835_vm7, %v2091_v2, %v3401_v17  ;;  %vm5836_vm12 = vcmask 785408   ;;  %v3707_v17 = vpack.i.bf16 %v1165_v59, %v4790_v57  ;;  %v4807_v16 = vld [vmem:[#allocation2 + $0x9f] sm:$0xff] }
  0xa3   : > { %v3404_v28 = vpop.permute.xlu1 %3403  ;;  %v2154_v42 = vsel %vm5836_vm12, %v2122_v63, %v3385_v19  ;;  %vm5837_vm8 = vmmov %vm5836_vm12  ;;  %v1198_v43 = vsel %vm4780_vm2, 0.0, %v4792_v23  ;;  %v3416_v2 = vunpack.i.h.bf16 %v3414_v53  ;;  %v3415_v50 = vunpack.i.l.bf16 %v3414_v53  ;;  %v970_v53 = vld [vmem:[#allocation2 + $0x98] sm:$0xff] }
  0xa4   : > { %v2155_v18 = vsel %vm5837_vm8, %v2123_v10, %v3386_v12  ;;  %3698 = vrot.lane.b32.xlu0 %v4771_v40, %s4033_s24  ;;  %v3406_v19 = vunpack.i.h.bf16 %v3404_v28  ;;  %v3405_v63 = vunpack.i.l.bf16 %v3404_v28  ;;  %v1095_v59 = vsel %vm4763_vm3, 0.0, %v4715_v33  ;;  %v4825_v33 = vld [vmem:[#allocation2 + $0xa1] sm:$0xff] }
  0xa5   : > { %v2187_v56 = vpack.c.bf16 %v2155_v18, %v2154_v42  ;;  %3693 = vrot.lane.b32.xlu1 %v3692_v6, %s4034_s26  ;;  %v492_v20 = vand.u32 15, %v4797_v5  ;;  %vm5838_vm7 = vcmask 261120   ;;  %v3717_v18 = vpack.i.bf16 %v4807_v16, %v1198_v43 }
  0xa6   : > { %v3419_v10 = vpop.permute.xlu0 %3418  ;;  %v1992_v11 = vsel %vm5838_vm7, %v920_v48, %v3380_v39  ;;  %vm5839_vm10 = vmmov %vm5838_vm7  ;;  %vm4820_vm12 = vcmp.eq.s32.totalorder %v499_v47, 15  ;;  %v2092_v48 = vsel %vm5838_vm7, %v4199_v37, %v3415_v50  ;;  %v3391_v50 = vunpack.i.h.bf16 %v4752_v55 }
  0xa7   : > { %2458 = vmatprep.mubr.bf16.mxu0 %v2187_v56  ;;  %v1993_v12 = vsel %vm5839_vm10, %v825_v24, %v3381_v15  ;;  %v3409_v42 = vpop.permute.xlu1 %3408  ;;  %v3421_v6 = vunpack.i.h.bf16 %v3419_v10  ;;  %v3420_v56 = vunpack.i.l.bf16 %v3419_v10  ;;  %vm5842_vm8 = vmmov %vm5838_vm7  ;;  %vm5843_vm10 = vcmask 523264  }
  0xa8   : > { %v3411_v3 = vunpack.i.h.bf16 %v3409_v42  ;;  %v3410_v0 = vunpack.i.l.bf16 %v3409_v42  ;;  %3708 = vrot.lane.b32.xlu0 %v3707_v17, %s4032_s20  ;;  %v2093_v24 = vsel %vm5842_vm8, %v4201_v38, %v3416_v2  ;;  %v2026_v5 = vsel %vm5843_vm10, %v1993_v12, %v3406_v19  ;;  %vm5844_vm3 = vmmov %vm5843_vm10 }
  0xa9   : > { %v2025_v47 = vsel %vm5844_vm3, %v1992_v11, %v3405_v63  ;;  %3703 = vrot.lane.b32.xlu1 %v3702_v31, %s4033_s24  ;;  %v4836_v17 = vpack.i.bf16 %v971_v13, %v970_v53  ;;  %v3722_v10 = vpack.i.bf16 %v1095_v59, %v4724_v35  ;;  %v1167_v37 = vsel %vm4820_vm12, 0.0, %v4825_v33  ;;  %v4847_v13 = vld [vmem:[#allocation2 + $0x99] sm:$0xff]  ;;  %vm5848_vm8 = vmmov %vm5846_vm1  ;;  %v4862_v53 = vld [vmem:[#allocation2 + $0xa7] sm:$0xff] }
  0xaa   : > { %v3424_v15 = vpop.permute.xlu0 %3423  ;;  %v2058_v39 = vsel %vm5845_vm5, %v2025_v47, %v3410_v0  ;;  %v2059_v43 = vsel %vm5846_vm1, %v2026_v5, %v3411_v3  ;;  %v3390_v31 = vunpack.i.l.bf16 %v4752_v55  ;;  %v2124_v0 = vsel %vm5844_vm3, %v2092_v48, %v3420_v56  ;;  %vm5847_vm5 = vmmov %vm5844_vm3 }
  0xab   : > { %v3426_v42 = vunpack.i.h.bf16 %v3424_v15  ;;  %v3425_v38 = vunpack.i.l.bf16 %v3424_v15  ;;  %v3429_v2 = vpop.permute.xlu1 %3428  ;;  %v2186_v52 = vpack.c.bf16 %v2059_v43, %v2058_v39  ;;  %v2125_v3 = vsel %vm5847_vm5, %v2093_v24, %v3421_v6 }
  0xac   : > { %3718 = vrot.lane.b32.xlu0 %v3717_v18, %s4034_s26  ;;  %v3431_v35 = vunpack.i.h.bf16 %v3429_v2  ;;  %v3430_v19 = vunpack.i.l.bf16 %v3429_v2  ;;  %v1128_v12 = vsel %vm4780_vm2, 0.0, %v4737_v8  ;;  %vm4858_vm7 = vcmp.eq.s32.totalorder %v492_v20, 0 }
  0xad   : > { %3713 = vrot.lane.b32.xlu1 %v4720_v58, %s4032_s20  ;;  %2459 = vmatmul.mubr.bf16.vlgmr.msra.gmra.mxu0 %v2186_v52  ;;  %v2156_v63 = vsel %vm5846_vm1, %v2124_v0, %v3425_v38  ;;  %v2157_v59 = vsel %vm5848_vm8, %v2125_v3, %v3426_v42  ;;  %v5849_v18 = vmov 0  ;;  %v363_v58 = vadd.s32 152, %v4136_v4  ;;  %vm5854_vm1 = vmmov %vm5847_vm5  ;;  %v4896_v0 = vld [vmem:[#allocation2 + $0xa8] sm:$0xff]  ;;  %v4898_v3 = vld [vmem:[#allocation2 + $0xb0] sm:$0xff] }
  0xae   : > { %v4853_v11 = vpop.permute.xlu0 %3438  ;;  %v2190_v55 = vpack.c.bf16 %v2157_v59, %v2156_v63  ;;  %v5850_v18 = vsel %vm4858_vm7, 4294967295, %v5849_v18  ;;  %v3737_v6 = vpack.i.bf16 %v1167_v37, %v4847_v13  ;;  %v362_v56 = vadd.s32 144, %v4136_v4  ;;  %5857 = vst [vmem:[#allocation21_spill] sm:$0xff] %v4896_v0  ;;  %v4905_v59 = vld [vmem:[#allocation2 + $0xc7] sm:$0xff] }
  0xaf   : > { %v3434_v52 = vpop.permute.xlu1 %3433  ;;  %v5851_v24 = vsel %vm4242_vm4, 0.0, %v4248_v62  ;;  %vm5852_vm10 = vcmask 261120   ;;  %v3732_v60 = vpack.i.bf16 %v4745_v1, %v1128_v12  ;;  %v4880_v62 = vld [vmem:[#allocation2 + $0xaf] sm:$0xff]  ;;  %vm5855_vm4 = vmmov %vm5848_vm8  ;;  %v513_v38 = vand.u32 15, %v363_v58 }
  0xb0   : > { %v1994_v48 = vsel %vm5852_vm10, %v5851_v24, %v3390_v31  ;;  %vm5853_vm3 = vmmov %vm5852_vm10  ;;  %v3436_v20 = vunpack.i.h.bf16 %v3434_v52  ;;  %v3435_v5 = vunpack.i.l.bf16 %v3434_v52  ;;  %3728 = vrot.lane.b32.xlu0 %v4836_v17, %s4033_s24  ;;  %2466 = vmatprep.mubr.bf16.mxu0 %v2190_v55  ;;  %v4893_v31 = vadd.s32 160, %v4136_v4  ;;  %v4913_v58 = vld [vmem:[#allocation2 + $0xb1] sm:$0xff] }
  0xb1   : > { %v1995_v8 = vsel %vm5853_vm3, %v4264_v7, %v3391_v50  ;;  %v2027_v15 = vsel %vm5854_vm1, %v1994_v48, %v3430_v19  ;;  %3723 = vrot.lane.b32.xlu1 %v3722_v10, %s4034_s26  ;;  %v1200_v7 = vsel %vm4858_vm7, 0.0, %v4862_v53  ;;  %vm5856_vm8 = vmmov %vm5855_vm4  ;;  %v365_v50 = vadd.s32 168, %v4136_v4  ;;  %v4928_v48 = vld [vmem:[#allocation2 + $0xb7] sm:$0xff] }
  0xb2   : > { %v2028_v47 = vsel %vm5847_vm5, %v1995_v8, %v3431_v35  ;;  %v3449_v39 = vpop.permute.xlu0 %3448  ;;  %v2060_v43 = vsel %vm5855_vm4, %v2027_v15, %v3435_v5  ;;  %v3747_v1 = vpack.i.bf16 %v4880_v62, %v1200_v7  ;;  %v506_v10 = vand.u32 15, %v362_v56  ;;  %v4974_v8 = vld [vmem:[#allocation2 + $0xc1] sm:$0xff] }
  0xb3   : > { %v2061_v42 = vsel %vm5856_vm8, %v2028_v47, %v3436_v20  ;;  %v4887_v2 = vpop.permute.xlu1 %3443  ;;  %v1097_v35 = vsel %vm4820_vm12, 0.0, %v4767_v9  ;;  %v3441_v19 = vunpack.i.h.bf16 %v4853_v11  ;;  %v3440_v63 = vunpack.i.l.bf16 %v4853_v11  ;;  %v4936_v47 = vld [vmem:[#allocation2 + $0xa9] sm:$0xff] }
  0xb4   : > { %v2189_v37 = vpack.c.bf16 %v2061_v42, %v2060_v43  ;;  %3738 = vrot.lane.b32.xlu0 %v3737_v6, %s4032_s20  ;;  %vm4909_vm10 = vcmp.eq.s32.totalorder %v513_v38, 15  ;;  %v5858_v12 = vmov 0  ;;  %v1130_v6 = vsel %vm4858_vm7, 0.0, %v4792_v23  ;;  %v4950_v42 = vld [vmem:[#allocation2 + $0xbf] sm:$0xff] }
  0xb5   : > { %3733 = vrot.lane.b32.xlu1 %v3732_v60, %s4033_s24  ;;  %v5859_v12 = vsel %vm4909_vm10, 4294967295, %v5858_v12  ;;  %v527_v9 = vand.u32 15, %v365_v50  ;;  %v4921_v11 = vpack.i.bf16 %v4898_v3, %v4896_v0  ;;  %v3752_v56 = vpack.i.bf16 %v1097_v35, %v4790_v57  ;;  %v4982_v0 = vld [vmem:[#allocation2 + $0xc0] sm:$0xff] }
  0xb6   : > { %2467 = vmatmul.mubr.bf16.gmra.mxu0 %v2189_v37  ;;  %v4907_v55 = vpop.permute.xlu0 %3458  ;;  %vm4924_vm3 = vcmp.eq.s32.totalorder %v506_v10, 0  ;;  %v3451_v20 = vunpack.i.h.bf16 %v3449_v39  ;;  %v3450_v5 = vunpack.i.l.bf16 %v3449_v39  ;;  %v944_v23 = vsel %vm4304_vm6, 0.0, %v4905_v59 }
  0xb7   : > { %v3454_v52 = vpop.permute.xlu1 %3453  ;;  %v1169_v57 = vsel %vm4909_vm10, 0.0, %v4913_v58  ;;  %v3762_v60 = vpack.i.bf16 %v4807_v16, %v1130_v6  ;;  %vm5862_vm5 = vcmask 261120   ;;  %v3446_v39 = vunpack.i.h.bf16 %v4887_v2  ;;  %v4959_v16 = vld [vmem:[#allocation2 + $0xcf] sm:$0xff] }
  0xb8   : > { %3748 = vrot.lane.b32.xlu0 %v3747_v1, %s4034_s26  ;;  %v2114_v7 = vsel %vm5862_vm5, %v4464_v51, %v3440_v63  ;;  %vm5863_vm1 = vmmov %vm5862_vm5  ;;  %v1202_v38 = vsel %vm4924_vm3, 0.0, %v4928_v48  ;;  %vm4955_vm6 = vcmp.eq.s32.totalorder %v527_v9, 15  ;;  %v3456_v1 = vunpack.i.h.bf16 %v3454_v52 }
  0xb9   : > { %3743 = vrot.lane.b32.xlu1 %v4771_v40, %s4032_s20  ;;  %v2115_v29 = vsel %vm5863_vm1, %v4466_v54, %v3441_v19  ;;  %v3445_v40 = vunpack.i.l.bf16 %v4887_v2  ;;  %v3767_v54 = vpack.i.bf16 %v1169_v57, %v4936_v47  ;;  %v1099_v2 = vsel %vm4909_vm10, 0.0, %v4825_v33 }
  0xba   : > { %v4941_v15 = vpop.permute.xlu0 %3468  ;;  %v3455_v10 = vunpack.i.l.bf16 %v3454_v52  ;;  %vm5866_vm4 = vcmask 523264   ;;  %v3461_v63 = vunpack.i.h.bf16 %v4907_v55  ;;  %vm5868_vm5 = vcmask 785408  }
  0xbb   : > { %v3464_v43 = vpop.permute.xlu1 %3463  ;;  %v2146_v35 = vsel %vm5866_vm4, %v2114_v7, %v3450_v5  ;;  %vm5867_vm8 = vmmov %vm5866_vm4  ;;  %v3777_v57 = vpack.i.bf16 %v4950_v42, %v1202_v38  ;;  %vm5870_vm7 = vcmask 261120   ;;  %v3460_v5 = vunpack.i.l.bf16 %v4907_v55 }
  0xbc   : > { %v3466_v51 = vunpack.i.h.bf16 %v3464_v43  ;;  %v3465_v50 = vunpack.i.l.bf16 %v3464_v43  ;;  %3758 = vrot.lane.b32.xlu0 %v4921_v11, %s4033_s24  ;;  %v2147_v19 = vsel %vm5867_vm8, %v2115_v29, %v3451_v20  ;;  %vm5869_vm1 = vmmov %vm5868_vm5  ;;  %v2017_v52 = vsel %vm5870_vm7, %v4959_v16, %v3446_v39  ;;  %v4980_v29 = vld [vmem:[#allocation2 + $0xb8] sm:$0xff] }
  0xbd   : > { %3753 = vrot.lane.b32.xlu1 %v3752_v56, %s4034_s26  ;;  %vm5871_vm10 = vmmov %vm5870_vm7  ;;  %v3782_v55 = vpack.i.bf16 %v1099_v2, %v4847_v13 }
  0xbe   : > { %v3479_v6 = vpop.permute.xlu0 %3478  ;;  %v2178_v9 = vsel %vm5868_vm5, %v2146_v35, %v3465_v50  ;;  %v2179_v43 = vsel %vm5869_vm1, %v2147_v19, %v3466_v51  ;;  %v2016_v56 = vsel %vm5871_vm10, %v944_v23, %v3445_v40  ;;  %vm5872_vm8 = vmmov %vm5866_vm4  ;;  %v1171_v23 = vsel %vm4955_vm6, 0.0, %v4974_v8  ;;  %v3875_v40 = vld [vmem:[#allocation2 + $0x40] sm:$0xff] }
  0xbf   : > { %v3474_v7 = vpop.permute.xlu1 %3473  ;;  %v2223_v20 = vpack.c.bf16 %v2179_v43, %v2178_v9  ;;  %v3481_v50 = vunpack.i.h.bf16 %v3479_v6  ;;  %v3480_v35 = vunpack.i.l.bf16 %v3479_v6  ;;  %v2049_v38 = vsel %vm5866_vm4, %v2016_v56, %v3455_v10  ;;  %vm5873_vm10 = vmmov %vm5869_vm1 }
  0xc0   : > { %v3476_v51 = vunpack.i.h.bf16 %v3474_v7  ;;  %v3475_v19 = vunpack.i.l.bf16 %v3474_v7  ;;  %3768 = vrot.lane.b32.xlu0 %v3767_v54, %s4032_s20  ;;  %v2050_v39 = vsel %vm5872_vm8, %v2017_v52, %v3456_v1  ;;  %v2095_v6 = vsel %vm5870_vm7, %v3875_v40, %v3461_v63  ;;  %vm5874_vm5 = vmmov %vm5869_vm1  ;;  %v3874_v63 = vld [vmem:[%s5737_s3 + $0x80] sm:$0xff]  }
  0xc1   : > { %3763 = vrot.lane.b32.xlu1 %v3762_v60, %s4033_s24  ;;  %2554 = vmatprep.mubr.bf16.mxu1 %v2223_v20  ;;  %v4997_v1 = vpack.i.bf16 %v4982_v0, %v4980_v29  ;;  %v3876_v60 = vld [vmem:[#allocation2 + $0x38] sm:$0xff]  ;;  %vm5875_vm1 = vmmov %vm5870_vm7  ;;  %v3471_v20 = vunpack.i.h.bf16 %v4941_v15 }
  0xc2   : > { %v3489_v9 = vpop.permute.xlu0 %3488  ;;  %v2082_v43 = vsel %vm5873_vm10, %v2049_v38, %v3475_v19  ;;  %v2083_v54 = vsel %vm5874_vm5, %v2050_v39, %v3476_v51  ;;  %v2094_v10 = vsel %vm5875_vm1, %v3876_v60, %v3460_v5  ;;  %v3470_v19 = vunpack.i.l.bf16 %v4941_v15  ;;  %vm5876_vm8 = vmmov %vm5866_vm4  ;;  %v5008_v39 = vld [vmem:[#allocation2 + $0xb9] sm:$0xff] }
  0xc3   : > { %v3491_v2 = vunpack.i.h.bf16 %v3489_v9  ;;  %v3490_v52 = vunpack.i.l.bf16 %v3489_v9  ;;  %v3484_v56 = vpop.permute.xlu1 %3483  ;;  %v2222_v7 = vpack.c.bf16 %v2083_v54, %v2082_v43  ;;  %v2126_v51 = vsel %vm5866_vm4, %v2094_v10, %v3480_v35  ;;  %vm5877_vm7 = vmmov %vm5874_vm5 }
  0xc4   : > { %v2127_v38 = vsel %vm5876_vm8, %v2095_v6, %v3481_v50  ;;  %3778 = vrot.lane.b32.xlu0 %v3777_v57, %s4034_s26  ;;  %v3486_v5 = vunpack.i.h.bf16 %v3484_v56  ;;  %v3485_v40 = vunpack.i.l.bf16 %v3484_v56  ;;  %vm5878_vm10 = vmmov %vm5874_vm5  ;;  %v1132_v50 = vsel %vm4924_vm3, 0.0, %v4862_v53 }
  0xc5   : > { %3773 = vrot.lane.b32.xlu1 %v4836_v17, %s4032_s20  ;;  %2555 = vmatmul.mubr.bf16.vlgmr.msra.gmra.mxu1 %v2222_v7  ;;  %v2158_v9 = vsel %vm5877_vm7, %v2126_v51, %v3490_v52  ;;  %v2159_v43 = vsel %vm5878_vm10, %v2127_v38, %v3491_v2  ;;  %v5879_v57 = vand.u32 15, %v4893_v31  ;;  %v5880_v35 = vmov 0  ;;  %v3877_v2 = vld [vmem:[#allocation2 + $0x2f] sm:$0xff]  ;;  %vm5883_vm4 = vmmov %vm5875_vm1 }
  0xc6   : > { %v3499_v54 = vpop.permute.xlu0 %3498  ;;  %v2193_v15 = vpack.c.bf16 %v2159_v43, %v2158_v9  ;;  %v367_v6 = vadd.s32 184, %v4136_v4  ;;  %3278 = vmatpush3.bf16.msra.mxu1 %v4689_v26  ;;  %v3797_v60 = vpack.i.bf16 %v1171_v23, %v5008_v39  ;;  %v366_v10 = vadd.s32 176, %v4136_v4  ;;  %vm5884_vm7 = vmmov %vm5876_vm8 }
  0xc7   : > { %vm5019_vm5 = vcmp.eq.s32.totalorder %v5879_v57, 0  ;;  %v3494_v17 = vpop.permute.xlu1 %3493  ;;  %3279 = vmatprep.subr.bf16.mxu1 %v3874_v63  ;;  %v1997_v52 = vsel %vm5875_vm1, %v3877_v2, %v3471_v20  ;;  %v5882_v53 = vsel %vm4364_vm9, 0.0, %v4225_v49  ;;  %v3792_v23 = vpack.i.bf16 %v4880_v62, %v1132_v50  ;;  %vm5885_vm9 = vmmov %vm5878_vm10 }
  0xc8   : > { %v5881_v35 = vsel %vm5019_vm5, 4294967295, %v5880_v35  ;;  %v1996_v31 = vsel %vm5883_vm4, %v5882_v53, %v3470_v19  ;;  %v3496_v56 = vunpack.i.h.bf16 %v3494_v17  ;;  %v3495_v7 = vunpack.i.l.bf16 %v3494_v17  ;;  %3788 = vrot.lane.b32.xlu0 %v4997_v1, %s4033_s24  ;;  %2474 = vmatprep.mubr.bf16.mxu0 %v2193_v15  ;;  %vm5886_vm10 = vmmov %vm5885_vm9 }
  0xc9   : > { %v2030_v26 = vsel %vm5876_vm8, %v1997_v52, %v3486_v5  ;;  %v2029_v4 = vsel %vm5884_vm7, %v1996_v31, %v3485_v40  ;;  %3783 = vrot.lane.b32.xlu1 %v3782_v55, %s4034_s26  ;;  %v1204_v49 = vsel %vm5019_vm5, 0.0, %v4905_v59  ;;  %v541_v51 = vand.u32 15, %v367_v6  ;;  %v5060_v6 = vld [vmem:[#allocation2 + $0xc8] sm:$0xff]  ;;  %v5073_v52 = vld [vmem:[#allocation2 + $0xd1] sm:$0xff] }
  0xca   : > { %v3509_v21 = vpop.permute.xlu0 %3508  ;;  %v2062_v20 = vsel %vm5885_vm9, %v2029_v4, %v3495_v7  ;;  %v2063_v19 = vsel %vm5886_vm10, %v2030_v26, %v3496_v56  ;;  %3280 = vmatpush3.bf16.msra.mxu1 %v3874_v63  ;;  %v3807_v5 = vpack.i.bf16 %v4959_v16, %v1204_v49  ;;  %v534_v55 = vand.u32 15, %v366_v10  ;;  %5889 = vst [vmem:[#allocation22_spill] sm:$0xff] %v5060_v6  ;;  %v3881_v31 = vld [vmem:[#allocation2 + $0xf0] sm:$0xff]  ;;  %v3882_v7 = vld [vmem:[#allocation2 + $0xe8] sm:$0xff] }
  0xcb   : > { %v3504_v38 = vpop.permute.xlu1 %3503  ;;  %v2192_v9 = vpack.c.bf16 %v2063_v19, %v2062_v20  ;;  %v3501_v62 = vunpack.i.h.bf16 %v3499_v54  ;;  %v3500_v40 = vunpack.i.l.bf16 %v3499_v54  ;;  %v1101_v15 = vsel %vm4955_vm6, 0.0, %v4913_v58  ;;  %v5062_v54 = vld [vmem:[#allocation2 + $0xd0] sm:$0xff] }
  0xcc   : > { %3798 = vrot.lane.b32.xlu0 %v3797_v60, %s4032_s20  ;;  %vm5052_vm1 = vcmp.eq.s32.totalorder %v541_v51, 15  ;;  %v1134_v57 = vsel %vm5019_vm5, 0.0, %v4928_v48  ;;  %5890 = vst [vmem:[#allocation23_spill] sm:$0xff] %v5062_v54  ;;  %v3817_v17 = vpack.i.bf16 %v5062_v54, %v5060_v6  ;;  %vm5066_vm4 = vcmp.eq.s32.totalorder %v534_v55, 0  ;;  %v3883_v20 = vld [vmem:[#allocation2 + $0xd7] sm:$0xff]  ;;  %v3930_v63 = vld [vmem:[#allocation2 + $0xe9] sm:$0xff] }
  0xcd   : > { %3793 = vrot.lane.b32.xlu1 %v3792_v23, %s4033_s24  ;;  %2475 = vmatmul.mubr.bf16.gmra.mxu0 %v2192_v9  ;;  %v3511_v10 = vunpack.i.h.bf16 %v3509_v21  ;;  %v3510_v2 = vunpack.i.l.bf16 %v3509_v21  ;;  %v3812_v48 = vpack.i.bf16 %v1101_v15, %v4936_v47  ;;  %v1173_v53 = vsel %vm5052_vm1, 0.0, %v5073_v52 }
  0xce   : > { %v5047_v43 = vpop.permute.xlu0 %3518  ;;  %vm5893_vm8 = vcmask 261120   ;;  %v3822_v23 = vpack.i.bf16 %v4950_v42, %v1134_v57  ;;  %v3506_v49 = vunpack.i.h.bf16 %v3504_v38  ;;  %v1206_v19 = vsel %vm5066_vm4, 0.0, %v3883_v20 }
  0xcf   : > { %v3514_v50 = vpop.permute.xlu1 %3513  ;;  %v2117_v56 = vsel %vm5893_vm8, %v3881_v31, %v3501_v62  ;;  %vm5894_vm7 = vmmov %vm5893_vm8  ;;  %v1103_v62 = vsel %vm5052_vm1, 0.0, %v4974_v8  ;;  %vm5895_vm9 = vcmask 523264   ;;  %v3521_v57 = vunpack.i.h.bf16 %v5047_v43 }
  0xd0   : > { %3808 = vrot.lane.b32.xlu0 %v3807_v5, %s4034_s26  ;;  %v2116_v26 = vsel %vm5894_vm7, %v3882_v7, %v3500_v40  ;;  %v5086_v5 = vld [vmem:[#allocation2 + $0xc9] sm:$0xff]  ;;  %vm5896_vm10 = vmmov %vm5895_vm9  ;;  %v3516_v40 = vunpack.i.h.bf16 %v3514_v50  ;;  %v3515_v15 = vunpack.i.l.bf16 %v3514_v50  ;;  %vm5897_vm8 = vcmask 785408  }
  0xd1   : > { %3803 = vrot.lane.b32.xlu1 %v4921_v11, %s4032_s20  ;;  %v3505_v11 = vunpack.i.l.bf16 %v3504_v38  ;;  %v3827_v55 = vpack.i.bf16 %v1173_v53, %v5086_v5  ;;  %v2148_v42 = vsel %vm5895_vm9, %v2116_v26, %v3510_v2  ;;  %v2149_v38 = vsel %vm5896_vm10, %v2117_v56, %v3511_v10  ;;  %vm5898_vm7 = vmmov %vm5897_vm8  ;;  %v3885_v53 = vld [vmem:[#allocation2 + $0xdf] sm:$0xff] }
  0xd2   : > { %v5080_v4 = vpop.permute.xlu0 %3528  ;;  %vm5899_vm5 = vcmask 261120   ;;  %v5900_v2 = vsel %vm4439_vm11, 0.0, %v4370_v25  ;;  %v3520_v50 = vunpack.i.l.bf16 %v5047_v43  ;;  %v3886_v25 = vld [vmem:[#allocation2 + $0x50] sm:$0xff] }
  0xd3   : > { %v3524_v21 = vpop.permute.xlu1 %3523  ;;  %v2019_v20 = vsel %vm5899_vm5, %v3885_v53, %v3506_v49  ;;  %vm5901_vm9 = vmmov %vm5899_vm5 }
  0xd4   : > { %v3526_v51 = vunpack.i.h.bf16 %v3524_v21  ;;  %v3525_v9 = vunpack.i.l.bf16 %v3524_v21  ;;  %3818 = vrot.lane.b32.xlu0 %v3817_v17, %s4033_s24  ;;  %v3837_v21 = vpack.i.bf16 %v3885_v53, %v1206_v19  ;;  %v2018_v10 = vsel %vm5901_vm9, %v5900_v2, %v3505_v11  ;;  %vm5903_vm11 = vmmov %vm5899_vm5 }
  0xd5   : > { %3813 = vrot.lane.b32.xlu1 %v3812_v48, %s4034_s26  ;;  %v2051_v19 = vsel %vm5896_vm10, %v2018_v10, %v3515_v15  ;;  %v2097_v27 = vsel %vm5903_vm11, %v3886_v25, %v3521_v57  ;;  %vm5904_vm5 = vmmov %vm5898_vm7 }
  0xd6   : > { %v3539_v31 = vpop.permute.xlu0 %3538  ;;  %v2180_v17 = vsel %vm5897_vm8, %v2148_v42, %v3525_v9  ;;  %v2181_v7 = vsel %vm5898_vm7, %v2149_v38, %v3526_v51  ;;  %vm5902_vm8 = vmmov %vm5896_vm10  ;;  %v3842_v42 = vpack.i.bf16 %v1103_v62, %v5008_v39  ;;  %v3887_v38 = vld [vmem:[#allocation2 + $0x48] sm:$0xff] }
  0xd7   : > { %v3534_v48 = vpop.permute.xlu1 %3533  ;;  %v2226_v56 = vpack.c.bf16 %v2181_v7, %v2180_v17  ;;  %v3541_v26 = vunpack.i.h.bf16 %v3539_v31  ;;  %v3540_v6 = vunpack.i.l.bf16 %v3539_v31  ;;  %v2052_v49 = vsel %vm5902_vm8, %v2019_v20, %v3516_v40  ;;  %vm5905_vm7 = vmmov %vm5904_vm5 }
  0xd8   : > { %v3536_v54 = vunpack.i.h.bf16 %v3534_v48  ;;  %v3535_v9 = vunpack.i.l.bf16 %v3534_v48  ;;  %3828 = vrot.lane.b32.xlu0 %v3827_v55, %s4032_s20  ;;  %v2096_v55 = vsel %vm5901_vm9, %v3887_v38, %v3520_v50  ;;  %v3530_v7 = vunpack.i.l.bf16 %v5080_v4  ;;  %vm5906_vm10 = vmmov %vm5902_vm8  ;;  %v3888_v48 = vld [vmem:[#allocation2 + $0x3f] sm:$0xff] }
  0xd9   : > { %3823 = vrot.lane.b32.xlu1 %v3822_v23, %s4033_s24  ;;  %2562 = vmatprep.mubr.bf16.mxu1 %v2226_v56  ;;  %v3531_v23 = vunpack.i.h.bf16 %v5080_v4  ;;  %v2128_v57 = vsel %vm5906_vm10, %v2096_v55, %v3540_v6  ;;  %v2129_v53 = vsel %vm5902_vm8, %v2097_v27, %v3541_v26  ;;  %vm5907_vm11 = vmmov %vm5904_vm5  ;;  %v1136_v6 = vsel %vm5066_vm4, 0.0, %v4905_v59 }
  0xda   : > { %v3549_v11 = vpop.permute.xlu0 %3548  ;;  %v2084_v43 = vsel %vm5904_vm5, %v2051_v19, %v3535_v9  ;;  %v2085_v51 = vsel %vm5905_vm7, %v2052_v49, %v3536_v54  ;;  %vm5908_vm7 = vmmov %vm5901_vm9  ;;  %v5909_v56 = vsel %vm4512_vm13, 0.0, %v4246_v61  ;;  %v3852_v49 = vpack.i.bf16 %v4959_v16, %v1136_v6  ;;  %v3890_v16 = vld [vmem:[#allocation2 + $0xf8] sm:$0xff] }
  0xdb   : > { %v3551_v31 = vunpack.i.h.bf16 %v3549_v11  ;;  %v3550_v15 = vunpack.i.l.bf16 %v3549_v11  ;;  %v3544_v17 = vpop.permute.xlu1 %3543  ;;  %v2225_v40 = vpack.c.bf16 %v2085_v51, %v2084_v43  ;;  %vm5910_vm9 = vmmov %vm5908_vm7 }
  0xdc   : > { %3838 = vrot.lane.b32.xlu0 %v3837_v21, %s4034_s26  ;;  %v3546_v54 = vunpack.i.h.bf16 %v3544_v17  ;;  %v3545_v20 = vunpack.i.l.bf16 %v3544_v17  ;;  %v1999_v21 = vsel %vm5908_vm7, %v3888_v48, %v3531_v23  ;;  %vm5911_vm10 = vmmov %vm5902_vm8 }
  0xdd   : > { %3833 = vrot.lane.b32.xlu1 %v4997_v1, %s4032_s20  ;;  %2563 = vmatmul.mubr.bf16.gmra.mxu1 %v2225_v40  ;;  %v2160_v62 = vsel %vm5907_vm11, %v2128_v57, %v3550_v15  ;;  %v2161_v2 = vsel %vm5904_vm5, %v2129_v53, %v3551_v31  ;;  %v1998_v1 = vsel %vm5910_vm9, %v5909_v56, %v3530_v7  ;;  %vm5912_vm11 = vmmov %vm5904_vm5  ;;  %v3889_v15 = vld [vmem:[#allocation2 + $0x100] sm:$0xff]  ;;  %s3943_s20 = sshll.u32 %s4035_s10, 4  ;;  %s3944_s20 = int_to_ptr.vmem [resolvable:$false] %s3943_s20 }
  0xde   : > { %v3559_v10 = vpop.permute.xlu0 %3558  ;;  %v2196_v50 = vpack.c.bf16 %v2161_v2, %v2160_v62  ;;  %v2032_v19 = vsel %vm5911_vm10, %v1999_v21, %v3546_v54  ;;  %v2031_v59 = vsel %vm5902_vm8, %v1998_v1, %v3545_v20  ;;  %vm5913_vm13 = vmmov %vm5904_vm5  ;;  %v3891_v21 = vld [vmem:[#allocation2 + $0xef] sm:$0xff]  ;;  %v5921_v1 = vsel %vm4550_vm14, 0.0, %v4308_v30  ;;  %p3946_p0 = scmp.lt.s32.totalorder %s5662_s13, %s3944_s20 }
  0xdf   : > { %v3554_v4 = vpop.permute.xlu1 %3553  ;;  %v3560_v43 = vunpack.i.l.bf16 %v3559_v10  ;;  %vm5914_vm5 = vmmov %vm5908_vm7 }
  0xe0   : > { %v3556_v26 = vunpack.i.h.bf16 %v3554_v4  ;;  %v3555_v9 = vunpack.i.l.bf16 %v3554_v4  ;;  %3848 = vrot.lane.b32.xlu0 %v4494_v14, %s4033_s24  ;;  %2482 = vmatprep.mubr.bf16.mxu0 %v2196_v50  ;;  %v3561_v14 = vunpack.i.h.bf16 %v3559_v10  ;;  %vm5915_vm7 = vmmov %vm5914_vm5 }
  0xe1   : > { %3843 = vrot.lane.b32.xlu1 %v3842_v42, %s4034_s26  ;;  %v2118_v17 = vsel %vm5915_vm7, %v3890_v16, %v3560_v43  ;;  %vm5916_vm9 = vmmov %vm5902_vm8  ;;  %s5378_s26 = scalar_lea.vmem %s5738_s4, %s3145_s14  ;;  %s3141_s14 = sshll.u32 %s4093_s23, 4 }
  0xe2   : > { %v3569_v25 = vpop.permute.xlu0 %3568  ;;  %v2064_v46 = vsel %vm5912_vm11, %v2031_v59, %v3555_v9  ;;  %v2065_v61 = vsel %vm5913_vm13, %v2032_v19, %v3556_v26  ;;  %v2119_v42 = vsel %vm5914_vm5, %v3889_v15, %v3561_v14  ;;  %vm5917_vm10 = vmmov %vm5902_vm8  ;;  %v3892_v14 = vld [vmem:[#allocation2 + $0x60] sm:$0xff]  ;;  %s5660_s27 = scalar_lea.hbm %s5739_s5, %s3141_s14  ;;  %s5668_s19 = scalar_lea.hbm %s5740_s6, %s3141_s14 }
  0xe3   : > { %v3564_v27 = vpop.permute.xlu1 %3563  ;;  %v2195_v11 = vpack.c.bf16 %v2065_v61, %v2064_v46  ;;  %v3571_v55 = vunpack.i.h.bf16 %v3569_v25  ;;  %v3570_v31 = vunpack.i.l.bf16 %v3569_v25  ;;  %vm5918_vm8 = vmmov %vm5912_vm11 }
  0xe4   : > { %v3566_v23 = vunpack.i.h.bf16 %v3564_v27  ;;  %v3565_v7 = vunpack.i.l.bf16 %v3564_v27  ;;  %vm5919_vm11 = vmmov %vm5918_vm8 }
  0xe5   : > { %3853 = vrot.lane.b32.xlu1 %v3852_v49, %s4033_s24  ;;  %2483 = vmatmul.mubr.bf16.gmra.mxu0 %v2195_v11  ;;  %v2150_v20 = vsel %vm5916_vm9, %v2118_v17, %v3570_v31  ;;  %v2151_v62 = vsel %vm5917_vm10, %v2119_v42, %v3571_v55  ;;  %vm5920_vm13 = vmmov %vm5914_vm5  ;;  %s3945_s24 = scalar_lea.vmem %s3944_s20, 32 }
  0xe6   : > { %v3579_v51 = vpop.permute.xlu0 %3578  ;;  %v2021_v56 = vsel %vm5920_vm13, %v3891_v21, %v3566_v23  ;;  %v2020_v26 = vsel %vm5914_vm5, %v5921_v1, %v3565_v7  ;;  %vm5922_vm7 = vmmov %vm5916_vm9  ;;  %p3947_p1 = scmp.lt.s32.totalorder %s3945_s24, %s3939_s9 }
  0xe7   : > { %v3574_v38 = vpop.permute.xlu1 %3573  ;;  %v3581_v50 = vunpack.i.h.bf16 %v3579_v51  ;;  %v3580_v9 = vunpack.i.l.bf16 %v3579_v51  ;;  %vm5923_vm9 = vmmov %vm5922_vm7  ;;  %v3893_v51 = vld [vmem:[#allocation2 + $0x58] sm:$0xff] }
  0xe8   : > { %v3576_v2 = vunpack.i.h.bf16 %v3574_v38  ;;  %v3575_v10 = vunpack.i.l.bf16 %v3574_v38  ;;  %vm5924_vm10 = vmmov %vm5914_vm5  ;;  %p3948_p2 = por %p3947_p1, %p3946_p0 }
  0xe9   : > { %v2099_v43 = vsel %vm5924_vm10, %v3892_v14, %v3581_v50  ;;  %vm5925_vm14 = vmmov %vm5918_vm8  ;;  %v3895_v14 = vld [vmem:[#allocation2 + $0x110] sm:$0xff] }
  0xea   : > { %v3589_v40 = vpop.permute.xlu0 %3588  ;;  %v2053_v27 = vsel %vm5922_vm7, %v2020_v26, %v3575_v10  ;;  %v2054_v11 = vsel %vm5923_vm9, %v2021_v56, %v3576_v2  ;;  %vm5927_vm13 = vmmov %vm5922_vm7  ;;  %p3949_p3 = pnand %p3948_p2, %p3942_p13 }
  0xeb   : > { %v3584_v57 = vpop.permute.xlu1 %3583  ;;  %v3591_v17 = vunpack.i.h.bf16 %v3589_v40  ;;  %v3590_v23 = vunpack.i.l.bf16 %v3589_v40  ;;  %v5931_v40 = vsel %vm4579_vm15, 0.0, %v4368_v22 }
  0xec   : > { %v3586_v53 = vunpack.i.h.bf16 %v3584_v57  ;;  %v3585_v54 = vunpack.i.l.bf16 %v3584_v57 }
  0xee   : > { %v3599_v6 = vpop.permute.xlu0 %3598  ;;  %v2182_v4 = vsel %vm5918_vm8, %v2150_v20, %v3585_v54  ;;  %v2183_v48 = vsel %vm5919_vm11, %v2151_v62, %v3586_v53  ;;  %vm5926_vm11 = vmmov %vm5914_vm5 }
  0xef   : > { %v3594_v19 = vpop.permute.xlu1 %3593  ;;  %v2229_v59 = vpack.c.bf16 %v2183_v48, %v2182_v4  ;;  %v3601_v49 = vunpack.i.h.bf16 %v3599_v6  ;;  %v3600_v25 = vunpack.i.l.bf16 %v3599_v6  ;;  %v2098_v55 = vsel %vm5926_vm11, %v3893_v51, %v3580_v9  ;;  %vm5928_vm5 = vmmov %vm5922_vm7  ;;  %v3894_v6 = vld [vmem:[#allocation2 + $0x4f] sm:$0xff] }
  0xf0   : > { %v3596_v46 = vunpack.i.h.bf16 %v3594_v19  ;;  %v3595_v61 = vunpack.i.l.bf16 %v3594_v19  ;;  %vm5929_vm7 = vmmov %vm5918_vm8  ;;  %v2001_v4 = vsel %vm5924_vm10, %v3894_v6, %v3591_v17 }
  0xf1   : > { %2570 = vmatprep.mubr.bf16.mxu1 %v2229_v59  ;;  %v2130_v7 = vsel %vm5927_vm13, %v2098_v55, %v3600_v25  ;;  %v2131_v57 = vsel %vm5928_vm5, %v2099_v43, %v3601_v49  ;;  %vm5930_vm9 = vmmov %vm5929_vm7 }
  0xf2   : > { %v3609_v45 = vpop.permute.xlu0 %3608  ;;  %v2086_v30 = vsel %vm5918_vm8, %v2053_v27, %v3595_v61  ;;  %v2087_v38 = vsel %vm5925_vm14, %v2054_v11, %v3596_v46  ;;  %vm5932_vm8 = vmmov %vm5924_vm10 }
  0xf3   : > { %v3611_v31 = vunpack.i.h.bf16 %v3609_v45  ;;  %v3610_v15 = vunpack.i.l.bf16 %v3609_v45  ;;  %v3604_v42 = vpop.permute.xlu1 %3603  ;;  %v2228_v16 = vpack.c.bf16 %v2087_v38, %v2086_v30  ;;  %v2000_v48 = vsel %vm5932_vm8, %v5931_v40, %v3590_v23  ;;  %vm5933_vm14 = vmmov %vm5928_vm5  ;;  %v3896_v45 = vld [vmem:[#allocation2 + $0x108] sm:$0xff] }
  0xf4   : > { %v3606_v53 = vunpack.i.h.bf16 %v3604_v42  ;;  %v3605_v54 = vunpack.i.l.bf16 %v3604_v42  ;;  %vm5934_vm11 = vmmov %vm5928_vm5 }
  0xf5   : > { %2571 = vmatmul.mubr.bf16.gmra.mxu1 %v2228_v16  ;;  %v2162_v20 = vsel %vm5929_vm7, %v2130_v7, %v3610_v15  ;;  %v2163_v62 = vsel %vm5930_vm9, %v2131_v57, %v3611_v31  ;;  %vm5935_vm13 = vmmov %vm5929_vm7  ;;  %v3897_v15 = vld [vmem:[#allocation2 + $0xf7] sm:$0xff] }
  0xf6   : > { %v3619_v2 = vpop.permute.xlu0 %3618  ;;  %v2199_v10 = vpack.c.bf16 %v2163_v62, %v2162_v20  ;;  %v2034_v1 = vsel %vm5933_vm14, %v2001_v4, %v3606_v53  ;;  %v2033_v26 = vsel %vm5934_vm11, %v2000_v48, %v3605_v54  ;;  %vm5936_vm5 = vmmov %vm5929_vm7  ;;  %v950_v42 = vsel %vm4646_vm0, 0.0, %v3897_v15 }
  0xf7   : > { %v3614_v50 = vpop.permute.xlu1 %3613  ;;  %v3621_v32 = vunpack.i.h.bf16 %v3619_v2  ;;  %v3620_v46 = vunpack.i.l.bf16 %v3619_v2  ;;  %vm5937_vm15 = vmmov %vm5932_vm8 }
  0xf8   : > { %v3616_v21 = vunpack.i.h.bf16 %v3614_v50  ;;  %v3615_v56 = vunpack.i.l.bf16 %v3614_v50  ;;  %2490 = vmatprep.mubr.bf16.mxu0 %v2199_v10  ;;  %vm5938_vm7 = vmmov %vm5932_vm8  ;;  %v3898_v10 = vld [vmem:[#allocation2 + $0x31] sm:$0xff] }
  0xf9   : > { %v2121_v43 = vsel %vm5937_vm15, %v3895_v14, %v3621_v32  ;;  %v2120_v30 = vsel %vm5938_vm7, %v3896_v45, %v3620_v46  ;;  %vm5939_vm9 = vmmov %vm5934_vm11  ;;  %vm5943_vm11 = vnez %v5773_v34  ;;  %v3903_v14 = vld [vmem:[#allocation2 + $0x68] sm:$0xff] }
  0xfa   : > { %v3629_v9 = vpop.permute.xlu0 %3628  ;;  %v2066_v19 = vsel %vm5935_vm13, %v2033_v26, %v3615_v56  ;;  %v2067_v59 = vsel %vm5936_vm5, %v2034_v1, %v3616_v21  ;;  %vm5940_vm10 = vmmov %vm5939_vm9  ;;  %v1221_v50 = vsel %vm5943_vm11, 0.0, %v3898_v10 }
  0xfb   : > { %v3624_v49 = vpop.permute.xlu1 %3623  ;;  %v2198_v25 = vpack.c.bf16 %v2067_v59, %v2066_v19  ;;  %v3631_v27 = vunpack.i.h.bf16 %v3629_v9  ;;  %v3630_v11 = vunpack.i.l.bf16 %v3629_v9  ;;  %vm5941_vm8 = vmmov %vm5936_vm5 }
  0xfc   : > { %v3626_v51 = vunpack.i.h.bf16 %v3624_v49  ;;  %v3625_v55 = vunpack.i.l.bf16 %v3624_v49  ;;  %vm5942_vm14 = vmmov %vm5936_vm5  ;;  %v3900_v49 = vld [vmem:[#allocation2 + $0x57] sm:$0xff] }
  0xfd   : > { %2491 = vmatmul.mubr.bf16.gmra.mxu0 %v2198_v25  ;;  %v2152_v23 = vsel %vm5939_vm9, %v2120_v30, %v3630_v11  ;;  %v2153_v7 = vsel %vm5940_vm10, %v2121_v43, %v3631_v27  ;;  %vm5944_vm0 = vmmov %vm5938_vm7  ;;  %vm5948_vm7 = vnez %v5820_v36  ;;  %v3901_v25 = vld [vmem:[#allocation2 + $0x70] sm:$0xff] }
  0xfe   : > { %v3639_v22 = vpop.permute.xlu0 %3638  ;;  %v2023_v6 = vsel %vm5944_vm0, %v3899_v44, %v3626_v51  ;;  %vm5945_vm13 = vmmov %vm5944_vm0  ;;  %v930_v34 = vsel %vm5948_vm7, 0.0, %v3900_v49  ;;  %v3902_v27 = vld [vmem:[#allocation2 + $0x29] sm:$0xff] }
  0xff   : > { %v3634_v61 = vpop.permute.xlu1 %3633  ;;  %v3641_v54 = vunpack.i.h.bf16 %v3639_v22  ;;  %v2022_v4 = vsel %vm5945_vm13, %v950_v42, %v3625_v55  ;;  %v3640_v40 = vunpack.i.l.bf16 %v3639_v22  ;;  %vm5946_vm5 = vmmov %vm5939_vm9  ;;  %v2188_v11 = vpack.c.bf16 %v1221_v50, %v3902_v27 }
 0x100   : > { %v3636_v57 = vunpack.i.h.bf16 %v3634_v61  ;;  %v3635_v53 = vunpack.i.l.bf16 %v3634_v61  ;;  %vm5947_vm15 = vmmov %vm5946_vm5 }
 0x101   : > { %vm5949_vm9 = vmmov %vm5944_vm0 }
 0x102   : > { %v5175_v38 = vpop.permute.xlu0 %3648  ;;  %v2055_v19 = vsel %vm5946_vm5, %v2022_v4, %v3635_v53  ;;  %v2056_v59 = vsel %vm5947_vm15, %v2023_v6, %v3636_v57  ;;  %v2101_v32 = vsel %vm5949_vm9, %v3901_v25, %v3641_v54  ;;  %vm5950_vm10 = vmmov %vm5941_vm8 }
 0x103   : > { %v3644_v31 = vpop.permute.xlu1 %3643  ;;  %v3651_v36 = vunpack.i.h.bf16 %v5175_v38  ;;  %vm5952_vm11 = vmmov %vm5946_vm5 }
 0x104   : > { %v3646_v16 = vunpack.i.h.bf16 %v3644_v31  ;;  %v3645_v17 = vunpack.i.l.bf16 %v3644_v31  ;;  %v3650_v31 = vunpack.i.l.bf16 %v5175_v38  ;;  %vm5954_vm13 = vmmov %vm5941_vm8 }
 0x105   : > { %vm5956_vm15 = vmmov %vm5949_vm9 }
 0x106   : > { %v3659_v20 = vpop.permute.xlu0 %3658  ;;  %v2184_v62 = vsel %vm5941_vm8, %v2152_v23, %v3645_v17  ;;  %v2185_v2 = vsel %vm5942_vm14, %v2153_v7, %v3646_v16  ;;  %vm5951_vm14 = vmmov %vm5944_vm0 }
 0x107   : > { %v3654_v48 = vpop.permute.xlu1 %3653  ;;  %v2232_v21 = vpack.c.bf16 %v2185_v2, %v2184_v62  ;;  %v3661_v56 = vunpack.i.h.bf16 %v3659_v20  ;;  %v3660_v1 = vunpack.i.l.bf16 %v3659_v20  ;;  %v2100_v43 = vsel %vm5951_vm14, %v3903_v14, %v3640_v40  ;;  %vm5953_vm0 = vmmov %vm5946_vm5  ;;  %v3904_v20 = vld [vmem:[#allocation2 + $0x51] sm:$0xff]  ;;  %v5957_v62 = vld [vmem:[#allocation11_spill] sm:$0xff] }
 0x108   : > { %v3656_v26 = vunpack.i.h.bf16 %v3654_v48  ;;  %v3655_v9 = vunpack.i.l.bf16 %v3654_v48  ;;  %vm5955_vm5 = vmmov %vm5941_vm8  ;;  %vm5958_vm7 = vnez %v5957_v62  ;;  %v3905_v2 = vld [vmem:[#allocation2 + $0x5f] sm:$0xff] }
 0x109   : > { %2578 = vmatprep.mubr.bf16.mxu1 %v2232_v21  ;;  %v2132_v15 = vsel %vm5952_vm11, %v2100_v43, %v3660_v1  ;;  %v2133_v42 = vsel %vm5953_vm0, %v2101_v32, %v3661_v56  ;;  %v1225_v38 = vsel %vm5958_vm7, 0.0, %v3904_v20  ;;  %v2003_v10 = vsel %vm5949_vm9, %v3905_v2, %v3651_v36  ;;  %vm5961_vm14 = vmmov %vm5953_vm0  ;;  %v3907_v32 = vld [vmem:[#allocation2 + $0x61] sm:$0xff]  ;;  %v5968_v43 = vld [vmem:[#allocation9_spill] sm:$0xff] }
 0x10a   : > { %v3669_v46 = vpop.permute.xlu0 %3668  ;;  %v2088_v22 = vsel %vm5950_vm10, %v2055_v19, %v3655_v9  ;;  %v2089_v61 = vsel %vm5941_vm8, %v2056_v59, %v3656_v26  ;;  %vm5959_vm10 = vmmov %vm5949_vm9  ;;  %v3906_v9 = vld [vmem:[#allocation2 + $0x49] sm:$0xff] }
 0x10b   : > { %v3671_v45 = vunpack.i.h.bf16 %v3669_v46  ;;  %v3670_v30 = vunpack.i.l.bf16 %v3669_v46  ;;  %v3664_v51 = vpop.permute.xlu1 %3663  ;;  %v2231_v55 = vpack.c.bf16 %v2089_v61, %v2088_v22  ;;  %v2002_v50 = vsel %vm5959_vm10, %v930_v34, %v3650_v31  ;;  %vm5960_vm8 = vmmov %vm5953_vm0  ;;  %v5964_v46 = vld [vmem:[#allocation14_spill] sm:$0xff] }
 0x10c   : > { %v3666_v16 = vunpack.i.h.bf16 %v3664_v51  ;;  %v3665_v17 = vunpack.i.l.bf16 %v3664_v51  ;;  %vm5962_vm11 = vmmov %vm5955_vm5  ;;  %v2194_v19 = vpack.c.bf16 %v1225_v38, %v3906_v9  ;;  %v3908_v61 = vld [vmem:[#allocation2 + $0x80] sm:$0xff] }
 0x10d   : > { %2579 = vmatmul.mubr.bf16.gmra.mxu1 %v2231_v55  ;;  %v2164_v23 = vsel %vm5954_vm13, %v2132_v15, %v3670_v30  ;;  %v2165_v7 = vsel %vm5955_vm5, %v2133_v42, %v3671_v45  ;;  %vm5963_vm0 = vmmov %vm5955_vm5  ;;  %vm5965_vm13 = vnez %v5964_v46  ;;  %v3910_v45 = vld [vmem:[#allocation2 + $0x67] sm:$0xff]  ;;  %v3911_v42 = vld [vmem:[#allocation2 + $0x59] sm:$0xff] }
 0x10e   : > { %v3679_v57 = vpop.permute.xlu0 %3678  ;;  %v2202_v53 = vpack.c.bf16 %v2165_v7, %v2164_v23  ;;  %3281 = vmatprep.mubr.msk.bf16.mxu1 %vm5956_vm15, %v2188_v11  ;;  %v2036_v4 = vsel %vm5960_vm8, %v2003_v10, %v3666_v16  ;;  %v2035_v40 = vsel %vm5961_vm14, %v2002_v50, %v3665_v17  ;;  %v1227_v22 = vsel %vm5965_vm13, 0.0, %v3907_v32  ;;  %vm5966_vm5 = vmmov %vm5949_vm9  ;;  %v3909_v11 = vld [vmem:[#allocation2 + $0x78] sm:$0xff]  ;;  %v5970_v30 = vld [vmem:[#allocation19_spill] sm:$0xff] }
 0x10f   : > { %v3674_v54 = vpop.permute.xlu1 %3673  ;;  %v3681_v48 = vunpack.i.h.bf16 %v3679_v57  ;;  %v3680_v21 = vunpack.i.l.bf16 %v3679_v57  ;;  %vm5967_vm15 = vmmov %vm5966_vm5  ;;  %vm5971_vm9 = vnez %v5970_v30  ;;  %v2197_v16 = vpack.c.bf16 %v1227_v22, %v3911_v42  ;;  %v3912_v17 = vld [vmem:[#allocation2 + $0x71] sm:$0xff]  ;;  %v5973_v23 = vld [vmem:[#allocation15_spill] sm:$0xff] }
 0x110   : > { %v3676_v44 = vunpack.i.h.bf16 %v3674_v54  ;;  %v3675_v6 = vunpack.i.l.bf16 %v3674_v54  ;;  %2498 = vmatprep.mubr.bf16.mxu0 %v2202_v53  ;;  %vm5969_vm7 = vmmov %vm5966_vm5  ;;  %v932_v51 = vsel %vm5971_vm9, 0.0, %v3910_v45  ;;  %vm5974_vm8 = vnez %v5973_v23  ;;  %v3915_v46 = vld [vmem:[#allocation2 + $0x81] sm:$0xff]  ;;  %v5984_v22 = vld [vmem:[#allocation17_spill] sm:$0xff] }
 0x111   : > { %v2103_v27 = vsel %vm5966_vm5, %v3908_v61, %v3681_v48  ;;  %v2102_v14 = vsel %vm5967_vm15, %v3909_v11, %v3680_v21  ;;  %vm5972_vm10 = vmmov %vm5966_vm5  ;;  %v1229_v7 = vsel %vm5974_vm8, 0.0, %v3912_v17  ;;  %v3914_v48 = vld [vmem:[#allocation2 + $0x6f] sm:$0xff]  ;;  %v3919_v42 = vld [vmem:[#allocation2 + $0x79] sm:$0xff] }
 0x112   : > { %v3689_v56 = vpop.permute.xlu0 %3688  ;;  %v2068_v1 = vsel %vm5962_vm11, %v2035_v40, %v3675_v6  ;;  %v2069_v26 = vsel %vm5963_vm0, %v2036_v4, %v3676_v44  ;;  %vm5975_vm11 = vmmov %vm5961_vm14  ;;  %v3913_v6 = vld [vmem:[#allocation2 + $0x69] sm:$0xff] }
 0x113   : > { %v3684_v59 = vpop.permute.xlu1 %3683  ;;  %v2201_v49 = vpack.c.bf16 %v2069_v26, %v2068_v1  ;;  %v3691_v25 = vunpack.i.h.bf16 %v3689_v56  ;;  %v3690_v34 = vunpack.i.l.bf16 %v3689_v56  ;;  %vm5976_vm13 = vmmov %vm5963_vm0  ;;  %v2200_v4 = vpack.c.bf16 %v1229_v7, %v3913_v6  ;;  %v3920_v23 = vld [vmem:[#allocation2 + $0x89] sm:$0xff] }
 0x114   : > { %v3686_v54 = vunpack.i.h.bf16 %v3684_v59  ;;  %v3685_v20 = vunpack.i.l.bf16 %v3684_v59  ;;  %vm5977_vm15 = vmmov %vm5966_vm5 }
 0x115   : > { %2499 = vmatmul.mubr.bf16.gmra.mxu0 %v2201_v49  ;;  %3282 = vmatmul.mubr.msk.bf16.vlgmr.msra.gmra.mxu1 %vm5969_vm7, %v5968_v43  ;;  %v2134_v57 = vsel %vm5961_vm14, %v2102_v14, %v3690_v34  ;;  %v2135_v53 = vsel %vm5975_vm11, %v2103_v27, %v3691_v25  ;;  %vm5978_vm7 = vmmov %vm5975_vm11  ;;  %v3916_v14 = vld [vmem:[#allocation2 + $0x91] sm:$0xff]  ;;  %v5986_v43 = vld [vmem:[#allocation18_spill] sm:$0xff] }
 0x116   : > { %v3699_v55 = vpop.permute.xlu0 %3698  ;;  %3285 = vmatprep.mubr.msk.bf16.mxu1 %vm5972_vm10, %v2194_v19  ;;  %v2005_v21 = vsel %vm5966_vm5, %v3914_v48, %v3686_v54  ;;  %v2004_v56 = vsel %vm5977_vm15, %v932_v51, %v3685_v20  ;;  %vm5979_vm9 = vmmov %vm5978_vm7 }
 0x117   : > { %v3701_v36 = vunpack.i.h.bf16 %v3699_v55  ;;  %v3700_v31 = vunpack.i.l.bf16 %v3699_v55  ;;  %v3694_v15 = vpop.permute.xlu1 %3693  ;;  %vm5980_vm10 = vmmov %vm5966_vm5  ;;  %v3917_v55 = vld [vmem:[#allocation2 + $0x90] sm:$0xff] }
 0x118   : > { %v3696_v62 = vunpack.i.h.bf16 %v3694_v15  ;;  %v3695_v38 = vunpack.i.l.bf16 %v3694_v15  ;;  %vm5981_vm8 = vmmov %vm5963_vm0 }
 0x119   : > { %v2166_v2 = vsel %vm5963_vm0, %v2134_v57, %v3700_v31  ;;  %v2167_v10 = vsel %vm5976_vm13, %v2135_v53, %v3701_v36  ;;  %vm5982_vm14 = vmmov %vm5963_vm0  ;;  %vm5985_vm0 = vnez %v5984_v22  ;;  %vm5987_vm13 = vnez %v5986_v43  ;;  %v3918_v31 = vld [vmem:[#allocation2 + $0x88] sm:$0xff]  ;;  %v3921_v57 = vld [vmem:[#allocation2 + $0x77] sm:$0xff] }
 0x11a   : > { %v3709_v50 = vpop.permute.xlu0 %3708  ;;  %v2205_v44 = vpack.c.bf16 %v2167_v10, %v2166_v2  ;;  %v2037_v9 = vsel %vm5978_vm7, %v2004_v56, %v3695_v38  ;;  %v2038_v19 = vsel %vm5979_vm9, %v2005_v21, %v3696_v62  ;;  %vm5983_vm11 = vmmov %vm5966_vm5  ;;  %v1231_v61 = vsel %vm5985_vm0, 0.0, %v3915_v46  ;;  %v5989_v38 = vld [vmem:[#allocation20_spill] sm:$0xff] }
 0x11b   : > { %v3704_v40 = vpop.permute.xlu1 %3703  ;;  %v3711_v59 = vunpack.i.h.bf16 %v3709_v50  ;;  %v3710_v49 = vunpack.i.l.bf16 %v3709_v50  ;;  %v1233_v45 = vsel %vm5987_vm13, 0.0, %v3916_v14  ;;  %vm5988_vm15 = vmmov %vm5966_vm5  ;;  %v934_v53 = vsel %vm4780_vm2, 0.0, %v3921_v57 }
 0x11c   : > { %v3706_v1 = vunpack.i.h.bf16 %v3704_v40  ;;  %v3705_v26 = vunpack.i.l.bf16 %v3704_v40  ;;  %2506 = vmatprep.mubr.bf16.mxu0 %v2205_v44  ;;  %v2206_v7 = vpack.c.bf16 %v1233_v45, %v3920_v23  ;;  %vm5990_vm7 = vnez %v5989_v38  ;;  %vm5993_vm2 = vmmov %vm5982_vm14 }
 0x11d   : > { %3286 = vmatmul.mubr.msk.bf16.gmra.mxu1 %vm5980_vm10, %v2197_v16  ;;  %v2105_v36 = vsel %vm5966_vm5, %v3917_v55, %v3711_v59  ;;  %v2104_v15 = vsel %vm5988_vm15, %v3918_v31, %v3710_v49  ;;  %v2203_v16 = vpack.c.bf16 %v1231_v61, %v3919_v42  ;;  %v1235_v2 = vsel %vm5990_vm7, 0.0, %v4825_v33  ;;  %vm5991_vm10 = vmmov %vm5979_vm9  ;;  %v3924_v55 = vld [vmem:[#allocation2 + $0x98] sm:$0xff]  ;;  %v3925_v31 = vld [vmem:[#allocation2 + $0x87] sm:$0xff] }
 0x11e   : > { %v3719_v25 = vpop.permute.xlu0 %3718  ;;  %v2070_v34 = vsel %vm5981_vm8, %v2037_v9, %v3705_v26  ;;  %v2071_v32 = vsel %vm5982_vm14, %v2038_v19, %v3706_v1  ;;  %3289 = vmatprep.mubr.msk.bf16.mxu1 %vm5983_vm11, %v2200_v4  ;;  %vm5992_vm8 = vmmov %vm5966_vm5  ;;  %v2209_v33 = vpack.c.bf16 %v1235_v2, %v4847_v13  ;;  %v1237_v26 = vsel %vm4820_vm12, 0.0, %v4913_v58  ;;  %v3922_v9 = vld [vmem:[#allocation2 + $0x7f] sm:$0xff] }
 0x11f   : > { %v3714_v27 = vpop.permute.xlu1 %3713  ;;  %v2204_v11 = vpack.c.bf16 %v2071_v32, %v2070_v34  ;;  %v3721_v30 = vunpack.i.h.bf16 %v3719_v25  ;;  %v3720_v51 = vunpack.i.l.bf16 %v3719_v25  ;;  %vm5994_vm11 = vmmov %vm5966_vm5  ;;  %v2212_v58 = vpack.c.bf16 %v1237_v26, %v4936_v47 }
 0x120   : > { %v3716_v44 = vunpack.i.h.bf16 %v3714_v27  ;;  %v3715_v6 = vunpack.i.l.bf16 %v3714_v27  ;;  %vm5995_vm0 = vmmov %vm5966_vm5  ;;  %vm6001_vm12 = vnez %v5859_v12 }
 0x121   : > { %2507 = vmatmul.mubr.bf16.gmra.mxu0 %v2204_v11  ;;  %v2136_v10 = vsel %vm5979_vm9, %v2104_v15, %v3720_v51  ;;  %v2137_v50 = vsel %vm5991_vm10, %v2105_v36, %v3721_v30  ;;  %vm5996_vm13 = vmmov %vm5995_vm0  ;;  %v1239_v45 = vsel %vm6001_vm12, 0.0, %v4974_v8  ;;  %v3923_v30 = vld [vmem:[#allocation2 + $0xa0] sm:$0xff] }
 0x122   : > { %v3729_v17 = vpop.permute.xlu0 %3728  ;;  %v2007_v19 = vsel %vm5995_vm0, %v3922_v9, %v3716_v44  ;;  %v2006_v59 = vsel %vm5996_vm13, %v934_v53, %v3715_v6  ;;  %vm5997_vm5 = vmmov %vm5979_vm9  ;;  %v2215_v8 = vpack.c.bf16 %v1239_v45, %v5008_v39 }
 0x123   : > { %v3731_v54 = vunpack.i.h.bf16 %v3729_v17  ;;  %v3730_v20 = vunpack.i.l.bf16 %v3729_v17  ;;  %v3724_v62 = vpop.permute.xlu1 %3723  ;;  %vm5998_vm15 = vmmov %vm5997_vm5  ;;  %v1241_v17 = vsel %vm4955_vm6, 0.0, %v5073_v52 }
 0x124   : > { %v3726_v4 = vunpack.i.h.bf16 %v3724_v62  ;;  %v3725_v40 = vunpack.i.l.bf16 %v3724_v62  ;;  %vm5999_vm7 = vmmov %vm5993_vm2  ;;  %v2218_v39 = vpack.c.bf16 %v1241_v17, %v5086_v5 }
 0x125   : > { %3290 = vmatmul.mubr.msk.bf16.gmra.mxu1 %vm5992_vm8, %v2203_v16  ;;  %v2168_v41 = vsel %vm5982_vm14, %v2136_v10, %v3730_v20  ;;  %v2169_v48 = vsel %vm5993_vm2, %v2137_v50, %v3731_v54  ;;  %vm6000_vm9 = vmmov %vm5993_vm2  ;;  %vm6005_vm2 = vnez %v5850_v18  ;;  %v3926_v50 = vld [vmem:[#allocation2 + $0x8f] sm:$0xff] }
 0x126   : > { %v3739_v21 = vpop.permute.xlu0 %3738  ;;  %v2208_v56 = vpack.c.bf16 %v2169_v48, %v2168_v41  ;;  %3293 = vmatprep.mubr.msk.bf16.mxu1 %vm5994_vm11, %v2206_v7  ;;  %v2039_v34 = vsel %vm5997_vm5, %v2006_v59, %v3725_v40  ;;  %v2040_v32 = vsel %vm5998_vm15, %v2007_v19, %v3726_v4  ;;  %vm6002_vm10 = vmmov %vm5995_vm0  ;;  %v936_v47 = vsel %vm6005_vm2, 0.0, %v3925_v31  ;;  %v3928_v19 = vld [vmem:[#allocation2 + $0xf1] sm:$0xff]  ;;  %v6019_v59 = vld [vmem:[#allocation10_spill] sm:$0xff] }
 0x127   : > { %v3734_v1 = vpop.permute.xlu1 %3733  ;;  %v3741_v46 = vunpack.i.h.bf16 %v3739_v21  ;;  %v3740_v22 = vunpack.i.l.bf16 %v3739_v21  ;;  %vm6003_vm8 = vmmov %vm5995_vm0 }
 0x128   : > { %v3736_v49 = vunpack.i.h.bf16 %v3734_v1  ;;  %v3735_v25 = vunpack.i.l.bf16 %v3734_v1  ;;  %2514 = vmatprep.mubr.bf16.mxu0 %v2208_v56  ;;  %vm6004_vm14 = vmmov %vm5995_vm0  ;;  %v3927_v1 = vld [vmem:[#allocation2 + $0xe1] sm:$0xff] }
 0x129   : > { %v2107_v51 = vsel %vm6002_vm10, %v3923_v30, %v3741_v46  ;;  %v2106_v36 = vsel %vm6003_vm8, %v3924_v55, %v3740_v22  ;;  %vm6006_vm11 = vmmov %vm5995_vm0  ;;  %v6022_v46 = vld [vmem:[#allocation21_spill] sm:$0xff]  ;;  %v3932_v30 = vld [vmem:[#allocation2 + $0x101] sm:$0xff] }
 0x12a   : > { %v3749_v61 = vpop.permute.xlu0 %3748  ;;  %v2072_v13 = vsel %vm5999_vm7, %v2039_v34, %v3735_v25  ;;  %v2073_v28 = vsel %vm6000_vm9, %v2040_v32, %v3736_v49  ;;  %vm6007_vm0 = vmmov %vm5997_vm5 }
 0x12b   : > { %v3744_v27 = vpop.permute.xlu1 %3743  ;;  %v2207_v11 = vpack.c.bf16 %v2073_v28, %v2072_v13  ;;  %v3751_v14 = vunpack.i.h.bf16 %v3749_v61  ;;  %v3750_v43 = vunpack.i.l.bf16 %v3749_v61  ;;  %vm6008_vm13 = vmmov %vm6007_vm0  ;;  %v3929_v61 = vld [vmem:[#allocation2 + $0xd9] sm:$0xff] }
 0x12c   : > { %v3746_v57 = vunpack.i.h.bf16 %v3744_v27  ;;  %v3745_v53 = vunpack.i.l.bf16 %v3744_v27  ;;  %vm6009_vm5 = vmmov %vm5999_vm7  ;;  %v3931_v27 = vld [vmem:[#allocation2 + $0x97] sm:$0xff] }
 0x12d   : > { %2515 = vmatmul.mubr.bf16.gmra.mxu0 %v2207_v11  ;;  %3294 = vmatmul.mubr.msk.bf16.gmra.mxu1 %vm6004_vm14, %v2209_v33  ;;  %v2138_v23 = vsel %vm6007_vm0, %v2106_v36, %v3750_v43  ;;  %v2139_v7 = vsel %vm6008_vm13, %v2107_v51, %v3751_v14  ;;  %vm6010_vm15 = vmmov %vm6009_vm5  ;;  %v1243_v33 = vsel %vm5052_vm1, 0.0, %v3927_v1  ;;  %v938_v11 = vsel %vm4924_vm3, 0.0, %v3931_v27  ;;  %v6024_v51 = vld [vmem:[#allocation13_spill] sm:$0xff] }
 0x12e   : > { %v3759_v15 = vpop.permute.xlu0 %3758  ;;  %3297 = vmatprep.mubr.msk.bf16.mxu1 %vm6006_vm11, %v2212_v58  ;;  %vm6011_vm7 = vmmov %vm6003_vm8  ;;  %vm6020_vm11 = vnez %v6019_v59  ;;  %v2221_v13 = vpack.c.bf16 %v1243_v33, %v3929_v61  ;;  %vm6025_vm1 = vnez %v6024_v51  ;;  %v6043_v33 = vld [vmem:[#allocation12_spill] sm:$0xff] }
 0x12f   : > { %v3761_v42 = vunpack.i.h.bf16 %v3759_v15  ;;  %v3760_v16 = vunpack.i.l.bf16 %v3759_v15  ;;  %v3754_v12 = vpop.permute.xlu1 %3753  ;;  %v2009_v37 = vsel %vm6011_vm7, %v3926_v50, %v3746_v57  ;;  %vm6012_vm6 = vmmov %vm6011_vm7  ;;  %v1245_v49 = vsel %vm6020_vm11, 0.0, %v3928_v19  ;;  %v3934_v57 = vld [vmem:[#allocation2 + $0x9f] sm:$0xff] }
 0x130   : > { %v3756_v18 = vunpack.i.h.bf16 %v3754_v12  ;;  %v3755_v54 = vunpack.i.l.bf16 %v3754_v12  ;;  %v2008_v52 = vsel %vm6012_vm6, %v936_v47, %v3745_v53  ;;  %vm6013_vm9 = vmmov %vm6007_vm0  ;;  %v2224_v58 = vpack.c.bf16 %v1245_v49, %v3930_v63 }
 0x131   : > { %v2170_v20 = vsel %vm6009_vm5, %v2138_v23, %v3760_v16  ;;  %v2171_v62 = vsel %vm6010_vm15, %v2139_v7, %v3761_v42  ;;  %vm6014_vm12 = vmmov %vm6007_vm0  ;;  %v3933_v23 = vld [vmem:[#allocation2 + $0xf9] sm:$0xff] }
 0x132   : > { %v3769_v38 = vpop.permute.xlu0 %3768  ;;  %v2211_v2 = vpack.c.bf16 %v2171_v62, %v2170_v20  ;;  %v2041_v4 = vsel %vm6013_vm9, %v2008_v52, %v3755_v54  ;;  %v2042_v40 = vsel %vm6014_vm12, %v2009_v37, %v3756_v18  ;;  %vm6015_vm10 = vmmov %vm6012_vm6 }
 0x133   : > { %v3764_v10 = vpop.permute.xlu1 %3763  ;;  %v3771_v41 = vunpack.i.h.bf16 %v3769_v38  ;;  %v3770_v48 = vunpack.i.l.bf16 %v3769_v38  ;;  %vm6016_vm8 = vmmov %vm6009_vm5 }
 0x134   : > { %v3766_v44 = vunpack.i.h.bf16 %v3764_v10  ;;  %v3765_v6 = vunpack.i.l.bf16 %v3764_v10  ;;  %2522 = vmatprep.mubr.bf16.mxu0 %v2211_v2  ;;  %vm6017_vm14 = vmmov %vm6009_vm5  ;;  %v1219_v10 = vld [vmem:[#allocation2 + $0x121] sm:$0xff] }
 0x135   : > { %3298 = vmatmul.mubr.msk.bf16.gmra.mxu1 %vm6015_vm10, %v2215_v8  ;;  %vm6018_vm2 = vmmov %vm6012_vm6 }
 0x136   : > { %v3779_v21 = vpop.permute.xlu0 %3778  ;;  %v2074_v5 = vsel %vm6016_vm8, %v2041_v4, %v3765_v6  ;;  %v2075_v56 = vsel %vm6017_vm14, %v2042_v40, %v3766_v44  ;;  %3301 = vmatprep.mubr.msk.bf16.mxu1 %vm6018_vm2, %v2218_v39  ;;  %vm6021_vm0 = vmmov %vm6018_vm2 }
 0x137   : > { %v3774_v26 = vpop.permute.xlu1 %3773  ;;  %v2210_v9 = vpack.c.bf16 %v2075_v56, %v2074_v5  ;;  %v3781_v25 = vunpack.i.h.bf16 %v3779_v21  ;;  %v3780_v34 = vunpack.i.l.bf16 %v3779_v21  ;;  %v2109_v32 = vsel %vm6021_vm0, %v4898_v3, %v3771_v41  ;;  %vm6023_vm13 = vmmov %vm6021_vm0  ;;  %v1218_v41 = vld [vmem:[#allocation2 + $0x119] sm:$0xff] }
 0x138   : > { %v2108_v22 = vsel %vm6023_vm13, %v6022_v46, %v3770_v48  ;;  %v1247_v3 = vsel %vm6025_vm1, 0.0, %v3932_v30  ;;  %vm6026_vm5 = vmmov %vm6013_vm9  ;;  %v3776_v31 = vunpack.i.h.bf16 %v3774_v26  ;;  %v3775_v47 = vunpack.i.l.bf16 %v3774_v26  ;;  %v6038_v48 = vld [vmem:[#allocation16_spill] sm:$0xff] }
 0x139   : > { %2523 = vmatmul.mubr.bf16.gmra.mxu0 %v2210_v9  ;;  %v2140_v55 = vsel %vm6026_vm5, %v2108_v22, %v3780_v34  ;;  %vm6027_vm15 = vmmov %vm6026_vm5  ;;  %v2227_v7 = vpack.c.bf16 %v1247_v3, %v3933_v23  ;;  %v3935_v26 = vld [vmem:[#allocation2 + $0xa7] sm:$0xff] }
 0x13a   : > { %v3789_v28 = vpop.permute.xlu0 %3788  ;;  %v2141_v36 = vsel %vm6027_vm15, %v2109_v32, %v3781_v25  ;;  %vm6028_vm7 = vmmov %vm6021_vm0 }
 0x13b   : > { %v3791_v14 = vunpack.i.h.bf16 %v3789_v28  ;;  %v3790_v43 = vunpack.i.l.bf16 %v3789_v28  ;;  %v3784_v45 = vpop.permute.xlu1 %3783  ;;  %vm6029_vm6 = vmmov %vm6016_vm8 }
 0x13c   : > { %v3786_v15 = vunpack.i.h.bf16 %v3784_v45  ;;  %v3785_v42 = vunpack.i.l.bf16 %v3784_v45  ;;  %vm6030_vm3 = vmmov %vm6029_vm6 }
 0x13d   : > { %3302 = vmatmul.mubr.msk.bf16.gmra.mxu1 %vm6028_vm7, %v2221_v13  ;;  %v2172_v24 = vsel %vm6029_vm6, %v2140_v55, %v3790_v43  ;;  %v2173_v16 = vsel %vm6030_vm3, %v2141_v36, %v3791_v14  ;;  %vm6031_vm9 = vmmov %vm6021_vm0 }
 0x13e   : > { %v3799_v12 = vpop.permute.xlu0 %3798  ;;  %v2214_v8 = vpack.c.bf16 %v2173_v16, %v2172_v24  ;;  %3305 = vmatprep.mubr.msk.bf16.mxu1 %vm6031_vm9, %v2224_v58  ;;  %vm6032_vm12 = vmmov %vm6021_vm0  ;;  %v3936_v58 = vld [vmem:[#allocation2 + $0xaf] sm:$0xff]  ;;  %v6057_v16 = vld [vmem:[#allocation23_spill] sm:$0xff] }
 0x13f   : > { %v3794_v17 = vpop.permute.xlu1 %3793  ;;  %v2011_v53 = vsel %vm6032_vm12, %v3934_v57, %v3776_v31  ;;  %vm6033_vm10 = vmmov %vm6021_vm0  ;;  %v3801_v2 = vunpack.i.h.bf16 %v3799_v12  ;;  %v3800_v39 = vunpack.i.l.bf16 %v3799_v12  ;;  %vm6039_vm0 = vnez %v6038_v48 }
 0x140   : > { %v2010_v18 = vsel %vm6033_vm10, %v938_v11, %v3775_v47  ;;  %v3796_v54 = vunpack.i.h.bf16 %v3794_v17  ;;  %v3795_v20 = vunpack.i.l.bf16 %v3794_v17  ;;  %2530 = vmatprep.mubr.bf16.mxu0 %v2214_v8  ;;  %vm6034_vm8 = vmmov %vm6026_vm5  ;;  %v1251_v21 = vsel %vm6039_vm0, 0.0, %v1219_v10  ;;  %v6058_v8 = vld [vmem:[#allocation22_spill] sm:$0xff] }
 0x141   : > { %v2043_v62 = vsel %vm6034_vm8, %v2010_v18, %v3785_v42  ;;  %vm6035_vm14 = vmmov %vm6026_vm5  ;;  %v2233_v25 = vpack.c.bf16 %v1251_v21, %v1218_v41 }
 0x142   : > { %v2044_v38 = vsel %vm6035_vm14, %v2011_v53, %v3786_v15  ;;  %v3809_v50 = vpop.permute.xlu0 %3808  ;;  %vm6036_vm2 = vmmov %vm6030_vm3 }
 0x143   : > { %v2076_v37 = vsel %vm6036_vm2, %v2043_v62, %v3795_v20  ;;  %vm6037_vm11 = vmmov %vm6036_vm2  ;;  %v3804_v44 = vpop.permute.xlu1 %3803  ;;  %v3811_v4 = vunpack.i.h.bf16 %v3809_v50  ;;  %v3810_v40 = vunpack.i.l.bf16 %v3809_v50 }
 0x144   : > { %v2077_v52 = vsel %vm6037_vm11, %v2044_v38, %v3796_v54  ;;  %vm6040_vm13 = vmmov %vm6028_vm7  ;;  %v3805_v32 = vunpack.i.l.bf16 %v3804_v44 }
 0x145   : > { %v2213_v6 = vpack.c.bf16 %v2077_v52, %v2076_v37  ;;  %v2111_v5 = vsel %vm6040_vm13, %v4982_v0, %v3801_v2  ;;  %vm6041_vm1 = vmmov %vm6028_vm7  ;;  %vm6045_vm7 = vnez %v5881_v35 }
 0x146   : > { %v2110_v56 = vsel %vm6041_vm1, %v4980_v29, %v3800_v39  ;;  %vm6042_vm5 = vmmov %vm6041_vm1  ;;  %v3819_v1 = vpop.permute.xlu0 %3818  ;;  %v940_v9 = vsel %vm6045_vm7, 0.0, %v3935_v26  ;;  %v3806_v29 = vunpack.i.h.bf16 %v3804_v44 }
 0x147   : > { %2531 = vmatmul.mubr.bf16.gmra.mxu0 %v2213_v6  ;;  %3306 = vmatmul.mubr.msk.bf16.gmra.mxu1 %vm6042_vm5, %v2227_v7  ;;  %vm6044_vm15 = vmmov %vm6041_vm1  ;;  %v3821_v19 = vunpack.i.h.bf16 %v3819_v1  ;;  %v3820_v59 = vunpack.i.l.bf16 %v3819_v1  ;;  %v3814_v49 = vpop.permute.xlu1 %3813  ;;  %v3937_v7 = vld [vmem:[#allocation2 + $0xb7] sm:$0xff]  ;;  %v3938_v6 = vld [vmem:[#allocation2 + $0xbf] sm:$0xff] }
 0x148   : > { %3309 = vmatprep.mubr.msk.bf16.mxu1 %vm6044_vm15, %v6043_v33  ;;  %vm6046_vm6 = vmmov %vm6034_vm8  ;;  %v3816_v46 = vunpack.i.h.bf16 %v3814_v49  ;;  %v3815_v22 = vunpack.i.l.bf16 %v3814_v49  ;;  %v942_v57 = vsel %vm5066_vm4, 0.0, %v3937_v7 }
 0x149   : > { %v2142_v0 = vsel %vm6046_vm6, %v2110_v56, %v3810_v40  ;;  %vm6047_vm3 = vmmov %vm6046_vm6 }
 0x14a   : > { %v2143_v34 = vsel %vm6047_vm3, %v2111_v5, %v3811_v4  ;;  %vm6048_vm9 = vmmov %vm6036_vm2  ;;  %v3829_v28 = vpop.permute.xlu0 %3828 }
 0x14b   : > { %v2174_v61 = vsel %vm6048_vm9, %v2142_v0, %v3820_v59  ;;  %vm6049_vm12 = vmmov %vm6036_vm2  ;;  %v3824_v35 = vpop.permute.xlu1 %3823  ;;  %v3831_v51 = vunpack.i.h.bf16 %v3829_v28  ;;  %v3830_v3 = vunpack.i.l.bf16 %v3829_v28 }
 0x14c   : > { %v2175_v13 = vsel %vm6049_vm12, %v2143_v34, %v3821_v19  ;;  %vm6050_vm10 = vmmov %vm6041_vm1  ;;  %v3826_v14 = vunpack.i.h.bf16 %v3824_v35  ;;  %v3825_v43 = vunpack.i.l.bf16 %v3824_v35 }
 0x14d   : > { %v2217_v63 = vpack.c.bf16 %v2175_v13, %v2174_v61  ;;  %v2013_v27 = vsel %vm6050_vm10, %v3936_v58, %v3806_v29  ;;  %vm6051_vm8 = vmmov %vm6041_vm1  ;;  %v2113_v12 = vsel %vm6041_vm1, %v6057_v16, %v3831_v51 }
 0x14e   : > { %v2012_v11 = vsel %vm6051_vm8, %v940_v9, %v3805_v32  ;;  %vm6052_vm14 = vmmov %vm6047_vm3  ;;  %v3839_v55 = vpop.permute.xlu0 %3838 }
 0x14f   : > { %2538 = vmatprep.mubr.bf16.mxu0 %v2217_v63  ;;  %v2045_v45 = vsel %vm6052_vm14, %v2012_v11, %v3815_v22  ;;  %vm6053_vm2 = vmmov %vm6047_vm3  ;;  %v3834_v47 = vpop.permute.xlu1 %3833  ;;  %v3841_v42 = vunpack.i.h.bf16 %v3839_v55  ;;  %v3840_v24 = vunpack.i.l.bf16 %v3839_v55 }
 0x150   : > { %v2046_v30 = vsel %vm6053_vm2, %v2013_v27, %v3816_v46  ;;  %vm6054_vm11 = vmmov %vm6041_vm1  ;;  %v3836_v38 = vunpack.i.h.bf16 %v3834_v47  ;;  %v3835_v2 = vunpack.i.l.bf16 %v3834_v47 }
 0x151   : > { %3310 = vmatmul.mubr.msk.bf16.gmra.mxu1 %vm6054_vm11, %v2233_v25  ;;  %vm6055_vm0 = vmmov %vm6048_vm9 }
 0x152   : > { %v2078_v36 = vsel %vm6055_vm0, %v2045_v45, %v3825_v43  ;;  %vm6056_vm13 = vmmov %vm6055_vm0  ;;  %v3849_v23 = vpop.permute.xlu0 %3848 }
 0x153   : > { %v2079_v31 = vsel %vm6056_vm13, %v2046_v30, %v3826_v14  ;;  %vm6059_vm5 = vmmov %vm6041_vm1  ;;  %v3851_v53 = vunpack.i.h.bf16 %v3849_v23  ;;  %v3850_v18 = vunpack.i.l.bf16 %v3849_v23  ;;  %v3844_v54 = vpop.permute.xlu1 %3843 }
 0x154   : > { %v2216_v15 = vpack.c.bf16 %v2079_v31, %v2078_v36  ;;  %v2112_v17 = vsel %vm6059_vm5, %v6058_v8, %v3830_v3  ;;  %vm6060_vm15 = vmmov %vm6053_vm2  ;;  %v3846_v39 = vunpack.i.h.bf16 %v3844_v54  ;;  %v3845_v10 = vunpack.i.l.bf16 %v3844_v54 }
 0x155   : > { %v2144_v20 = vsel %vm6060_vm15, %v2112_v17, %v3840_v24  ;;  %vm6061_vm7 = vmmov %vm6053_vm2 }
 0x156   : > { %2539 = vmatmul.mubr.bf16.gmra.mxu0 %v2216_v15  ;;  %v2145_v62 = vsel %vm6061_vm7, %v2113_v12, %v3841_v42  ;;  %vm6062_vm6 = vmmov %vm6055_vm0 }
 0x157   : > { %v2176_v50 = vsel %vm6062_vm6, %v2144_v20, %v3850_v18  ;;  %vm6063_vm3 = vmmov %vm6055_vm0  ;;  %v3854_v44 = vpop.permute.xlu1 %3853 }
 0x158   : > { %v2177_v37 = vsel %vm6063_vm3, %v2145_v62, %v3851_v53  ;;  %vm6064_vm9 = vmmov %vm6041_vm1  ;;  %v3856_v40 = vunpack.i.h.bf16 %v3854_v44  ;;  %v3855_v41 = vunpack.i.l.bf16 %v3854_v44 }
 0x159   : > { %v2220_v52 = vpack.c.bf16 %v2177_v37, %v2176_v50  ;;  %v2015_v60 = vsel %vm6064_vm9, %v3938_v6, %v3836_v38  ;;  %vm6065_vm4 = vmmov %vm6041_vm1 }
 0x15a   : > { %v2014_v4 = vsel %vm6065_vm4, %v942_v57, %v3835_v2  ;;  %vm6066_vm12 = vmmov %vm6053_vm2 }
 0x15b   : > { %2546 = vmatprep.mubr.bf16.mxu0 %v2220_v52  ;;  %v2047_v48 = vsel %vm6066_vm12, %v2014_v4, %v3845_v10  ;;  %vm6067_vm10 = vmmov %vm6053_vm2 }
 0x15c   : > { %v2048_v21 = vsel %vm6067_vm10, %v2015_v60, %v3846_v39  ;;  %vm6068_vm8 = vmmov %vm6055_vm0 }
 0x15d   : > { %v2080_v5 = vsel %vm6068_vm8, %v2047_v48, %v3855_v41  ;;  %vm6069_vm14 = vmmov %vm6055_vm0 }
 0x15e   : > { %v2081_v56 = vsel %vm6069_vm14, %v2048_v21, %v3856_v40  ;;  %vm6070_vm2 = vmmov %vm6041_vm1 }
 0x15f   : > { %v2219_v1 = vpack.c.bf16 %v2081_v56, %v2080_v5  ;;  %vm6071_vm11 = vmmov %vm6041_vm1 }
 0x160   : > { %vm6072_vm0 = vmmov %vm6041_vm1 }
 0x161   : > { %2547 = vmatmul.mubr.bf16.gmra.mxu0 %v2219_v1  ;;  %vm6073_vm13 = vmmov %vm6072_vm0 }
 0x162   : > { %vm6074_vm1 = vmmov %vm6072_vm0 }
 0x163   : > { %vm6075_vm5 = vmmov %vm6072_vm0 }
 0x164   : > { %vm6076_vm15 = vmmov %vm6072_vm0 }
 0x165   : > { %vm6077_vm7 = vmmov %vm6072_vm0 }
 0x166   : > { %vm6078_vm6 = vmmov %vm6072_vm0 }
 0x167   : > { %vm6079_vm3 = vmmov %vm6072_vm0 }
 0x168   : > { %vm6080_vm9 = vmmov %vm6072_vm0 }
 0x169   : > { %vm6081_vm4 = vmmov %vm6072_vm0 }
 0x16a   : > { %vm6082_vm12 = vmmov %vm6072_vm0 }
 0x16b   : > { %vm6083_vm10 = vmmov %vm6072_vm0 }
 0x16c   : > { %vm6084_vm8 = vmmov %vm6072_vm0 }
 0x16d   : > { %v3163_v25 = vpop.f32.mrf.mxu0  ;;  %vm6085_vm14 = vmmov %vm6072_vm0 }
 0x16f   : > { %v3164_v0 = vpop.f32.mrf.mxu0 }
 0x170   : > { %v3165_v62 = vadd.f32 %v3164_v0, %v3163_v25 }
 0x171   : > { %v3166_v34 = vpop.f32.mrf.mxu0 }
 0x173   : > { %v3167_v29 = vpop.f32.mrf.mxu0 }
 0x174   : > { %v3168_v44 = vadd.f32 %v3167_v29, %v3166_v34 }
 0x176   : > { %v3169_v32 = vpop.f32.mrf.mxu0 }
 0x178   : > { %v3170_v13 = vpop.f32.mrf.mxu0 }
 0x179   : > { %v3171_v18 = vadd.f32 %v3170_v13, %v3169_v32 }
 0x17a   : > { %v3172_v58 = vpop.f32.mrf.mxu0 }
 0x17c   : > { %v3173_v27 = vpop.f32.mrf.mxu0 }
 0x17d   : > { %v3174_v10 = vadd.f32 %v3173_v27, %v3172_v58 }
 0x185   : > { %v3235_v33 = vpop.f32.mrf.mxu1 }
 0x187   : > { %v3236_v26 = vpop.f32.mrf.mxu1 }
 0x188   : > { %v5349_v9 = vadd.f32 %v3236_v26, %v3235_v33 }
 0x189   : > { %v3238_v19 = vpop.f32.mrf.mxu1 }
 0x18b   : > { %v3239_v59 = vpop.f32.mrf.mxu1 }
 0x18c   : > { %v5351_v49 = vadd.f32 %v3239_v59, %v3238_v19 }
 0x18d   : > { %v3175_v11 = vpop.f32.mrf.mxu0 }
 0x18f   : > { %v3176_v14 = vpop.f32.mrf.mxu0 }
 0x190   : > { %v3177_v48 = vadd.f32 %v3176_v14, %v3175_v11 }
 0x191   : > { %v3178_v43 = vpop.f32.mrf.mxu0 }
 0x193   : > { %v3179_v30 = vpop.f32.mrf.mxu0 }
 0x19d   : > { %v3241_v46 = vpop.f32.mrf.mxu1 }
 0x19f   : > { %v3242_v22 = vpop.f32.mrf.mxu1 }
 0x1a0   : > { %v5353_v61 = vadd.f32 %v3242_v22, %v3241_v46  ;;  %v3180_v46 = vadd.f32 %v3179_v30, %v3178_v43 }
 0x1a1   : > { %v3244_v28 = vpop.f32.mrf.mxu1 }
 0x1a3   : > { %v3245_v63 = vpop.f32.mrf.mxu1 }
 0x1a4   : > { %v5355_v35 = vadd.f32 %v3245_v63, %v3244_v28 }
 0x1a5   : > { %v3181_v55 = vpop.f32.mrf.mxu0 }
 0x1a7   : > { %v3182_v15 = vpop.f32.mrf.mxu0 }
 0x1a8   : > { %v3183_v4 = vadd.f32 %v3182_v15, %v3181_v55 }
 0x1a9   : > { %v3184_v42 = vpop.f32.mrf.mxu0 }
 0x1ab   : > { %v3185_v24 = vpop.f32.mrf.mxu0 }
 0x1ac   : > { %v3186_v25 = vadd.f32 %v3185_v24, %v3184_v42 }
 0x1b5   : > { %v3247_v45 = vpop.f32.mrf.mxu1 }
 0x1b7   : > { %v3248_v51 = vpop.f32.mrf.mxu1 }
 0x1b8   : > { %v5357_v3 = vadd.f32 %v3248_v51, %v3247_v45 }
 0x1b9   : > { %v3250_v36 = vpop.f32.mrf.mxu1 }
 0x1bb   : > { %v3251_v31 = vpop.f32.mrf.mxu1 }
 0x1bc   : > { %v5359_v47 = vadd.f32 %v3251_v31, %v3250_v36 }
 0x1bd   : > { %v3187_v16 = vpop.f32.mrf.mxu0 }
 0x1bf   : > { %v3188_v12 = vpop.f32.mrf.mxu0 }
 0x1c0   : > { %v3189_v36 = vadd.f32 %v3188_v12, %v3187_v16 }
 0x1c1   : > { %v5363_v17 = vpop.f32.mrf.mxu0 }
 0x1c3   : > { %v5369_v57 = vpop.f32.mrf.mxu0 }
 0x1c4   : > { %v3192_v12 = vadd.f32 %v5369_v57, %v5363_v17 }
 0x1cd   : > { %v5361_v8 = vpop.f32.mrf.mxu1 }
 0x1cf   : > { %v5365_v23 = vpop.f32.mrf.mxu1 }
 0x1d1   : > { %v5367_v7 = vpop.f32.mrf.mxu1 }
 0x1d3   : > { %v5371_v53 = vpop.f32.mrf.mxu1 }
 0x1d5   : > { %v3193_v54 = vpop.f32.mrf.mxu0  ;;  %v3283_v20 = vpop.f32.mrf.mxu1 }
 0x1d6   : > { %v2630_v38 = vadd.f32 %v3283_v20, %v3171_v18 }
 0x1d7   : > { %v3194_v2 = vpop.f32.mrf.mxu0  ;;  %v2621_v39 = vpop.f32.mrf.mxu1 }
 0x1d8   : > { %2750 = vst.msk [vmem:[%s5378_s26 + $0x10] sm:$0xff] %vm6070_vm2, %v2630_v38  ;;  %v2622_v50 = vadd.f32 %v3165_v62, %v2621_v39  ;;  %v2853_v22 = vmul.f32 %v2630_v38, %v2630_v38  ;;  %v2783_v11 = vsel %vm6080_vm9, %v2630_v38, 0.0  ;;  %v3195_v45 = vadd.f32 %v3194_v2, %v3193_v54  ;;  %vm6086_vm2 = vmmov %vm6072_vm0 }
 0x1d9   : > { %v3284_v37 = vpop.f32.mrf.mxu1  ;;  %v3196_v6 = vpop.f32.mrf.mxu0  ;;  %vm6095_vm9 = vmmov %vm6072_vm0 }
 0x1da   : > { %2748 = vst.msk [vmem:[%s5378_s26] sm:$0xff] %vm6071_vm11, %v2622_v50  ;;  %v2633_v52 = vadd.f32 %v3284_v37, %v3174_v10  ;;  %v2851_v21 = vmul.f32 %v2622_v50, %v2622_v50  ;;  %v2780_v19 = vsel %vm6075_vm5, %v2622_v50, 0.0  ;;  %v2886_v30 = vsel %vm6082_vm12, %v2853_v22, 0.0  ;;  %vm6087_vm11 = vmmov %vm6072_vm0 }
 0x1db   : > { %v2624_v60 = vpop.f32.mrf.mxu1  ;;  %v3197_v56 = vpop.f32.mrf.mxu0  ;;  %vm6090_vm5 = vmmov %vm6072_vm0 }
 0x1dc   : > { %2751 = vst.msk [vmem:[%s5378_s26 + $0x18] sm:$0xff] %vm6072_vm0, %v2633_v52  ;;  %v2625_v40 = vadd.f32 %v3168_v44, %v2624_v60  ;;  %v2883_v13 = vsel %vm6078_vm6, %v2851_v21, 0.0  ;;  %v2854_v55 = vmul.f32 %v2633_v52, %v2633_v52  ;;  %v2785_v18 = vsel %vm6084_vm8, %v2633_v52, 0.0  ;;  %vm6093_vm6 = vmmov %vm6072_vm0 }
 0x1dd   : > { %v3287_v41 = vpop.f32.mrf.mxu1  ;;  %v3198_v54 = vadd.f32 %v3197_v56, %v3196_v6  ;;  %vm6097_vm12 = vmmov %vm6072_vm0 }
 0x1de   : > { %v5386_v5 = vadd.f32 %v3287_v41, %v3183_v4  ;;  %2749 = vst.msk [vmem:[%s5378_s26 + $0x8] sm:$0xff] %vm6073_vm13, %v2625_v40  ;;  %v2781_v1 = vsel %vm6074_vm1, %v2625_v40, 0.0  ;;  %v2852_v33 = vmul.f32 %v2625_v40, %v2625_v40  ;;  %v2888_v2 = vsel %vm6086_vm2, %v2854_v55, 0.0  ;;  %vm6088_vm13 = vmmov %vm6072_vm0 }
 0x1df   : > { %v2637_v26 = vpop.f32.mrf.mxu1  ;;  %v2782_v0 = vadd.f32 %v2781_v1, %v2780_v19  ;;  %vm6089_vm1 = vmmov %vm6072_vm0 }
 0x1e0   : > { %2754 = vst.msk [vmem:[%s5378_s26 + $0x30] sm:$0xff] %vm6076_vm15, %v5386_v5  ;;  %v2638_v59 = vadd.f32 %v3177_v48, %v2637_v26  ;;  %v2884_v34 = vsel %vm6077_vm7, %v2852_v33, 0.0  ;;  %vm6091_vm15 = vmmov %vm6072_vm0 }
 0x1e1   : > { %v3199_v29 = vpop.f32.mrf.mxu0  ;;  %v3288_v32 = vpop.f32.mrf.mxu1  ;;  %v2885_v28 = vadd.f32 %v2884_v34, %v2883_v13  ;;  %v2784_v51 = vadd.f32 %v2783_v11, %v2782_v0  ;;  %vm6092_vm7 = vmmov %vm6072_vm0  ;;  %v2857_v0 = vmul.f32 %v5386_v5, %v5386_v5 }
 0x1e2   : > { %2752 = vst.msk [vmem:[%s5378_s26 + $0x20] sm:$0xff] %vm6079_vm3, %v2638_v59  ;;  %v5399_v63 = vadd.f32 %v3288_v32, %v3186_v25  ;;  %v2855_v39 = vmul.f32 %v2638_v59, %v2638_v59  ;;  %v2787_v52 = vsel %vm6072_vm0, %v2638_v59, 0.0  ;;  %vm6094_vm3 = vmmov %vm6072_vm0 }
 0x1e3   : > { %v3200_v58 = vpop.f32.mrf.mxu0  ;;  %v2640_v27 = vpop.f32.mrf.mxu1  ;;  %v2887_v31 = vadd.f32 %v2886_v30, %v2885_v28  ;;  %v2786_v20 = vadd.f32 %v2785_v18, %v2784_v51  ;;  %v2791_v13 = vsel %vm6094_vm3, %v5386_v5, 0.0  ;;  %vm6099_vm8 = vmmov %vm6072_vm0 }
 0x1e4   : > { %v2641_v14 = vadd.f32 %v3180_v46, %v2640_v27  ;;  %2755 = vst.msk [vmem:[%s5378_s26 + $0x38] sm:$0xff] %vm6081_vm4, %v5399_v63  ;;  %v2890_v41 = vsel %vm6089_vm1, %v2855_v39, 0.0  ;;  %v3201_v17 = vadd.f32 %v3200_v58, %v3199_v29  ;;  %vm6096_vm4 = vmmov %vm6072_vm0 }
 0x1e5   : > { %v3291_v43 = vpop.f32.mrf.mxu1  ;;  %v3202_v15 = vpop.f32.mrf.mxu0  ;;  %v2889_v10 = vadd.f32 %v2888_v2, %v2887_v31  ;;  %v2788_v6 = vadd.f32 %v2787_v52, %v2786_v20  ;;  %vm6101_vm2 = vmmov %vm6072_vm0 }
 0x1e6   : > { %2753 = vst.msk [vmem:[%s5378_s26 + $0x28] sm:$0xff] %vm6083_vm10, %v2641_v14  ;;  %v5408_v42 = vadd.f32 %v3291_v43, %v3195_v45  ;;  %v2856_v44 = vmul.f32 %v2641_v14, %v2641_v14  ;;  %v2789_v57 = vsel %vm6090_vm5, %v2641_v14, 0.0  ;;  %v2894_v14 = vsel %vm6096_vm4, %v2857_v0, 0.0  ;;  %vm6098_vm10 = vmmov %vm6072_vm0 }
 0x1e7   : > { %v2653_v24 = vpop.f32.mrf.mxu1  ;;  %v3203_v50 = vpop.f32.mrf.mxu0  ;;  %v2891_v48 = vadd.f32 %v2890_v41, %v2889_v10  ;;  %v2790_v19 = vadd.f32 %v2789_v57, %v2788_v6  ;;  %v2858_v45 = vmul.f32 %v5399_v63, %v5399_v63  ;;  %v2793_v30 = vsel %vm6098_vm10, %v5399_v63, 0.0  ;;  %vm6104_vm1 = vmmov %vm6072_vm0 }
 0x1e8   : > { %2758 = vst.msk [vmem:[%s5378_s26 + $0x50] sm:$0xff] %vm6085_vm14, %v5408_v42  ;;  %v2654_v62 = vadd.f32 %v3189_v36, %v2653_v24  ;;  %v2892_v1 = vsel %vm6092_vm7, %v2856_v44, 0.0  ;;  %v3204_v32 = vadd.f32 %v3203_v50, %v3202_v15  ;;  %vm6100_vm14 = vmmov %vm6072_vm0  ;;  %v2861_v57 = vmul.f32 %v5408_v42, %v5408_v42 }
 0x1e9   : > { %v3292_v38 = vpop.f32.mrf.mxu1  ;;  %v2893_v29 = vadd.f32 %v2892_v1, %v2891_v48  ;;  %v2792_v28 = vadd.f32 %v2791_v13, %v2790_v19  ;;  %v2896_v15 = vsel %vm6100_vm14, %v2858_v45, 0.0  ;;  %vm6105_vm5 = vmmov %vm6072_vm0 }
 0x1ea   : > { %v5415_v16 = vadd.f32 %v3292_v38, %v3198_v54  ;;  %2756 = vst.msk [vmem:[%s5378_s26 + $0x40] sm:$0xff] %vm6087_vm11, %v2654_v62  ;;  %v2859_v24 = vmul.f32 %v2654_v62, %v2654_v62  ;;  %v2795_v38 = vsel %vm6101_vm2, %v2654_v62, 0.0  ;;  %vm6102_vm11 = vmmov %vm6072_vm0 }
 0x1eb   : > { %v2656_v37 = vpop.f32.mrf.mxu1  ;;  %v2895_v51 = vadd.f32 %v2894_v14, %v2893_v29  ;;  %v2794_v55 = vadd.f32 %v2793_v30, %v2792_v28  ;;  %vm6107_vm7 = vmmov %vm6072_vm0 }
 0x1ec   : > { %2759 = vst.msk [vmem:[%s5378_s26 + $0x58] sm:$0xff] %vm6088_vm13, %v5415_v16  ;;  %v2657_v60 = vadd.f32 %v3192_v12, %v2656_v37  ;;  %v2898_v50 = vsel %vm6102_vm11, %v2859_v24, 0.0  ;;  %vm6103_vm13 = vmmov %vm6072_vm0 }
 0x1ed   : > { %v3205_v4 = vpop.f32.mrf.mxu0  ;;  %v3295_v40 = vpop.f32.mrf.mxu1  ;;  %v2897_v18 = vadd.f32 %v2896_v15, %v2895_v51  ;;  %v2796_v12 = vadd.f32 %v2795_v38, %v2794_v55  ;;  %vm6109_vm3 = vmmov %vm6072_vm0  ;;  %v3255_v55 = vadd.f32 %v5365_v23, %v5361_v8 }
 0x1ee   : > { %2757 = vst.msk [vmem:[%s5378_s26 + $0x48] sm:$0xff] %vm6091_vm15, %v2657_v60  ;;  %v2860_v2 = vmul.f32 %v2657_v60, %v2657_v60  ;;  %v2797_v37 = vsel %vm6072_vm0, %v2657_v60, 0.0  ;;  %vm6106_vm15 = vmmov %vm6072_vm0 }
 0x1ef   : > { %v3206_v21 = vpop.f32.mrf.mxu0  ;;  %v2669_v56 = vpop.f32.mrf.mxu1  ;;  %v2899_v44 = vadd.f32 %v2898_v50, %v2897_v18  ;;  %v2798_v41 = vadd.f32 %v2797_v37, %v2796_v12  ;;  %vm6111_vm4 = vmmov %vm6072_vm0 }
 0x1f0   : > { %v3207_v33 = vadd.f32 %v3206_v21, %v3205_v4  ;;  %v5430_v26 = vadd.f32 %v3201_v17, %v2669_v56  ;;  %v2799_v56 = vsel %vm6105_vm5, %v5408_v42, 0.0  ;;  %vm6113_vm10 = vmmov %vm6072_vm0 }
 0x1f1   : > { %v3208_v59 = vpop.f32.mrf.mxu0  ;;  %v3296_v25 = vpop.f32.mrf.mxu1  ;;  %v2800_v1 = vadd.f32 %v2799_v56, %v2798_v41  ;;  %vm6115_vm14 = vmmov %vm6072_vm0 }
 0x1f2   : > { %v5434_v34 = vadd.f32 %v3295_v40, %v3207_v33  ;;  %2760 = vst.msk [vmem:[%s5378_s26 + $0x60] sm:$0xff] %vm6093_vm6, %v5430_v26  ;;  %v2900_v40 = vsel %vm6103_vm13, %v2860_v2, 0.0  ;;  %vm6108_vm6 = vmmov %vm6072_vm0  ;;  %v2863_v45 = vmul.f32 %v5430_v26, %v5430_v26 }
 0x1f3   : > { %v3209_v46 = vpop.f32.mrf.mxu0  ;;  %v2672_v22 = vpop.f32.mrf.mxu1  ;;  %v2901_v48 = vadd.f32 %v2900_v40, %v2899_v44  ;;  %v2801_v42 = vsel %vm6108_vm6, %v5415_v16, 0.0  ;;  %vm6116_vm2 = vmmov %vm6072_vm0 }
 0x1f4   : > { %2762 = vst.msk [vmem:[%s5378_s26 + $0x70] sm:$0xff] %vm6095_vm9, %v5434_v34  ;;  %v3210_v58 = vadd.f32 %v3209_v46, %v3208_v59  ;;  %v5444_v27 = vadd.f32 %v3204_v32, %v2672_v22  ;;  %v2902_v59 = vsel %vm6107_vm7, %v2861_v57, 0.0  ;;  %v2802_v28 = vadd.f32 %v2801_v42, %v2800_v1  ;;  %vm6110_vm9 = vmmov %vm6072_vm0 }
 0x1f5   : > { %v3299_v11 = vpop.f32.mrf.mxu1  ;;  %v2903_v29 = vadd.f32 %v2902_v59, %v2901_v48  ;;  %v2906_v23 = vsel %vm6115_vm14, %v2863_v45, 0.0  ;;  %vm6117_vm11 = vmmov %vm6072_vm0 }
 0x1f6   : > { %v5449_v43 = vadd.f32 %v3296_v25, %v3210_v58  ;;  %2761 = vst.msk [vmem:[%s5378_s26 + $0x68] sm:$0xff] %vm6097_vm12, %v5444_v27  ;;  %v2862_v25 = vmul.f32 %v5415_v16, %v5415_v16  ;;  %vm6112_vm12 = vmmov %vm6072_vm0 }
 0x1f7   : > { %v2685_v5 = vpop.f32.mrf.mxu1  ;;  %vm6118_vm13 = vmmov %vm6072_vm0 }
 0x1f8   : > { %2763 = vst.msk [vmem:[%s5378_s26 + $0x78] sm:$0xff] %vm6099_vm8, %v5449_v43  ;;  %vm6114_vm8 = vmmov %vm6072_vm0  ;;  %v2866_v40 = vmul.f32 %v5449_v43, %v5449_v43 }
 0x1f9   : > { %v3211_v36 = vpop.f32.mrf.mxu0  ;;  %v5459_v31 = vpop.f32.mrf.mxu1  ;;  %vm6120_vm5 = vmmov %vm6072_vm0 }
 0x1fa   : > { %vm6122_vm7 = vmmov %vm6072_vm0 }
 0x1fb   : > { %v3212_v54 = vpop.f32.mrf.mxu0  ;;  %v2688_v20 = vpop.f32.mrf.mxu1  ;;  %vm6123_vm6 = vmmov %vm6072_vm0 }
 0x1fc   : > { %v3213_v39 = vadd.f32 %v3212_v54, %v3211_v36  ;;  %v2803_v36 = vsel %vm6112_vm12, %v5430_v26, 0.0  ;;  %v2805_v26 = vsel %vm6116_vm2, %v5444_v27, 0.0  ;;  %vm6127_vm12 = vmmov %vm6072_vm0 }
 0x1fd   : > { %v3214_v63 = vpop.f32.mrf.mxu0  ;;  %v5463_v10 = vpop.f32.mrf.mxu1  ;;  %vm6130_vm14 = vmmov %vm6072_vm0 }
 0x1fe   : > { %v5467_v52 = vadd.f32 %v3213_v39, %v2685_v5  ;;  %vm6131_vm2 = vmmov %vm6072_vm0 }
 0x1ff   : > { %v3215_v6 = vpop.f32.mrf.mxu0  ;;  %v5469_v4 = vpop.f32.mrf.mxu1 }
 0x200   : > { %2764 = vst.msk [vmem:[%s5378_s26 + $0x80] sm:$0xff] %vm6104_vm1, %v5467_v52  ;;  %v3216_v62 = vadd.f32 %v3215_v6, %v3214_v63  ;;  %vm6119_vm1 = vmmov %vm6072_vm0  ;;  %v2865_v63 = vmul.f32 %v5434_v34, %v5434_v34  ;;  %v2867_v48 = vmul.f32 %v5467_v52, %v5467_v52 }
 0x201   : > { %v5475_v17 = vpop.f32.mrf.mxu1 }
 0x202   : > { %v5479_v60 = vadd.f32 %v3216_v62, %v2688_v20  ;;  %v2910_v57 = vsel %vm6123_vm6, %v2865_v63, 0.0  ;;  %vm6138_vm6 = vmmov %vm6072_vm0 }
 0x203   : > { %v5481_v21 = vpop.f32.mrf.mxu1 }
 0x204   : > { %2765 = vst.msk [vmem:[%s5378_s26 + $0x88] sm:$0xff] %vm6106_vm15, %v5479_v60  ;;  %vm6121_vm15 = vmmov %vm6072_vm0 }
 0x205   : > { %v2807_v44 = vsel %vm6121_vm15, %v5434_v34, 0.0  ;;  %vm6136_vm15 = vmmov %vm6072_vm0 }
 0x207   : > { %v3217_v33 = vpop.f32.mrf.mxu0  ;;  %v3307_v19 = vpop.f32.mrf.mxu1 }
 0x208   : > { %v5492_v0 = vadd.f32 %v3307_v19, %v5353_v61  ;;  %v2904_v61 = vsel %vm6110_vm9, %v2862_v25, 0.0  ;;  %vm6125_vm9 = vmmov %vm6072_vm0  ;;  %v2868_v19 = vmul.f32 %v5479_v60, %v5479_v60 }
 0x209   : > { %v3218_v32 = vpop.f32.mrf.mxu0  ;;  %v2717_v46 = vpop.f32.mrf.mxu1  ;;  %v2905_v16 = vadd.f32 %v2904_v61, %v2903_v29 }
 0x20a   : > { %2774 = vst.msk [vmem:[%s5378_s26 + $0xd0] sm:$0xff] %vm6109_vm3, %v5492_v0  ;;  %v3219_v22 = vadd.f32 %v3218_v32, %v3217_v33  ;;  %v5500_v13 = vadd.f32 %v5349_v9, %v2717_v46  ;;  %vm6124_vm3 = vmmov %vm6072_vm0  ;;  %v2813_v32 = vsel %vm6130_vm14, %v5479_v60, 0.0 }
 0x20b   : > { %v3220_v58 = vpop.f32.mrf.mxu0  ;;  %v3308_v14 = vpop.f32.mrf.mxu1  ;;  %v2907_v20 = vadd.f32 %v2906_v23, %v2905_v16  ;;  %vm6145_vm14 = vmmov %vm6072_vm0 }
 0x20c   : > { %v5505_v51 = vadd.f32 %v3299_v11, %v3219_v22  ;;  %2772 = vst.msk [vmem:[%s5378_s26 + $0xc0] sm:$0xff] %vm6111_vm4, %v5500_v13  ;;  %v5511_v5 = vadd.f32 %v3308_v14, %v5355_v35  ;;  %v2864_v11 = vmul.f32 %v5444_v27, %v5444_v27  ;;  %v2804_v35 = vadd.f32 %v2803_v36, %v2802_v28  ;;  %vm6126_vm4 = vmmov %vm6072_vm0 }
 0x20d   : > { %v3221_v9 = vpop.f32.mrf.mxu0  ;;  %v2720_v30 = vpop.f32.mrf.mxu1  ;;  %v2811_v33 = vsel %vm6126_vm4, %v5467_v52, 0.0  ;;  %v2916_v22 = vsel %vm6131_vm2, %v2868_v19, 0.0  ;;  %vm6141_vm4 = vmmov %vm6072_vm0 }
 0x20e   : > { %2766 = vst.msk [vmem:[%s5378_s26 + $0x90] sm:$0xff] %vm6113_vm10, %v5505_v51  ;;  %v3222_v15 = vadd.f32 %v3221_v9, %v3220_v58  ;;  %v5526_v24 = vadd.f32 %v5351_v49, %v2720_v30  ;;  %v3258_v49 = vadd.f32 %v5371_v53, %v5367_v7  ;;  %v2908_v2 = vsel %vm6072_vm0, %v2864_v11, 0.0  ;;  %vm6128_vm10 = vmmov %vm6072_vm0 }
 0x20f   : > { %2775 = vst.msk [vmem:[%s5378_s26 + $0xd8] sm:$0xff] %vm6114_vm8, %v5511_v5  ;;  %v2806_v27 = vadd.f32 %v2805_v26, %v2804_v35  ;;  %v2909_v7 = vadd.f32 %v2908_v2, %v2907_v20  ;;  %vm6129_vm8 = vmmov %vm6072_vm0 }
 0x210   : > { %v2697_v18 = vadd.f32 %v5459_v31, %v3222_v15  ;;  %2773 = vst.msk [vmem:[%s5378_s26 + $0xc8] sm:$0xff] %vm6117_vm11, %v5526_v24  ;;  %v2914_v29 = vsel %vm6129_vm8, %v2867_v48, 0.0  ;;  %vm6132_vm11 = vmmov %vm6072_vm0 }
 0x211   : > { %v3311_v8 = vpop.f32.mrf.mxu1  ;;  %v2808_v62 = vadd.f32 %v2807_v44, %v2806_v27  ;;  %v2911_v56 = vadd.f32 %v2910_v57, %v2909_v7  ;;  %v2815_v28 = vsel %vm6132_vm11, %v5505_v51, 0.0  ;;  %vm6144_vm8 = vmmov %vm6072_vm0 }
 0x212   : > { %v5532_v54 = vadd.f32 %v3311_v8, %v3255_v55  ;;  %2767 = vst.msk [vmem:[%s5378_s26 + $0x98] sm:$0xff] %vm6118_vm13, %v2697_v18  ;;  %v2870_v58 = vmul.f32 %v2697_v18, %v2697_v18  ;;  %vm6133_vm13 = vmmov %vm6072_vm0 }
 0x213   : > { %v2733_v38 = vpop.f32.mrf.mxu1  ;;  %vm6146_vm2 = vmmov %vm6072_vm0 }
 0x214   : > { %2778 = vst.msk [vmem:[%s5378_s26 + $0xf0] sm:$0xff] %vm6119_vm1, %v5532_v54  ;;  %v5546_v31 = vadd.f32 %v5357_v3, %v2733_v38  ;;  %vm6134_vm1 = vmmov %vm6072_vm0 }
 0x215   : > { %v3312_v12 = vpop.f32.mrf.mxu1  ;;  %v2817_v16 = vsel %vm6134_vm1, %v2697_v18, 0.0  ;;  %vm6147_vm11 = vmmov %vm6072_vm0 }
 0x216   : > { %v3223_v39 = vpop.f32.mrf.mxu0  ;;  %v5550_v50 = vadd.f32 %v3312_v12, %v3258_v49  ;;  %2776 = vst.msk [vmem:[%s5378_s26 + $0xe0] sm:$0xff] %vm6120_vm5, %v5546_v31  ;;  %vm6135_vm5 = vmmov %vm6072_vm0 }
 0x217   : > { %v2736_v37 = vpop.f32.mrf.mxu1  ;;  %v2920_v36 = vsel %vm6135_vm5, %v2870_v58, 0.0  ;;  %vm6149_vm1 = vmmov %vm6072_vm0 }
 0x218   : > { %v3224_v53 = vpop.f32.mrf.mxu0  ;;  %2779 = vst.msk [vmem:[%s5378_s26 + $0xf8] sm:$0xff] %vm6122_vm7, %v5550_v50  ;;  %v5561_v6 = vadd.f32 %v5359_v47, %v2736_v37  ;;  %v2809_v47 = vsel %vm6125_vm9, %v5449_v43, 0.0  ;;  %v2869_v43 = vmul.f32 %v5505_v51, %v5505_v51  ;;  %vm6137_vm7 = vmmov %vm6072_vm0 }
 0x219   : > { %v3225_v3 = vadd.f32 %v3224_v53, %v3223_v39  ;;  %v2810_v25 = vadd.f32 %v2809_v47, %v2808_v62  ;;  %vm6140_vm9 = vmmov %vm6072_vm0 }
 0x21a   : > { %v3226_v41 = vpop.f32.mrf.mxu0  ;;  %2777 = vst.msk [vmem:[%s5378_s26 + $0xe8] sm:$0xff] %vm6124_vm3, %v5561_v6  ;;  %v2918_v60 = vsel %vm6133_vm13, %v2869_v43, 0.0  ;;  %vm6139_vm3 = vmmov %vm6072_vm0 }
 0x21b   : > { %v2702_v34 = vadd.f32 %v3225_v3, %v5469_v4  ;;  %v2912_v4 = vsel %vm6128_vm10, %v2866_v40, 0.0  ;;  %v2812_v52 = vadd.f32 %v2811_v33, %v2810_v25  ;;  %v2875_v40 = vmul.f32 %v5500_v13, %v5500_v13  ;;  %vm6143_vm10 = vmmov %vm6072_vm0 }
 0x21c   : > { %v3227_v1 = vpop.f32.mrf.mxu0  ;;  %v2913_v42 = vadd.f32 %v2912_v4, %v2911_v56  ;;  %v2876_v56 = vmul.f32 %v5526_v24, %v5526_v24  ;;  %v2877_v33 = vmul.f32 %v5492_v0, %v5492_v0  ;;  %vm6148_vm13 = vmmov %vm6072_vm0 }
 0x21d   : > { %2768 = vst.msk [vmem:[%s5378_s26 + $0xa0] sm:$0xff] %vm6127_vm12, %v2702_v34  ;;  %v3228_v59 = vadd.f32 %v3227_v1, %v3226_v41  ;;  %v2814_v61 = vadd.f32 %v2813_v32, %v2812_v52  ;;  %v2871_v9 = vmul.f32 %v2702_v34, %v2702_v34  ;;  %v2819_v11 = vsel %vm6136_vm15, %v2702_v34, 0.0  ;;  %vm6142_vm12 = vmmov %vm6072_vm0 }
 0x21e   : > { %v2915_v14 = vadd.f32 %v2914_v29, %v2913_v42  ;;  %v2827_v34 = vsel %vm6145_vm14, %v5500_v13, 0.0  ;;  %v2930_v19 = vsel %vm6147_vm11, %v2875_v40, 0.0  ;;  %v2831_v13 = vsel %vm6148_vm13, %v5492_v0, 0.0  ;;  %vm6150_vm5 = vmmov %vm6072_vm0 }
 0x21f   : > { %v2705_v46 = vadd.f32 %v3228_v59, %v5481_v21  ;;  %v2816_v21 = vadd.f32 %v2815_v28, %v2814_v61  ;;  %v2922_v26 = vsel %vm6137_vm7, %v2871_v9, 0.0  ;;  %v2829_v59 = vsel %vm6072_vm0, %v5526_v24, 0.0  ;;  %vm6151_vm15 = vmmov %vm6072_vm0 }
 0x220   : > { %v2917_v30 = vadd.f32 %v2916_v22, %v2915_v14  ;;  %v2878_v29 = vmul.f32 %v5511_v5, %v5511_v5  ;;  %v2932_v32 = vsel %vm6149_vm1, %v2876_v56, 0.0  ;;  %v2934_v52 = vsel %vm6150_vm5, %v2877_v33, 0.0  ;;  %vm6152_vm7 = vmmov %vm6072_vm0 }
 0x221   : > { %2769 = vst.msk [vmem:[%s5378_s26 + $0xa8] sm:$0xff] %vm6072_vm0, %v2705_v46  ;;  %v3229_v45 = vpop.f32.mrf.mxu0  ;;  %v2872_v51 = vmul.f32 %v2705_v46, %v2705_v46  ;;  %v2818_v8 = vadd.f32 %v2817_v16, %v2816_v21  ;;  %v2821_v20 = vsel %vm6138_vm6, %v2705_v46, 0.0  ;;  %v2833_v42 = vsel %vm6151_vm15, %v5511_v5, 0.0  ;;  %vm6153_vm6 = vmmov %vm6072_vm0 }
 0x222   : > { %v2919_v35 = vadd.f32 %v2918_v60, %v2917_v30  ;;  %v2879_v24 = vmul.f32 %v5546_v31, %v5546_v31  ;;  %v2936_v58 = vsel %vm6152_vm7, %v2878_v29, 0.0  ;;  %v2835_v0 = vsel %vm6153_vm6, %v5546_v31, 0.0  ;;  %vm6160_vm14 = vmmov %vm6072_vm0 }
 0x223   : > { %v3230_v55 = vpop.f32.mrf.mxu0  ;;  %v2820_v49 = vadd.f32 %v2819_v11, %v2818_v8  ;;  %v2924_v27 = vsel %vm6139_vm3, %v2872_v51, 0.0  ;;  %v2880_v14 = vmul.f32 %v5561_v6, %v5561_v6  ;;  %v2881_v60 = vmul.f32 %v5532_v54, %v5532_v54  ;;  %vm6154_vm3 = vmmov %vm6072_vm0 }
 0x224   : > { %v3231_v15 = vadd.f32 %v3230_v55, %v3229_v45  ;;  %v2921_v38 = vadd.f32 %v2920_v36, %v2919_v35  ;;  %v2938_v5 = vsel %vm6154_vm3, %v2879_v24, 0.0  ;;  %v2882_v31 = vmul.f32 %v5550_v50, %v5550_v50 }
 0x225   : > { %v3232_v23 = vpop.f32.mrf.mxu0  ;;  %v2822_v53 = vadd.f32 %v2821_v20, %v2820_v49 }
 0x226   : > { %v2710_v18 = vadd.f32 %v5463_v10, %v3231_v15  ;;  %v2923_v7 = vadd.f32 %v2922_v26, %v2921_v38  ;;  %v2944_v8 = vsel %vm6160_vm14, %v2882_v31, 0.0 }
 0x227   : > { %v3233_v2 = vpop.f32.mrf.mxu0 }
 0x228   : > { %2770 = vst.msk [vmem:[%s5378_s26 + $0xb0] sm:$0xff] %vm6140_vm9, %v2710_v18  ;;  %v2823_v39 = vsel %vm6141_vm4, %v2710_v18, 0.0  ;;  %v2873_v12 = vmul.f32 %v2710_v18, %v2710_v18  ;;  %v3234_v63 = vadd.f32 %v3233_v2, %v3232_v23  ;;  %v2925_v3 = vadd.f32 %v2924_v27, %v2923_v7  ;;  %vm6155_vm9 = vmmov %vm6072_vm0 }
 0x229   : > { %v2824_v10 = vadd.f32 %v2823_v39, %v2822_v53  ;;  %v2837_v16 = vsel %vm6155_vm9, %v5561_v6, 0.0  ;;  %vm6156_vm4 = vmmov %vm6072_vm0 }
 0x22a   : > { %v2926_v37 = vsel %vm6142_vm12, %v2873_v12, 0.0  ;;  %v2713_v44 = vadd.f32 %v5475_v17, %v3234_v63  ;;  %v2839_v21 = vsel %vm6156_vm4, %v5532_v54, 0.0  ;;  %vm6157_vm12 = vmmov %vm6072_vm0 }
 0x22b   : > { %v2927_v57 = vadd.f32 %v2926_v37, %v2925_v3  ;;  %v2940_v55 = vsel %vm6157_vm12, %v2880_v14, 0.0 }
 0x22c   : > { %2771 = vst.msk [vmem:[%s5378_s26 + $0xb8] sm:$0xff] %vm6143_vm10, %v2713_v44  ;;  %v2825_v62 = vsel %vm6144_vm8, %v2713_v44, 0.0  ;;  %v2874_v41 = vmul.f32 %v2713_v44, %v2713_v44  ;;  %vm6158_vm10 = vmmov %vm6072_vm0 }
 0x22d   : > { %v2826_v48 = vadd.f32 %v2825_v62, %v2824_v10  ;;  %v2942_v51 = vsel %vm6158_vm10, %v2881_v60, 0.0  ;;  %vm6159_vm8 = vmmov %vm6072_vm0 }
 0x22e   : > { %v2928_v17 = vsel %vm6146_vm2, %v2874_v41, 0.0  ;;  %v2841_v15 = vsel %vm6159_vm8, %v5550_v50, 0.0  ;;  %vm2849_vm2 = vcmask 253952  }
 0x22f   : > { %v2828_v1 = vadd.f32 %v2827_v34, %v2826_v48  ;;  %v2929_v47 = vadd.f32 %v2928_v17, %v2927_v57 }
 0x231   : > { %v2830_v4 = vadd.f32 %v2829_v59, %v2828_v1  ;;  %v2931_v25 = vadd.f32 %v2930_v19, %v2929_v47 }
 0x233   : > { %v2832_v43 = vadd.f32 %v2831_v13, %v2830_v4  ;;  %v2933_v46 = vadd.f32 %v2932_v32, %v2931_v25 }
 0x235   : > { %v2834_v22 = vadd.f32 %v2833_v42, %v2832_v43  ;;  %v2935_v28 = vadd.f32 %v2934_v52, %v2933_v46 }
 0x237   : > { %v2836_v61 = vadd.f32 %v2835_v0, %v2834_v22  ;;  %v2937_v45 = vadd.f32 %v2936_v58, %v2935_v28 }
 0x239   : > { %v2838_v9 = vadd.f32 %v2837_v16, %v2836_v61  ;;  %v2939_v30 = vadd.f32 %v2938_v5, %v2937_v45 }
 0x23b   : > { %v2840_v36 = vadd.f32 %v2839_v21, %v2838_v9  ;;  %v2941_v11 = vadd.f32 %v2940_v55, %v2939_v30 }
 0x23d   : > { %v2842_v35 = vadd.f32 %v2841_v15, %v2840_v36  ;;  %v2943_v6 = vadd.f32 %v2942_v51, %v2941_v11 }
 0x23f   : > { %v2843_v23 = vrot.slane %v2842_v35, 4  ;;  %v2945_v26 = vadd.f32 %v2944_v8, %v2943_v6 }
 0x241   : > { %v2844_v54 = vadd.f32 %v2843_v23, %v2842_v35  ;;  %v2946_v20 = vrot.slane %v2945_v26, 4 }
 0x243   : > { %v2845_v18 = vrot.slane %v2844_v54, 2  ;;  %v2947_v38 = vadd.f32 %v2946_v20, %v2945_v26 }
 0x245   : > { %v2846_v49 = vadd.f32 %v2845_v18, %v2844_v54  ;;  %v2948_v2 = vrot.slane %v2947_v38, 2 }
 0x247   : > { %v2847_v50 = vrot.slane %v2846_v49, 1  ;;  %v2949_v27 = vadd.f32 %v2948_v2, %v2947_v38 }
 0x249   : > { %v2848_v39 = vadd.f32 %v2847_v50, %v2846_v49  ;;  %v2950_v12 = vrot.slane %v2949_v27, 1 }
 0x24b   : > { %2850 = vst.msk [vmem:[%s254_s12] sm:$0x1] %vm2849_vm2, %v2848_v39  ;;  %v2951_v63 = vadd.f32 %v2950_v12, %v2949_v27 }
 0x24c   : > { %3952 = shalt.err (!%p3949_p3)
}
 0x24d   : > { %s3953_s26 = scalar_lea.hbm %s5660_s27, 16  ;;  %s3957_s17 = scalar_lea.hbm %s5739_s5, 32 }
 0x24e   : > { %p3954_p4 = scmp.ne.s32.totalorder %s5660_s27, %s3953_s26  ;;  %p3958_p9 = scmp.lt.s32.totalorder %s5660_s27, %s5739_s5 }
 0x24f   : > { %p3959_p10 = scmp.lt.s32.totalorder %s3957_s17, %s3953_s26 }
 0x250   : > { %p3955_p7 = pnand %p3954_p4, %p4110_p5 }
 0x251   : > { %p3960_p11 = por %p3959_p10, %p3958_p9 }
 0x252   : > { %p3956_p8 = pneg %p3955_p7 }
 0x254   : > { %p3961_p12 = pnand %p3960_p11, %p3956_p8 }
 0x256   : > { %3964 = shalt.err (!%p3961_p12)
}
 0x257   : > { %3329 = dma.vmem_to_hbm [thread:$0]  (%p4110_p5), %s5662_s13, 16, %s5660_s27, %s2959_s8   ;;  %2952 = vst.msk [vmem:[%s260_s15] sm:$0x1] %vm2849_vm2, %v2951_v63 }
 0x258   : > { %s2963_s7 = scalar_lea.sflag [#allocation6], %s5650_s11  ;;  %s3965_s9 = scalar_lea.vmem %s5670_s16, 16 }
 0x259   : > { %p3966_p13 = scmp.ne.s32.totalorder %s5670_s16, %s3965_s9  ;;  %s4036_s10 = smov [#allocation5]  }
 0x25a   : > { %s3969_s20 = sshll.u32 %s4036_s10, 4  ;;  %s3970_s20 = int_to_ptr.vmem [resolvable:$false] %s3969_s20 }
 0x25b   : > { %p3967_p0 = pnand %p3966_p13, %p4110_p5  ;;  %s3971_s24 = scalar_lea.vmem %s3970_s20, 32 }
 0x25c   : > { %p3972_p2 = scmp.lt.s32.totalorder %s5670_s16, %s3970_s20  ;;  %p3973_p3 = scmp.lt.s32.totalorder %s3971_s24, %s3965_s9 }
 0x25d   : > { %p3968_p1 = pneg %p3967_p0 }
 0x25e   : > { %p3974_p4 = por %p3973_p3, %p3972_p2 }
 0x260   : > { %p3975_p7 = pnand %p3974_p4, %p3968_p1 }
 0x262   : > { %3978 = shalt.err (!%p3975_p7)
}
 0x263   : > { %s3979_s13 = scalar_lea.hbm %s5668_s19, 16  ;;  %s3983_s27 = scalar_lea.hbm %s5740_s6, 32 }
 0x264   : > { %p3980_p8 = scmp.ne.s32.totalorder %s5668_s19, %s3979_s13  ;;  %p3984_p11 = scmp.lt.s32.totalorder %s5668_s19, %s5740_s6 }
 0x265   : > { %p3985_p12 = scmp.lt.s32.totalorder %s3983_s27, %s3979_s13 }
 0x266   : > { %p3981_p9 = pnand %p3980_p8, %p4110_p5 }
 0x267   : > { %p3986_p13 = por %p3985_p12, %p3984_p11 }
 0x268   : > { %p3982_p10 = pneg %p3981_p9 }
 0x26a   : > { %p3987_p0 = pnand %p3986_p13, %p3982_p10 }
 0x26c   : > { %3990 = shalt.err (!%p3987_p0)
}
 0x26d   : > { %3330 = dma.vmem_to_hbm [thread:$0]  (%p4110_p5), %s5670_s16, 16, %s5668_s19, %s2963_s7  }
 0x26e PF: > { %p3340_p1 = scmp.ge.s32.totalorder %s4029_s22, 2  ;;  %s3011_s14 = sand.u32 1, %s4017_s1  }
 0x26f   : > { %s3012_s12 = scalar_lea.sflag [#allocation4], %s3011_s14 }
 0x270   : > { %p3334_p2 = pnand %p3340_p1, %p4114_p6 }
 0x272   : > { %p3335_p3 = pneg %p3334_p2 }
 0x274   : > { %4008 = dma.done.wait (%p3335_p3), %s3012_s12, 16  }
 0x275   : > { %4010 = vsyncadd (%p3335_p3), %s3012_s12, 4294967280  ;;  %s3020_s17 = scalar_lea.sflag [#allocation6], %s3011_s14 }
 0x276   : > { %4012 = dma.done.wait (%p3335_p3), %s3020_s17, 16  }
 0x277   : > { %4014 = vsyncadd (%p3335_p3), %s3020_s17, 4294967280  ;;  %p20_p5 = scmp.ge.s32.totalorder %s4097_s25, 4   ;;  %s6161_s1 = smov %s4021_s21 }
 0x278   : > { %s6162_s21 = smov %s4025_s2  ;;  %s6163_s2 = smov %s4108_s28 }
 0x279   : > { %s6164_s22 = smov %s4097_s25  ;;  %22 = sbr.rel (!%p20_p5) target bundleno = 5 (0x5), region = 100 }
 0x27e   :  { %3024 = vsyncpa [#allocation4], 1 }
 0x27f   :  { %3026 = vsyncpa [#allocation4 + $0x1], 1 }
 0x280   :  { %3027 = vsyncpa [#allocation6], 1 }
 0x281   :  { %3029 = vsyncpa [#allocation6 + $0x1], 1 }

</bundles_post_ra>
